<compile_context>
chip_gen: v7x
topology: tpu7x:2x2x1
jax: 0.10.0
libtpu: 0.0.40
codegen_flags: <defaults>
</compile_context>

<pallas_src>
import functools

import jax
import jax.numpy as jnp
from jax.experimental import pallas as pl
from jax.experimental.pallas import tpu as pltpu

# ----------------------------- config ---------------------------------------
MIN_NOTE = 20
NUM_NOTE = 64
HIDDEN = 32
MEL_SIZE = 16
DROPOUT = 0.0            # dropout is identity at 0.0 / eval time

ENC_DILS = (1, 3, 9, 27)
DEC_DILS = (1, 3, 9, 27, 1)


# ----------------------------- fused kernel ---------------------------------
def _fused_forward_kernel(idx_ref, embT_ref, cw_ref, cb_ref, hww_ref, hwb_ref,
                          ow_ref, ob_ref, out_ref, *, B, L):
    """Entire Model forward in one kernel (time-on-lanes layout).

    idx_ref : (1, B*L)   int32  raw note indices, lane g = b*L + t
    embT_ref: (H, NUM_NOTE)     transposed embedding table
    cw_ref  : (3, H, H)         pointwise (k=1) conv weights: enc0, dec0, dec1
    cb_ref  : (3, H, 1)         their biases
    hww_ref : (27, 2H, H)       highway per-tap weights, row 3*i+k is layer i,
                                tap k in {0:-d, 1:0, 2:+d}; output rows are
                                [gate(sigmoid) | value(relu)]
    hwb_ref : (9, 2H, 1)        highway biases (same row layout)
    ow_ref  : (MEL, H)          final mel projection
    ob_ref  : (MEL, 1)
    out_ref : (MEL, B*L)        lane-dense output
    """
    H = HIDDEN
    BL = B * L

    # ---- normalize + embedding lookup as a transposed one-hot matmul ----
    idx = idx_ref[...]                                        # (1, BL) int32
    idx = jnp.where(idx > 0, idx - MIN_NOTE, idx)
    idx = jnp.clip(idx, 0, NUM_NOTE - 1)
    rows = jax.lax.broadcasted_iota(jnp.int32, (NUM_NOTE, BL), 0)
    onehot = (rows == idx).astype(jnp.float32)                # (NUM_NOTE, BL)
    y = jnp.dot(embT_ref[...], onehot,
                preferred_element_type=jnp.float32)           # (H, BL)

    # ---- static per-dilation boundary masks (zero 'same' padding) ----
    pos = jax.lax.broadcasted_iota(jnp.int32, (H, BL), 1)

    def make_masks(d):
        ml = None   # left  tap x[:, t-d] valid  <=>  t >= d
        mr = None   # right tap x[:, t+d] valid  <=>  t <  L - d
        for b in range(B):
            lo = b * L
            sl = (pos >= lo + d) & (pos < lo + L)
            sr = (pos >= lo) & (pos < lo + L - d)
            ml = sl if ml is None else (ml | sl)
            mr = sr if mr is None else (mr | sr)
        return ml, mr

    masks = {d: make_masks(d) for d in sorted(set(ENC_DILS + DEC_DILS))}

    def conv1x1_relu(x, i):                                   # x: (H, BL)
        w = cw_ref[i]                                         # (H, H)
        b = cb_ref[i]                                         # (H, 1)
        return jnp.maximum(
            jnp.dot(w, x, preferred_element_type=jnp.float32) + b, 0.0)

    def highway(x, i, d):                                     # x: (H, BL)
        ml, mr = masks[d]
        # taps via lane rotation (wrap-around columns masked back to zero)
        t_l = jnp.where(ml, pltpu.roll(x, d, axis=1), 0.0)         # x[:, t-d]
        t_r = jnp.where(mr, pltpu.roll(x, BL - d, axis=1), 0.0)    # x[:, t+d]
        h = (jnp.dot(hww_ref[3 * i + 0], t_l, preferred_element_type=jnp.float32)
             + jnp.dot(hww_ref[3 * i + 1], x, preferred_element_type=jnp.float32)
             + jnp.dot(hww_ref[3 * i + 2], t_r, preferred_element_type=jnp.float32)
             + hwb_ref[i])                                    # (2H, BL)
        h1 = jax.nn.sigmoid(h[:H, :])                         # sublane split
        h2 = jnp.maximum(h[H:, :], 0.0)
        # dropout = 0.0 -> identity
        return h1 * h2 + (1.0 - h1) * x

    # ---- encoder: Conv1d(k=1)+ReLU, HW(d=1,3,9,27) ----
    y = conv1x1_relu(y, 0)
    li = 0
    for d in ENC_DILS:
        y = highway(y, li, d)
        li += 1

    # ---- decoder: Conv1d(k=1)+ReLU, HW(d=1,3,9,27,1), Conv1d+ReLU, Conv->mel ----
    y = conv1x1_relu(y, 1)
    for d in DEC_DILS:
        y = highway(y, li, d)
        li += 1
    y = conv1x1_relu(y, 2)

    # final projection, lane-dense (MEL, BL) store
    out_ref[...] = (jnp.dot(ow_ref[...], y, preferred_element_type=jnp.float32)
                    + ob_ref[...]).astype(out_ref.dtype)


# ----------------------------- wrapper ---------------------------------------
def model_forward(x_idx, params):
    """x_idx: [B, L] int32 note indices -> [B, MEL_SIZE, L] float32."""
    B, L = x_idx.shape
    BL = B * L

    kern = functools.partial(_fused_forward_kernel, B=B, L=L)
    out = pl.pallas_call(
        kern,
        out_shape=jax.ShapeDtypeStruct((MEL_SIZE, BL), jnp.float32),
        in_specs=[pl.BlockSpec(memory_space=pltpu.MemorySpace.VMEM)] * 8,
        out_specs=pl.BlockSpec(memory_space=pltpu.MemorySpace.VMEM),
    )(
        x_idx.reshape(1, BL).astype(jnp.int32),
        params["embT"], params["cw"], params["cb"],
        params["hww"], params["hwb"], params["ow"], params["ob"],
    )
    # back to PyTorch NCL layout [B, mel_size, L]
    return jnp.transpose(out.reshape(MEL_SIZE, B, L), (1, 0, 2))


# ----------------------------- pure-JAX reference ----------------------------
def reference_forward(x_idx, params):
    """Straightforward jnp implementation of the PyTorch forward (NCL layout)."""
    B, L = x_idx.shape
    H = HIDDEN
    hp = jax.lax.Precision.HIGHEST

    idx = jnp.where(x_idx > 0, x_idx - MIN_NOTE, x_idx)
    idx = jnp.clip(idx, 0, NUM_NOTE - 1)
    emb = params["embT"].T                                  # (NUM_NOTE, H)
    y = jnp.transpose(emb[idx], (0, 2, 1))                  # (B, H, L)

    def conv1x1_relu(x, i):
        out = jnp.einsum("oc,bcl->bol", params["cw"][i], x,
                         precision=hp) + params["cb"][i]
        return jnp.maximum(out, 0.0)

    def highway(x, i, d):
        xp = jnp.pad(x, ((0, 0), (0, 0), (d, d)))           # 'same' pad p=d
        tl, tm, tr = xp[:, :, 0:L], xp[:, :, d:d + L], xp[:, :, 2 * d:2 * d + L]
        w = params["hww"]
        h = (jnp.einsum("oc,bcl->bol", w[3 * i + 0], tl, precision=hp)
             + jnp.einsum("oc,bcl->bol", w[3 * i + 1], tm, precision=hp)
             + jnp.einsum("oc,bcl->bol", w[3 * i + 2], tr, precision=hp)
             + params["hwb"][i])
        h1 = jax.nn.sigmoid(h[:, :H])
        h2 = jnp.maximum(h[:, H:], 0.0)
        return h1 * h2 + (1.0 - h1) * x

    y = conv1x1_relu(y, 0)
    li = 0
    for d in ENC_DILS:
        y = highway(y, li, d)
        li += 1
    y = conv1x1_relu(y, 1)
    for d in DEC_DILS:
        y = highway(y, li, d)
        li += 1
    y = conv1x1_relu(y, 2)
    return jnp.einsum("oc,bcl->bol", params["ow"], y, precision=hp) + params["ob"]


# ----------------------------- parameters -----------------------------------
def init_params(key):
    keys = jax.random.split(key, 8)
    p = {}
    # transposed embedding table (H, NUM_NOTE)
    p["embT"] = 0.1 * jax.random.normal(keys[0], (HIDDEN, NUM_NOTE), jnp.float32)
    # 3 pointwise (k=1) conv layers (enc0, dec0, dec1), stacked, (out, in)
    p["cw"] = 0.1 * jax.random.normal(keys[1], (3, HIDDEN, HIDDEN), jnp.float32)
    p["cb"] = 0.01 * jax.random.normal(keys[2], (3, HIDDEN, 1), jnp.float32)
    # 9 highway layers (enc d=1,3,9,27 then dec d=1,3,9,27,1):
    # row 3*i+k = layer i, tap k (k=0: t-d, k=1: t, k=2: t+d); output rows are
    # [gate | value] of the 2H-wide conv.
    p["hww"] = 0.1 * jax.random.normal(
        keys[3], (9 * 3, 2 * HIDDEN, HIDDEN), jnp.float32)
    p["hwb"] = 0.01 * jax.random.normal(keys[4], (9, 2 * HIDDEN, 1), jnp.float32)
    # final mel projection
    p["ow"] = 0.1 * jax.random.normal(keys[5], (MEL_SIZE, HIDDEN), jnp.float32)
    p["ob"] = 0.01 * jax.random.normal(keys[6], (MEL_SIZE, 1), jnp.float32)
    return p


# ----------------------------- main ------------------------------------------
if __name__ == "__main__":
    key = jax.random.PRNGKey(0)
    pkey, xkey = jax.random.split(key)
    params = init_params(pkey)

    B, L = 2, 64
    # integer note indices (0 = rest, else note numbers up to MIN_NOTE+NUM_NOTE)
    x_idx = jax.random.randint(xkey, (B, L), 0, MIN_NOTE + NUM_NOTE,
                               dtype=jnp.int32)

    fwd = jax.jit(model_forward)
    out = fwd(x_idx, params)
    out = jax.block_until_ready(out)

    assert out.shape == (B, MEL_SIZE, L), out.shape
    assert bool(jnp.all(jnp.isfinite(out)))

    # numerical check against the plain-JAX reference of the same module
    ref = reference_forward(x_idx, params)
    assert bool(jnp.allclose(out, ref, rtol=2e-3, atol=2e-3)), \
        float(jnp.max(jnp.abs(out - ref)))

    print("KERNEL_OK")
</pallas_src>

<mosaic_0001>
module attributes {stable_mosaic.version = 11 : i64} {
  func.func @_fused_forward_kernel(%arg0: memref<1x128xi32, #tpu.memory_space<vmem>>, %arg1: memref<32x64xf32, #tpu.memory_space<vmem>>, %arg2: memref<3x32x32xf32, #tpu.memory_space<vmem>>, %arg3: memref<3x32x1xf32, #tpu.memory_space<vmem>>, %arg4: memref<27x64x32xf32, #tpu.memory_space<vmem>>, %arg5: memref<9x64x1xf32, #tpu.memory_space<vmem>>, %arg6: memref<16x32xf32, #tpu.memory_space<vmem>>, %arg7: memref<16x1xf32, #tpu.memory_space<vmem>>, %arg8: memref<16x128xf32, #tpu.memory_space<vmem>>) attributes {dimension_semantics = [], scalar_prefetch = 0 : i64, scratch_operands = 0 : i64, tpu.core_type = #tpu.core_type<tc>} {
    %c0 = arith.constant 0 : index
    %c0_0 = arith.constant 0 : index
    %0 = vector.load %arg0[%c0, %c0_0] : memref<1x128xi32, #tpu.memory_space<vmem>>, vector<1x128xi32>
    %c0_i32 = arith.constant 0 : i32
    %1 = vector.broadcast %c0_i32 : i32 to vector<1x128xi32>
    %2 = arith.cmpi sgt, %0, %1 : vector<1x128xi32>
    %c20_i32 = arith.constant 20 : i32
    %3 = vector.broadcast %c20_i32 : i32 to vector<1x128xi32>
    %4 = arith.subi %0, %3 : vector<1x128xi32>
    %5 = arith.select %2, %4, %0 : vector<1x128xi1>, vector<1x128xi32>
    %c0_i32_1 = arith.constant 0 : i32
    %c63_i32 = arith.constant 63 : i32
    %6 = vector.broadcast %c0_i32_1 : i32 to vector<1x128xi32>
    %7 = arith.maxsi %6, %5 : vector<1x128xi32>
    %8 = vector.broadcast %c63_i32 : i32 to vector<1x128xi32>
    %9 = arith.minsi %8, %7 : vector<1x128xi32>
    %10 = tpu.iota {dimensions = array<i32: 0>} : vector<64x128xi32>
    %11 = vector.broadcast %9 : vector<1x128xi32> to vector<64x128xi32>
    %12 = arith.cmpi eq, %10, %11 : vector<64x128xi32>
    %13 = arith.extui %12 : vector<64x128xi1> to vector<64x128xi32>
    %14 = arith.sitofp %13 : vector<64x128xi32> to vector<64x128xf32>
    %c0_2 = arith.constant 0 : index
    %c0_3 = arith.constant 0 : index
    %15 = vector.load %arg1[%c0_2, %c0_3] : memref<32x64xf32, #tpu.memory_space<vmem>>, vector<32x64xf32>
    %cst = arith.constant dense<0.000000e+00> : vector<32x128xf32>
    %16 = tpu.matmul %15, %14, %cst {dimension_numbers = #tpu.dot_dimension_numbers<[1], [0], [0], [1], [0, 0, 1, 1], [], []>} : vector<32x64xf32>, vector<64x128xf32>, vector<32x128xf32> -> vector<32x128xf32>
    %17 = tpu.iota {dimensions = array<i32: 1>} : vector<32x128xi32>
    %c1_i32 = arith.constant 1 : i32
    %18 = vector.broadcast %c1_i32 : i32 to vector<32x128xi32>
    %19 = arith.cmpi sge, %17, %18 : vector<32x128xi32>
    %c64_i32 = arith.constant 64 : i32
    %20 = vector.broadcast %c64_i32 : i32 to vector<32x128xi32>
    %21 = arith.cmpi slt, %17, %20 : vector<32x128xi32>
    %22 = arith.andi %19, %21 : vector<32x128xi1>
    %c0_i32_4 = arith.constant 0 : i32
    %23 = vector.broadcast %c0_i32_4 : i32 to vector<32x128xi32>
    %24 = arith.cmpi sge, %17, %23 : vector<32x128xi32>
    %c63_i32_5 = arith.constant 63 : i32
    %25 = vector.broadcast %c63_i32_5 : i32 to vector<32x128xi32>
    %26 = arith.cmpi slt, %17, %25 : vector<32x128xi32>
    %27 = arith.andi %24, %26 : vector<32x128xi1>
    %c65_i32 = arith.constant 65 : i32
    %28 = vector.broadcast %c65_i32 : i32 to vector<32x128xi32>
    %29 = arith.cmpi sge, %17, %28 : vector<32x128xi32>
    %c128_i32 = arith.constant 128 : i32
    %30 = vector.broadcast %c128_i32 : i32 to vector<32x128xi32>
    %31 = arith.cmpi slt, %17, %30 : vector<32x128xi32>
    %32 = arith.andi %29, %31 : vector<32x128xi1>
    %c64_i32_6 = arith.constant 64 : i32
    %33 = vector.broadcast %c64_i32_6 : i32 to vector<32x128xi32>
    %34 = arith.cmpi sge, %17, %33 : vector<32x128xi32>
    %c127_i32 = arith.constant 127 : i32
    %35 = vector.broadcast %c127_i32 : i32 to vector<32x128xi32>
    %36 = arith.cmpi slt, %17, %35 : vector<32x128xi32>
    %37 = arith.andi %34, %36 : vector<32x128xi1>
    %38 = arith.ori %22, %32 : vector<32x128xi1>
    %39 = arith.ori %27, %37 : vector<32x128xi1>
    %c3_i32 = arith.constant 3 : i32
    %40 = vector.broadcast %c3_i32 : i32 to vector<32x128xi32>
    %41 = arith.cmpi sge, %17, %40 : vector<32x128xi32>
    %c64_i32_7 = arith.constant 64 : i32
    %42 = vector.broadcast %c64_i32_7 : i32 to vector<32x128xi32>
    %43 = arith.cmpi slt, %17, %42 : vector<32x128xi32>
    %44 = arith.andi %41, %43 : vector<32x128xi1>
    %c0_i32_8 = arith.constant 0 : i32
    %45 = vector.broadcast %c0_i32_8 : i32 to vector<32x128xi32>
    %46 = arith.cmpi sge, %17, %45 : vector<32x128xi32>
    %c61_i32 = arith.constant 61 : i32
    %47 = vector.broadcast %c61_i32 : i32 to vector<32x128xi32>
    %48 = arith.cmpi slt, %17, %47 : vector<32x128xi32>
    %49 = arith.andi %46, %48 : vector<32x128xi1>
    %c67_i32 = arith.constant 67 : i32
    %50 = vector.broadcast %c67_i32 : i32 to vector<32x128xi32>
    %51 = arith.cmpi sge, %17, %50 : vector<32x128xi32>
    %c128_i32_9 = arith.constant 128 : i32
    %52 = vector.broadcast %c128_i32_9 : i32 to vector<32x128xi32>
    %53 = arith.cmpi slt, %17, %52 : vector<32x128xi32>
    %54 = arith.andi %51, %53 : vector<32x128xi1>
    %c64_i32_10 = arith.constant 64 : i32
    %55 = vector.broadcast %c64_i32_10 : i32 to vector<32x128xi32>
    %56 = arith.cmpi sge, %17, %55 : vector<32x128xi32>
    %c125_i32 = arith.constant 125 : i32
    %57 = vector.broadcast %c125_i32 : i32 to vector<32x128xi32>
    %58 = arith.cmpi slt, %17, %57 : vector<32x128xi32>
    %59 = arith.andi %56, %58 : vector<32x128xi1>
    %60 = arith.ori %44, %54 : vector<32x128xi1>
    %61 = arith.ori %49, %59 : vector<32x128xi1>
    %c9_i32 = arith.constant 9 : i32
    %62 = vector.broadcast %c9_i32 : i32 to vector<32x128xi32>
    %63 = arith.cmpi sge, %17, %62 : vector<32x128xi32>
    %c64_i32_11 = arith.constant 64 : i32
    %64 = vector.broadcast %c64_i32_11 : i32 to vector<32x128xi32>
    %65 = arith.cmpi slt, %17, %64 : vector<32x128xi32>
    %66 = arith.andi %63, %65 : vector<32x128xi1>
    %c0_i32_12 = arith.constant 0 : i32
    %67 = vector.broadcast %c0_i32_12 : i32 to vector<32x128xi32>
    %68 = arith.cmpi sge, %17, %67 : vector<32x128xi32>
    %c55_i32 = arith.constant 55 : i32
    %69 = vector.broadcast %c55_i32 : i32 to vector<32x128xi32>
    %70 = arith.cmpi slt, %17, %69 : vector<32x128xi32>
    %71 = arith.andi %68, %70 : vector<32x128xi1>
    %c73_i32 = arith.constant 73 : i32
    %72 = vector.broadcast %c73_i32 : i32 to vector<32x128xi32>
    %73 = arith.cmpi sge, %17, %72 : vector<32x128xi32>
    %c128_i32_13 = arith.constant 128 : i32
    %74 = vector.broadcast %c128_i32_13 : i32 to vector<32x128xi32>
    %75 = arith.cmpi slt, %17, %74 : vector<32x128xi32>
    %76 = arith.andi %73, %75 : vector<32x128xi1>
    %c64_i32_14 = arith.constant 64 : i32
    %77 = vector.broadcast %c64_i32_14 : i32 to vector<32x128xi32>
    %78 = arith.cmpi sge, %17, %77 : vector<32x128xi32>
    %c119_i32 = arith.constant 119 : i32
    %79 = vector.broadcast %c119_i32 : i32 to vector<32x128xi32>
    %80 = arith.cmpi slt, %17, %79 : vector<32x128xi32>
    %81 = arith.andi %78, %80 : vector<32x128xi1>
    %82 = arith.ori %66, %76 : vector<32x128xi1>
    %83 = arith.ori %71, %81 : vector<32x128xi1>
    %c27_i32 = arith.constant 27 : i32
    %84 = vector.broadcast %c27_i32 : i32 to vector<32x128xi32>
    %85 = arith.cmpi sge, %17, %84 : vector<32x128xi32>
    %c64_i32_15 = arith.constant 64 : i32
    %86 = vector.broadcast %c64_i32_15 : i32 to vector<32x128xi32>
    %87 = arith.cmpi slt, %17, %86 : vector<32x128xi32>
    %88 = arith.andi %85, %87 : vector<32x128xi1>
    %c0_i32_16 = arith.constant 0 : i32
    %89 = vector.broadcast %c0_i32_16 : i32 to vector<32x128xi32>
    %90 = arith.cmpi sge, %17, %89 : vector<32x128xi32>
    %c37_i32 = arith.constant 37 : i32
    %91 = vector.broadcast %c37_i32 : i32 to vector<32x128xi32>
    %92 = arith.cmpi slt, %17, %91 : vector<32x128xi32>
    %93 = arith.andi %90, %92 : vector<32x128xi1>
    %c91_i32 = arith.constant 91 : i32
    %94 = vector.broadcast %c91_i32 : i32 to vector<32x128xi32>
    %95 = arith.cmpi sge, %17, %94 : vector<32x128xi32>
    %c128_i32_17 = arith.constant 128 : i32
    %96 = vector.broadcast %c128_i32_17 : i32 to vector<32x128xi32>
    %97 = arith.cmpi slt, %17, %96 : vector<32x128xi32>
    %98 = arith.andi %95, %97 : vector<32x128xi1>
    %c64_i32_18 = arith.constant 64 : i32
    %99 = vector.broadcast %c64_i32_18 : i32 to vector<32x128xi32>
    %100 = arith.cmpi sge, %17, %99 : vector<32x128xi32>
    %c101_i32 = arith.constant 101 : i32
    %101 = vector.broadcast %c101_i32 : i32 to vector<32x128xi32>
    %102 = arith.cmpi slt, %17, %101 : vector<32x128xi32>
    %103 = arith.andi %100, %102 : vector<32x128xi1>
    %104 = arith.ori %88, %98 : vector<32x128xi1>
    %105 = arith.ori %93, %103 : vector<32x128xi1>
    %c0_19 = arith.constant 0 : index
    %c0_20 = arith.constant 0 : index
    %c0_21 = arith.constant 0 : index
    %106 = vector.load %arg2[%c0_19, %c0_20, %c0_21] : memref<3x32x32xf32, #tpu.memory_space<vmem>>, vector<1x32x32xf32>
    %107 = vector.shape_cast %106 : vector<1x32x32xf32> to vector<32x32xf32>
    %c0_22 = arith.constant 0 : index
    %c0_23 = arith.constant 0 : index
    %c0_24 = arith.constant 0 : index
    %108 = vector.load %arg3[%c0_22, %c0_23, %c0_24] : memref<3x32x1xf32, #tpu.memory_space<vmem>>, vector<1x32x1xf32>
    %109 = vector.shape_cast %108 : vector<1x32x1xf32> to vector<32x1xf32>
    %cst_25 = arith.constant dense<0.000000e+00> : vector<32x128xf32>
    %110 = tpu.matmul %107, %16, %cst_25 {dimension_numbers = #tpu.dot_dimension_numbers<[1], [0], [0], [1], [0, 0, 1, 1], [], []>} : vector<32x32xf32>, vector<32x128xf32>, vector<32x128xf32> -> vector<32x128xf32>
    %111 = vector.broadcast %109 : vector<32x1xf32> to vector<32x128xf32>
    %112 = arith.addf %110, %111 : vector<32x128xf32>
    %cst_26 = arith.constant 0.000000e+00 : f32
    %113 = vector.broadcast %cst_26 : f32 to vector<32x128xf32>
    %114 = arith.maximumf %112, %113 : vector<32x128xf32>
    %c1_i32_27 = arith.constant 1 : i32
    %115 = tpu.dynamic_rotate %114 by %c1_i32_27 dim 1 : vector<32x128xf32>, i32 -> vector<32x128xf32>
    %cst_28 = arith.constant 0.000000e+00 : f32
    %116 = vector.broadcast %cst_28 : f32 to vector<32x128xf32>
    %117 = arith.select %38, %115, %116 : vector<32x128xi1>, vector<32x128xf32>
    %c127_i32_29 = arith.constant 127 : i32
    %118 = tpu.dynamic_rotate %114 by %c127_i32_29 dim 1 : vector<32x128xf32>, i32 -> vector<32x128xf32>
    %cst_30 = arith.constant 0.000000e+00 : f32
    %119 = vector.broadcast %cst_30 : f32 to vector<32x128xf32>
    %120 = arith.select %39, %118, %119 : vector<32x128xi1>, vector<32x128xf32>
    %c0_31 = arith.constant 0 : index
    %c0_32 = arith.constant 0 : index
    %c0_33 = arith.constant 0 : index
    %121 = vector.load %arg4[%c0_31, %c0_32, %c0_33] : memref<27x64x32xf32, #tpu.memory_space<vmem>>, vector<1x64x32xf32>
    %122 = vector.shape_cast %121 : vector<1x64x32xf32> to vector<64x32xf32>
    %cst_34 = arith.constant dense<0.000000e+00> : vector<64x128xf32>
    %123 = tpu.matmul %122, %117, %cst_34 {dimension_numbers = #tpu.dot_dimension_numbers<[1], [0], [0], [1], [0, 0, 1, 1], [], []>} : vector<64x32xf32>, vector<32x128xf32>, vector<64x128xf32> -> vector<64x128xf32>
    %c1 = arith.constant 1 : index
    %c0_35 = arith.constant 0 : index
    %c0_36 = arith.constant 0 : index
    %124 = vector.load %arg4[%c1, %c0_35, %c0_36] : memref<27x64x32xf32, #tpu.memory_space<vmem>>, vector<1x64x32xf32>
    %125 = vector.shape_cast %124 : vector<1x64x32xf32> to vector<64x32xf32>
    %cst_37 = arith.constant dense<0.000000e+00> : vector<64x128xf32>
    %126 = tpu.matmul %125, %114, %cst_37 {dimension_numbers = #tpu.dot_dimension_numbers<[1], [0], [0], [1], [0, 0, 1, 1], [], []>} : vector<64x32xf32>, vector<32x128xf32>, vector<64x128xf32> -> vector<64x128xf32>
    %127 = arith.addf %123, %126 : vector<64x128xf32>
    %c2 = arith.constant 2 : index
    %c0_38 = arith.constant 0 : index
    %c0_39 = arith.constant 0 : index
    %128 = vector.load %arg4[%c2, %c0_38, %c0_39] : memref<27x64x32xf32, #tpu.memory_space<vmem>>, vector<1x64x32xf32>
    %129 = vector.shape_cast %128 : vector<1x64x32xf32> to vector<64x32xf32>
    %cst_40 = arith.constant dense<0.000000e+00> : vector<64x128xf32>
    %130 = tpu.matmul %129, %120, %cst_40 {dimension_numbers = #tpu.dot_dimension_numbers<[1], [0], [0], [1], [0, 0, 1, 1], [], []>} : vector<64x32xf32>, vector<32x128xf32>, vector<64x128xf32> -> vector<64x128xf32>
    %131 = arith.addf %127, %130 : vector<64x128xf32>
    %c0_41 = arith.constant 0 : index
    %c0_42 = arith.constant 0 : index
    %c0_43 = arith.constant 0 : index
    %132 = vector.load %arg5[%c0_41, %c0_42, %c0_43] : memref<9x64x1xf32, #tpu.memory_space<vmem>>, vector<1x64x1xf32>
    %133 = vector.shape_cast %132 : vector<1x64x1xf32> to vector<64x1xf32>
    %134 = vector.broadcast %133 : vector<64x1xf32> to vector<64x128xf32>
    %135 = arith.addf %131, %134 : vector<64x128xf32>
    %136 = vector.extract_strided_slice %135 {offsets = [0, 0], sizes = [32, 128], strides = [1, 1]} : vector<64x128xf32> to vector<32x128xf32>
    %137 = arith.negf %136 : vector<32x128xf32>
    %138 = math.exp %137 : vector<32x128xf32>
    %cst_44 = arith.constant 1.000000e+00 : f32
    %139 = vector.broadcast %cst_44 : f32 to vector<32x128xf32>
    %140 = arith.addf %139, %138 : vector<32x128xf32>
    %141 = arith.divf %139, %140 : vector<32x128xf32>
    %142 = vector.extract_strided_slice %135 {offsets = [32, 0], sizes = [32, 128], strides = [1, 1]} : vector<64x128xf32> to vector<32x128xf32>
    %cst_45 = arith.constant 0.000000e+00 : f32
    %143 = vector.broadcast %cst_45 : f32 to vector<32x128xf32>
    %144 = arith.maximumf %142, %143 : vector<32x128xf32>
    %145 = arith.mulf %141, %144 : vector<32x128xf32>
    %cst_46 = arith.constant 1.000000e+00 : f32
    %146 = vector.broadcast %cst_46 : f32 to vector<32x128xf32>
    %147 = arith.subf %146, %141 : vector<32x128xf32>
    %148 = arith.mulf %147, %114 : vector<32x128xf32>
    %149 = arith.addf %145, %148 : vector<32x128xf32>
    %c3_i32_47 = arith.constant 3 : i32
    %150 = tpu.dynamic_rotate %149 by %c3_i32_47 dim 1 : vector<32x128xf32>, i32 -> vector<32x128xf32>
    %cst_48 = arith.constant 0.000000e+00 : f32
    %151 = vector.broadcast %cst_48 : f32 to vector<32x128xf32>
    %152 = arith.select %60, %150, %151 : vector<32x128xi1>, vector<32x128xf32>
    %c125_i32_49 = arith.constant 125 : i32
    %153 = tpu.dynamic_rotate %149 by %c125_i32_49 dim 1 : vector<32x128xf32>, i32 -> vector<32x128xf32>
    %cst_50 = arith.constant 0.000000e+00 : f32
    %154 = vector.broadcast %cst_50 : f32 to vector<32x128xf32>
    %155 = arith.select %61, %153, %154 : vector<32x128xi1>, vector<32x128xf32>
    %c3 = arith.constant 3 : index
    %c0_51 = arith.constant 0 : index
    %c0_52 = arith.constant 0 : index
    %156 = vector.load %arg4[%c3, %c0_51, %c0_52] : memref<27x64x32xf32, #tpu.memory_space<vmem>>, vector<1x64x32xf32>
    %157 = vector.shape_cast %156 : vector<1x64x32xf32> to vector<64x32xf32>
    %cst_53 = arith.constant dense<0.000000e+00> : vector<64x128xf32>
    %158 = tpu.matmul %157, %152, %cst_53 {dimension_numbers = #tpu.dot_dimension_numbers<[1], [0], [0], [1], [0, 0, 1, 1], [], []>} : vector<64x32xf32>, vector<32x128xf32>, vector<64x128xf32> -> vector<64x128xf32>
    %c4 = arith.constant 4 : index
    %c0_54 = arith.constant 0 : index
    %c0_55 = arith.constant 0 : index
    %159 = vector.load %arg4[%c4, %c0_54, %c0_55] : memref<27x64x32xf32, #tpu.memory_space<vmem>>, vector<1x64x32xf32>
    %160 = vector.shape_cast %159 : vector<1x64x32xf32> to vector<64x32xf32>
    %cst_56 = arith.constant dense<0.000000e+00> : vector<64x128xf32>
    %161 = tpu.matmul %160, %149, %cst_56 {dimension_numbers = #tpu.dot_dimension_numbers<[1], [0], [0], [1], [0, 0, 1, 1], [], []>} : vector<64x32xf32>, vector<32x128xf32>, vector<64x128xf32> -> vector<64x128xf32>
    %162 = arith.addf %158, %161 : vector<64x128xf32>
    %c5 = arith.constant 5 : index
    %c0_57 = arith.constant 0 : index
    %c0_58 = arith.constant 0 : index
    %163 = vector.load %arg4[%c5, %c0_57, %c0_58] : memref<27x64x32xf32, #tpu.memory_space<vmem>>, vector<1x64x32xf32>
    %164 = vector.shape_cast %163 : vector<1x64x32xf32> to vector<64x32xf32>
    %cst_59 = arith.constant dense<0.000000e+00> : vector<64x128xf32>
    %165 = tpu.matmul %164, %155, %cst_59 {dimension_numbers = #tpu.dot_dimension_numbers<[1], [0], [0], [1], [0, 0, 1, 1], [], []>} : vector<64x32xf32>, vector<32x128xf32>, vector<64x128xf32> -> vector<64x128xf32>
    %166 = arith.addf %162, %165 : vector<64x128xf32>
    %c1_60 = arith.constant 1 : index
    %c0_61 = arith.constant 0 : index
    %c0_62 = arith.constant 0 : index
    %167 = vector.load %arg5[%c1_60, %c0_61, %c0_62] : memref<9x64x1xf32, #tpu.memory_space<vmem>>, vector<1x64x1xf32>
    %168 = vector.shape_cast %167 : vector<1x64x1xf32> to vector<64x1xf32>
    %169 = vector.broadcast %168 : vector<64x1xf32> to vector<64x128xf32>
    %170 = arith.addf %166, %169 : vector<64x128xf32>
    %171 = vector.extract_strided_slice %170 {offsets = [0, 0], sizes = [32, 128], strides = [1, 1]} : vector<64x128xf32> to vector<32x128xf32>
    %172 = arith.negf %171 : vector<32x128xf32>
    %173 = math.exp %172 : vector<32x128xf32>
    %cst_63 = arith.constant 1.000000e+00 : f32
    %174 = vector.broadcast %cst_63 : f32 to vector<32x128xf32>
    %175 = arith.addf %174, %173 : vector<32x128xf32>
    %176 = arith.divf %174, %175 : vector<32x128xf32>
    %177 = vector.extract_strided_slice %170 {offsets = [32, 0], sizes = [32, 128], strides = [1, 1]} : vector<64x128xf32> to vector<32x128xf32>
    %cst_64 = arith.constant 0.000000e+00 : f32
    %178 = vector.broadcast %cst_64 : f32 to vector<32x128xf32>
    %179 = arith.maximumf %177, %178 : vector<32x128xf32>
    %180 = arith.mulf %176, %179 : vector<32x128xf32>
    %cst_65 = arith.constant 1.000000e+00 : f32
    %181 = vector.broadcast %cst_65 : f32 to vector<32x128xf32>
    %182 = arith.subf %181, %176 : vector<32x128xf32>
    %183 = arith.mulf %182, %149 : vector<32x128xf32>
    %184 = arith.addf %180, %183 : vector<32x128xf32>
    %c9_i32_66 = arith.constant 9 : i32
    %185 = tpu.dynamic_rotate %184 by %c9_i32_66 dim 1 : vector<32x128xf32>, i32 -> vector<32x128xf32>
    %cst_67 = arith.constant 0.000000e+00 : f32
    %186 = vector.broadcast %cst_67 : f32 to vector<32x128xf32>
    %187 = arith.select %82, %185, %186 : vector<32x128xi1>, vector<32x128xf32>
    %c119_i32_68 = arith.constant 119 : i32
    %188 = tpu.dynamic_rotate %184 by %c119_i32_68 dim 1 : vector<32x128xf32>, i32 -> vector<32x128xf32>
    %cst_69 = arith.constant 0.000000e+00 : f32
    %189 = vector.broadcast %cst_69 : f32 to vector<32x128xf32>
    %190 = arith.select %83, %188, %189 : vector<32x128xi1>, vector<32x128xf32>
    %c6 = arith.constant 6 : index
    %c0_70 = arith.constant 0 : index
    %c0_71 = arith.constant 0 : index
    %191 = vector.load %arg4[%c6, %c0_70, %c0_71] : memref<27x64x32xf32, #tpu.memory_space<vmem>>, vector<1x64x32xf32>
    %192 = vector.shape_cast %191 : vector<1x64x32xf32> to vector<64x32xf32>
    %cst_72 = arith.constant dense<0.000000e+00> : vector<64x128xf32>
    %193 = tpu.matmul %192, %187, %cst_72 {dimension_numbers = #tpu.dot_dimension_numbers<[1], [0], [0], [1], [0, 0, 1, 1], [], []>} : vector<64x32xf32>, vector<32x128xf32>, vector<64x128xf32> -> vector<64x128xf32>
    %c7 = arith.constant 7 : index
    %c0_73 = arith.constant 0 : index
    %c0_74 = arith.constant 0 : index
    %194 = vector.load %arg4[%c7, %c0_73, %c0_74] : memref<27x64x32xf32, #tpu.memory_space<vmem>>, vector<1x64x32xf32>
    %195 = vector.shape_cast %194 : vector<1x64x32xf32> to vector<64x32xf32>
    %cst_75 = arith.constant dense<0.000000e+00> : vector<64x128xf32>
    %196 = tpu.matmul %195, %184, %cst_75 {dimension_numbers = #tpu.dot_dimension_numbers<[1], [0], [0], [1], [0, 0, 1, 1], [], []>} : vector<64x32xf32>, vector<32x128xf32>, vector<64x128xf32> -> vector<64x128xf32>
    %197 = arith.addf %193, %196 : vector<64x128xf32>
    %c8 = arith.constant 8 : index
    %c0_76 = arith.constant 0 : index
    %c0_77 = arith.constant 0 : index
    %198 = vector.load %arg4[%c8, %c0_76, %c0_77] : memref<27x64x32xf32, #tpu.memory_space<vmem>>, vector<1x64x32xf32>
    %199 = vector.shape_cast %198 : vector<1x64x32xf32> to vector<64x32xf32>
    %cst_78 = arith.constant dense<0.000000e+00> : vector<64x128xf32>
    %200 = tpu.matmul %199, %190, %cst_78 {dimension_numbers = #tpu.dot_dimension_numbers<[1], [0], [0], [1], [0, 0, 1, 1], [], []>} : vector<64x32xf32>, vector<32x128xf32>, vector<64x128xf32> -> vector<64x128xf32>
    %201 = arith.addf %197, %200 : vector<64x128xf32>
    %c2_79 = arith.constant 2 : index
    %c0_80 = arith.constant 0 : index
    %c0_81 = arith.constant 0 : index
    %202 = vector.load %arg5[%c2_79, %c0_80, %c0_81] : memref<9x64x1xf32, #tpu.memory_space<vmem>>, vector<1x64x1xf32>
    %203 = vector.shape_cast %202 : vector<1x64x1xf32> to vector<64x1xf32>
    %204 = vector.broadcast %203 : vector<64x1xf32> to vector<64x128xf32>
    %205 = arith.addf %201, %204 : vector<64x128xf32>
    %206 = vector.extract_strided_slice %205 {offsets = [0, 0], sizes = [32, 128], strides = [1, 1]} : vector<64x128xf32> to vector<32x128xf32>
    %207 = arith.negf %206 : vector<32x128xf32>
    %208 = math.exp %207 : vector<32x128xf32>
    %cst_82 = arith.constant 1.000000e+00 : f32
    %209 = vector.broadcast %cst_82 : f32 to vector<32x128xf32>
    %210 = arith.addf %209, %208 : vector<32x128xf32>
    %211 = arith.divf %209, %210 : vector<32x128xf32>
    %212 = vector.extract_strided_slice %205 {offsets = [32, 0], sizes = [32, 128], strides = [1, 1]} : vector<64x128xf32> to vector<32x128xf32>
    %cst_83 = arith.constant 0.000000e+00 : f32
    %213 = vector.broadcast %cst_83 : f32 to vector<32x128xf32>
    %214 = arith.maximumf %212, %213 : vector<32x128xf32>
    %215 = arith.mulf %211, %214 : vector<32x128xf32>
    %cst_84 = arith.constant 1.000000e+00 : f32
    %216 = vector.broadcast %cst_84 : f32 to vector<32x128xf32>
    %217 = arith.subf %216, %211 : vector<32x128xf32>
    %218 = arith.mulf %217, %184 : vector<32x128xf32>
    %219 = arith.addf %215, %218 : vector<32x128xf32>
    %c27_i32_85 = arith.constant 27 : i32
    %220 = tpu.dynamic_rotate %219 by %c27_i32_85 dim 1 : vector<32x128xf32>, i32 -> vector<32x128xf32>
    %cst_86 = arith.constant 0.000000e+00 : f32
    %221 = vector.broadcast %cst_86 : f32 to vector<32x128xf32>
    %222 = arith.select %104, %220, %221 : vector<32x128xi1>, vector<32x128xf32>
    %c101_i32_87 = arith.constant 101 : i32
    %223 = tpu.dynamic_rotate %219 by %c101_i32_87 dim 1 : vector<32x128xf32>, i32 -> vector<32x128xf32>
    %cst_88 = arith.constant 0.000000e+00 : f32
    %224 = vector.broadcast %cst_88 : f32 to vector<32x128xf32>
    %225 = arith.select %105, %223, %224 : vector<32x128xi1>, vector<32x128xf32>
    %c9 = arith.constant 9 : index
    %c0_89 = arith.constant 0 : index
    %c0_90 = arith.constant 0 : index
    %226 = vector.load %arg4[%c9, %c0_89, %c0_90] : memref<27x64x32xf32, #tpu.memory_space<vmem>>, vector<1x64x32xf32>
    %227 = vector.shape_cast %226 : vector<1x64x32xf32> to vector<64x32xf32>
    %cst_91 = arith.constant dense<0.000000e+00> : vector<64x128xf32>
    %228 = tpu.matmul %227, %222, %cst_91 {dimension_numbers = #tpu.dot_dimension_numbers<[1], [0], [0], [1], [0, 0, 1, 1], [], []>} : vector<64x32xf32>, vector<32x128xf32>, vector<64x128xf32> -> vector<64x128xf32>
    %c10 = arith.constant 10 : index
    %c0_92 = arith.constant 0 : index
    %c0_93 = arith.constant 0 : index
    %229 = vector.load %arg4[%c10, %c0_92, %c0_93] : memref<27x64x32xf32, #tpu.memory_space<vmem>>, vector<1x64x32xf32>
    %230 = vector.shape_cast %229 : vector<1x64x32xf32> to vector<64x32xf32>
    %cst_94 = arith.constant dense<0.000000e+00> : vector<64x128xf32>
    %231 = tpu.matmul %230, %219, %cst_94 {dimension_numbers = #tpu.dot_dimension_numbers<[1], [0], [0], [1], [0, 0, 1, 1], [], []>} : vector<64x32xf32>, vector<32x128xf32>, vector<64x128xf32> -> vector<64x128xf32>
    %232 = arith.addf %228, %231 : vector<64x128xf32>
    %c11 = arith.constant 11 : index
    %c0_95 = arith.constant 0 : index
    %c0_96 = arith.constant 0 : index
    %233 = vector.load %arg4[%c11, %c0_95, %c0_96] : memref<27x64x32xf32, #tpu.memory_space<vmem>>, vector<1x64x32xf32>
    %234 = vector.shape_cast %233 : vector<1x64x32xf32> to vector<64x32xf32>
    %cst_97 = arith.constant dense<0.000000e+00> : vector<64x128xf32>
    %235 = tpu.matmul %234, %225, %cst_97 {dimension_numbers = #tpu.dot_dimension_numbers<[1], [0], [0], [1], [0, 0, 1, 1], [], []>} : vector<64x32xf32>, vector<32x128xf32>, vector<64x128xf32> -> vector<64x128xf32>
    %236 = arith.addf %232, %235 : vector<64x128xf32>
    %c3_98 = arith.constant 3 : index
    %c0_99 = arith.constant 0 : index
    %c0_100 = arith.constant 0 : index
    %237 = vector.load %arg5[%c3_98, %c0_99, %c0_100] : memref<9x64x1xf32, #tpu.memory_space<vmem>>, vector<1x64x1xf32>
    %238 = vector.shape_cast %237 : vector<1x64x1xf32> to vector<64x1xf32>
    %239 = vector.broadcast %238 : vector<64x1xf32> to vector<64x128xf32>
    %240 = arith.addf %236, %239 : vector<64x128xf32>
    %241 = vector.extract_strided_slice %240 {offsets = [0, 0], sizes = [32, 128], strides = [1, 1]} : vector<64x128xf32> to vector<32x128xf32>
    %242 = arith.negf %241 : vector<32x128xf32>
    %243 = math.exp %242 : vector<32x128xf32>
    %cst_101 = arith.constant 1.000000e+00 : f32
    %244 = vector.broadcast %cst_101 : f32 to vector<32x128xf32>
    %245 = arith.addf %244, %243 : vector<32x128xf32>
    %246 = arith.divf %244, %245 : vector<32x128xf32>
    %247 = vector.extract_strided_slice %240 {offsets = [32, 0], sizes = [32, 128], strides = [1, 1]} : vector<64x128xf32> to vector<32x128xf32>
    %cst_102 = arith.constant 0.000000e+00 : f32
    %248 = vector.broadcast %cst_102 : f32 to vector<32x128xf32>
    %249 = arith.maximumf %247, %248 : vector<32x128xf32>
    %250 = arith.mulf %246, %249 : vector<32x128xf32>
    %cst_103 = arith.constant 1.000000e+00 : f32
    %251 = vector.broadcast %cst_103 : f32 to vector<32x128xf32>
    %252 = arith.subf %251, %246 : vector<32x128xf32>
    %253 = arith.mulf %252, %219 : vector<32x128xf32>
    %254 = arith.addf %250, %253 : vector<32x128xf32>
    %c1_104 = arith.constant 1 : index
    %c0_105 = arith.constant 0 : index
    %c0_106 = arith.constant 0 : index
    %255 = vector.load %arg2[%c1_104, %c0_105, %c0_106] : memref<3x32x32xf32, #tpu.memory_space<vmem>>, vector<1x32x32xf32>
    %256 = vector.shape_cast %255 : vector<1x32x32xf32> to vector<32x32xf32>
    %c1_107 = arith.constant 1 : index
    %c0_108 = arith.constant 0 : index
    %c0_109 = arith.constant 0 : index
    %257 = vector.load %arg3[%c1_107, %c0_108, %c0_109] : memref<3x32x1xf32, #tpu.memory_space<vmem>>, vector<1x32x1xf32>
    %258 = vector.shape_cast %257 : vector<1x32x1xf32> to vector<32x1xf32>
    %cst_110 = arith.constant dense<0.000000e+00> : vector<32x128xf32>
    %259 = tpu.matmul %256, %254, %cst_110 {dimension_numbers = #tpu.dot_dimension_numbers<[1], [0], [0], [1], [0, 0, 1, 1], [], []>} : vector<32x32xf32>, vector<32x128xf32>, vector<32x128xf32> -> vector<32x128xf32>
    %260 = vector.broadcast %258 : vector<32x1xf32> to vector<32x128xf32>
    %261 = arith.addf %259, %260 : vector<32x128xf32>
    %cst_111 = arith.constant 0.000000e+00 : f32
    %262 = vector.broadcast %cst_111 : f32 to vector<32x128xf32>
    %263 = arith.maximumf %261, %262 : vector<32x128xf32>
    %c1_i32_112 = arith.constant 1 : i32
    %264 = tpu.dynamic_rotate %263 by %c1_i32_112 dim 1 : vector<32x128xf32>, i32 -> vector<32x128xf32>
    %cst_113 = arith.constant 0.000000e+00 : f32
    %265 = vector.broadcast %cst_113 : f32 to vector<32x128xf32>
    %266 = arith.select %38, %264, %265 : vector<32x128xi1>, vector<32x128xf32>
    %c127_i32_114 = arith.constant 127 : i32
    %267 = tpu.dynamic_rotate %263 by %c127_i32_114 dim 1 : vector<32x128xf32>, i32 -> vector<32x128xf32>
    %cst_115 = arith.constant 0.000000e+00 : f32
    %268 = vector.broadcast %cst_115 : f32 to vector<32x128xf32>
    %269 = arith.select %39, %267, %268 : vector<32x128xi1>, vector<32x128xf32>
    %c12 = arith.constant 12 : index
    %c0_116 = arith.constant 0 : index
    %c0_117 = arith.constant 0 : index
    %270 = vector.load %arg4[%c12, %c0_116, %c0_117] : memref<27x64x32xf32, #tpu.memory_space<vmem>>, vector<1x64x32xf32>
    %271 = vector.shape_cast %270 : vector<1x64x32xf32> to vector<64x32xf32>
    %cst_118 = arith.constant dense<0.000000e+00> : vector<64x128xf32>
    %272 = tpu.matmul %271, %266, %cst_118 {dimension_numbers = #tpu.dot_dimension_numbers<[1], [0], [0], [1], [0, 0, 1, 1], [], []>} : vector<64x32xf32>, vector<32x128xf32>, vector<64x128xf32> -> vector<64x128xf32>
    %c13 = arith.constant 13 : index
    %c0_119 = arith.constant 0 : index
    %c0_120 = arith.constant 0 : index
    %273 = vector.load %arg4[%c13, %c0_119, %c0_120] : memref<27x64x32xf32, #tpu.memory_space<vmem>>, vector<1x64x32xf32>
    %274 = vector.shape_cast %273 : vector<1x64x32xf32> to vector<64x32xf32>
    %cst_121 = arith.constant dense<0.000000e+00> : vector<64x128xf32>
    %275 = tpu.matmul %274, %263, %cst_121 {dimension_numbers = #tpu.dot_dimension_numbers<[1], [0], [0], [1], [0, 0, 1, 1], [], []>} : vector<64x32xf32>, vector<32x128xf32>, vector<64x128xf32> -> vector<64x128xf32>
    %276 = arith.addf %272, %275 : vector<64x128xf32>
    %c14 = arith.constant 14 : index
    %c0_122 = arith.constant 0 : index
    %c0_123 = arith.constant 0 : index
    %277 = vector.load %arg4[%c14, %c0_122, %c0_123] : memref<27x64x32xf32, #tpu.memory_space<vmem>>, vector<1x64x32xf32>
    %278 = vector.shape_cast %277 : vector<1x64x32xf32> to vector<64x32xf32>
    %cst_124 = arith.constant dense<0.000000e+00> : vector<64x128xf32>
    %279 = tpu.matmul %278, %269, %cst_124 {dimension_numbers = #tpu.dot_dimension_numbers<[1], [0], [0], [1], [0, 0, 1, 1], [], []>} : vector<64x32xf32>, vector<32x128xf32>, vector<64x128xf32> -> vector<64x128xf32>
    %280 = arith.addf %276, %279 : vector<64x128xf32>
    %c4_125 = arith.constant 4 : index
    %c0_126 = arith.constant 0 : index
    %c0_127 = arith.constant 0 : index
    %281 = vector.load %arg5[%c4_125, %c0_126, %c0_127] : memref<9x64x1xf32, #tpu.memory_space<vmem>>, vector<1x64x1xf32>
    %282 = vector.shape_cast %281 : vector<1x64x1xf32> to vector<64x1xf32>
    %283 = vector.broadcast %282 : vector<64x1xf32> to vector<64x128xf32>
    %284 = arith.addf %280, %283 : vector<64x128xf32>
    %285 = vector.extract_strided_slice %284 {offsets = [0, 0], sizes = [32, 128], strides = [1, 1]} : vector<64x128xf32> to vector<32x128xf32>
    %286 = arith.negf %285 : vector<32x128xf32>
    %287 = math.exp %286 : vector<32x128xf32>
    %cst_128 = arith.constant 1.000000e+00 : f32
    %288 = vector.broadcast %cst_128 : f32 to vector<32x128xf32>
    %289 = arith.addf %288, %287 : vector<32x128xf32>
    %290 = arith.divf %288, %289 : vector<32x128xf32>
    %291 = vector.extract_strided_slice %284 {offsets = [32, 0], sizes = [32, 128], strides = [1, 1]} : vector<64x128xf32> to vector<32x128xf32>
    %cst_129 = arith.constant 0.000000e+00 : f32
    %292 = vector.broadcast %cst_129 : f32 to vector<32x128xf32>
    %293 = arith.maximumf %291, %292 : vector<32x128xf32>
    %294 = arith.mulf %290, %293 : vector<32x128xf32>
    %cst_130 = arith.constant 1.000000e+00 : f32
    %295 = vector.broadcast %cst_130 : f32 to vector<32x128xf32>
    %296 = arith.subf %295, %290 : vector<32x128xf32>
    %297 = arith.mulf %296, %263 : vector<32x128xf32>
    %298 = arith.addf %294, %297 : vector<32x128xf32>
    %c3_i32_131 = arith.constant 3 : i32
    %299 = tpu.dynamic_rotate %298 by %c3_i32_131 dim 1 : vector<32x128xf32>, i32 -> vector<32x128xf32>
    %cst_132 = arith.constant 0.000000e+00 : f32
    %300 = vector.broadcast %cst_132 : f32 to vector<32x128xf32>
    %301 = arith.select %60, %299, %300 : vector<32x128xi1>, vector<32x128xf32>
    %c125_i32_133 = arith.constant 125 : i32
    %302 = tpu.dynamic_rotate %298 by %c125_i32_133 dim 1 : vector<32x128xf32>, i32 -> vector<32x128xf32>
    %cst_134 = arith.constant 0.000000e+00 : f32
    %303 = vector.broadcast %cst_134 : f32 to vector<32x128xf32>
    %304 = arith.select %61, %302, %303 : vector<32x128xi1>, vector<32x128xf32>
    %c15 = arith.constant 15 : index
    %c0_135 = arith.constant 0 : index
    %c0_136 = arith.constant 0 : index
    %305 = vector.load %arg4[%c15, %c0_135, %c0_136] : memref<27x64x32xf32, #tpu.memory_space<vmem>>, vector<1x64x32xf32>
    %306 = vector.shape_cast %305 : vector<1x64x32xf32> to vector<64x32xf32>
    %cst_137 = arith.constant dense<0.000000e+00> : vector<64x128xf32>
    %307 = tpu.matmul %306, %301, %cst_137 {dimension_numbers = #tpu.dot_dimension_numbers<[1], [0], [0], [1], [0, 0, 1, 1], [], []>} : vector<64x32xf32>, vector<32x128xf32>, vector<64x128xf32> -> vector<64x128xf32>
    %c16 = arith.constant 16 : index
    %c0_138 = arith.constant 0 : index
    %c0_139 = arith.constant 0 : index
    %308 = vector.load %arg4[%c16, %c0_138, %c0_139] : memref<27x64x32xf32, #tpu.memory_space<vmem>>, vector<1x64x32xf32>
    %309 = vector.shape_cast %308 : vector<1x64x32xf32> to vector<64x32xf32>
    %cst_140 = arith.constant dense<0.000000e+00> : vector<64x128xf32>
    %310 = tpu.matmul %309, %298, %cst_140 {dimension_numbers = #tpu.dot_dimension_numbers<[1], [0], [0], [1], [0, 0, 1, 1], [], []>} : vector<64x32xf32>, vector<32x128xf32>, vector<64x128xf32> -> vector<64x128xf32>
    %311 = arith.addf %307, %310 : vector<64x128xf32>
    %c17 = arith.constant 17 : index
    %c0_141 = arith.constant 0 : index
    %c0_142 = arith.constant 0 : index
    %312 = vector.load %arg4[%c17, %c0_141, %c0_142] : memref<27x64x32xf32, #tpu.memory_space<vmem>>, vector<1x64x32xf32>
    %313 = vector.shape_cast %312 : vector<1x64x32xf32> to vector<64x32xf32>
    %cst_143 = arith.constant dense<0.000000e+00> : vector<64x128xf32>
    %314 = tpu.matmul %313, %304, %cst_143 {dimension_numbers = #tpu.dot_dimension_numbers<[1], [0], [0], [1], [0, 0, 1, 1], [], []>} : vector<64x32xf32>, vector<32x128xf32>, vector<64x128xf32> -> vector<64x128xf32>
    %315 = arith.addf %311, %314 : vector<64x128xf32>
    %c5_144 = arith.constant 5 : index
    %c0_145 = arith.constant 0 : index
    %c0_146 = arith.constant 0 : index
    %316 = vector.load %arg5[%c5_144, %c0_145, %c0_146] : memref<9x64x1xf32, #tpu.memory_space<vmem>>, vector<1x64x1xf32>
    %317 = vector.shape_cast %316 : vector<1x64x1xf32> to vector<64x1xf32>
    %318 = vector.broadcast %317 : vector<64x1xf32> to vector<64x128xf32>
    %319 = arith.addf %315, %318 : vector<64x128xf32>
    %320 = vector.extract_strided_slice %319 {offsets = [0, 0], sizes = [32, 128], strides = [1, 1]} : vector<64x128xf32> to vector<32x128xf32>
    %321 = arith.negf %320 : vector<32x128xf32>
    %322 = math.exp %321 : vector<32x128xf32>
    %cst_147 = arith.constant 1.000000e+00 : f32
    %323 = vector.broadcast %cst_147 : f32 to vector<32x128xf32>
    %324 = arith.addf %323, %322 : vector<32x128xf32>
    %325 = arith.divf %323, %324 : vector<32x128xf32>
    %326 = vector.extract_strided_slice %319 {offsets = [32, 0], sizes = [32, 128], strides = [1, 1]} : vector<64x128xf32> to vector<32x128xf32>
    %cst_148 = arith.constant 0.000000e+00 : f32
    %327 = vector.broadcast %cst_148 : f32 to vector<32x128xf32>
    %328 = arith.maximumf %326, %327 : vector<32x128xf32>
    %329 = arith.mulf %325, %328 : vector<32x128xf32>
    %cst_149 = arith.constant 1.000000e+00 : f32
    %330 = vector.broadcast %cst_149 : f32 to vector<32x128xf32>
    %331 = arith.subf %330, %325 : vector<32x128xf32>
    %332 = arith.mulf %331, %298 : vector<32x128xf32>
    %333 = arith.addf %329, %332 : vector<32x128xf32>
    %c9_i32_150 = arith.constant 9 : i32
    %334 = tpu.dynamic_rotate %333 by %c9_i32_150 dim 1 : vector<32x128xf32>, i32 -> vector<32x128xf32>
    %cst_151 = arith.constant 0.000000e+00 : f32
    %335 = vector.broadcast %cst_151 : f32 to vector<32x128xf32>
    %336 = arith.select %82, %334, %335 : vector<32x128xi1>, vector<32x128xf32>
    %c119_i32_152 = arith.constant 119 : i32
    %337 = tpu.dynamic_rotate %333 by %c119_i32_152 dim 1 : vector<32x128xf32>, i32 -> vector<32x128xf32>
    %cst_153 = arith.constant 0.000000e+00 : f32
    %338 = vector.broadcast %cst_153 : f32 to vector<32x128xf32>
    %339 = arith.select %83, %337, %338 : vector<32x128xi1>, vector<32x128xf32>
    %c18 = arith.constant 18 : index
    %c0_154 = arith.constant 0 : index
    %c0_155 = arith.constant 0 : index
    %340 = vector.load %arg4[%c18, %c0_154, %c0_155] : memref<27x64x32xf32, #tpu.memory_space<vmem>>, vector<1x64x32xf32>
    %341 = vector.shape_cast %340 : vector<1x64x32xf32> to vector<64x32xf32>
    %cst_156 = arith.constant dense<0.000000e+00> : vector<64x128xf32>
    %342 = tpu.matmul %341, %336, %cst_156 {dimension_numbers = #tpu.dot_dimension_numbers<[1], [0], [0], [1], [0, 0, 1, 1], [], []>} : vector<64x32xf32>, vector<32x128xf32>, vector<64x128xf32> -> vector<64x128xf32>
    %c19 = arith.constant 19 : index
    %c0_157 = arith.constant 0 : index
    %c0_158 = arith.constant 0 : index
    %343 = vector.load %arg4[%c19, %c0_157, %c0_158] : memref<27x64x32xf32, #tpu.memory_space<vmem>>, vector<1x64x32xf32>
    %344 = vector.shape_cast %343 : vector<1x64x32xf32> to vector<64x32xf32>
    %cst_159 = arith.constant dense<0.000000e+00> : vector<64x128xf32>
    %345 = tpu.matmul %344, %333, %cst_159 {dimension_numbers = #tpu.dot_dimension_numbers<[1], [0], [0], [1], [0, 0, 1, 1], [], []>} : vector<64x32xf32>, vector<32x128xf32>, vector<64x128xf32> -> vector<64x128xf32>
    %346 = arith.addf %342, %345 : vector<64x128xf32>
    %c20 = arith.constant 20 : index
    %c0_160 = arith.constant 0 : index
    %c0_161 = arith.constant 0 : index
    %347 = vector.load %arg4[%c20, %c0_160, %c0_161] : memref<27x64x32xf32, #tpu.memory_space<vmem>>, vector<1x64x32xf32>
    %348 = vector.shape_cast %347 : vector<1x64x32xf32> to vector<64x32xf32>
    %cst_162 = arith.constant dense<0.000000e+00> : vector<64x128xf32>
    %349 = tpu.matmul %348, %339, %cst_162 {dimension_numbers = #tpu.dot_dimension_numbers<[1], [0], [0], [1], [0, 0, 1, 1], [], []>} : vector<64x32xf32>, vector<32x128xf32>, vector<64x128xf32> -> vector<64x128xf32>
    %350 = arith.addf %346, %349 : vector<64x128xf32>
    %c6_163 = arith.constant 6 : index
    %c0_164 = arith.constant 0 : index
    %c0_165 = arith.constant 0 : index
    %351 = vector.load %arg5[%c6_163, %c0_164, %c0_165] : memref<9x64x1xf32, #tpu.memory_space<vmem>>, vector<1x64x1xf32>
    %352 = vector.shape_cast %351 : vector<1x64x1xf32> to vector<64x1xf32>
    %353 = vector.broadcast %352 : vector<64x1xf32> to vector<64x128xf32>
    %354 = arith.addf %350, %353 : vector<64x128xf32>
    %355 = vector.extract_strided_slice %354 {offsets = [0, 0], sizes = [32, 128], strides = [1, 1]} : vector<64x128xf32> to vector<32x128xf32>
    %356 = arith.negf %355 : vector<32x128xf32>
    %357 = math.exp %356 : vector<32x128xf32>
    %cst_166 = arith.constant 1.000000e+00 : f32
    %358 = vector.broadcast %cst_166 : f32 to vector<32x128xf32>
    %359 = arith.addf %358, %357 : vector<32x128xf32>
    %360 = arith.divf %358, %359 : vector<32x128xf32>
    %361 = vector.extract_strided_slice %354 {offsets = [32, 0], sizes = [32, 128], strides = [1, 1]} : vector<64x128xf32> to vector<32x128xf32>
    %cst_167 = arith.constant 0.000000e+00 : f32
    %362 = vector.broadcast %cst_167 : f32 to vector<32x128xf32>
    %363 = arith.maximumf %361, %362 : vector<32x128xf32>
    %364 = arith.mulf %360, %363 : vector<32x128xf32>
    %cst_168 = arith.constant 1.000000e+00 : f32
    %365 = vector.broadcast %cst_168 : f32 to vector<32x128xf32>
    %366 = arith.subf %365, %360 : vector<32x128xf32>
    %367 = arith.mulf %366, %333 : vector<32x128xf32>
    %368 = arith.addf %364, %367 : vector<32x128xf32>
    %c27_i32_169 = arith.constant 27 : i32
    %369 = tpu.dynamic_rotate %368 by %c27_i32_169 dim 1 : vector<32x128xf32>, i32 -> vector<32x128xf32>
    %cst_170 = arith.constant 0.000000e+00 : f32
    %370 = vector.broadcast %cst_170 : f32 to vector<32x128xf32>
    %371 = arith.select %104, %369, %370 : vector<32x128xi1>, vector<32x128xf32>
    %c101_i32_171 = arith.constant 101 : i32
    %372 = tpu.dynamic_rotate %368 by %c101_i32_171 dim 1 : vector<32x128xf32>, i32 -> vector<32x128xf32>
    %cst_172 = arith.constant 0.000000e+00 : f32
    %373 = vector.broadcast %cst_172 : f32 to vector<32x128xf32>
    %374 = arith.select %105, %372, %373 : vector<32x128xi1>, vector<32x128xf32>
    %c21 = arith.constant 21 : index
    %c0_173 = arith.constant 0 : index
    %c0_174 = arith.constant 0 : index
    %375 = vector.load %arg4[%c21, %c0_173, %c0_174] : memref<27x64x32xf32, #tpu.memory_space<vmem>>, vector<1x64x32xf32>
    %376 = vector.shape_cast %375 : vector<1x64x32xf32> to vector<64x32xf32>
    %cst_175 = arith.constant dense<0.000000e+00> : vector<64x128xf32>
    %377 = tpu.matmul %376, %371, %cst_175 {dimension_numbers = #tpu.dot_dimension_numbers<[1], [0], [0], [1], [0, 0, 1, 1], [], []>} : vector<64x32xf32>, vector<32x128xf32>, vector<64x128xf32> -> vector<64x128xf32>
    %c22 = arith.constant 22 : index
    %c0_176 = arith.constant 0 : index
    %c0_177 = arith.constant 0 : index
    %378 = vector.load %arg4[%c22, %c0_176, %c0_177] : memref<27x64x32xf32, #tpu.memory_space<vmem>>, vector<1x64x32xf32>
    %379 = vector.shape_cast %378 : vector<1x64x32xf32> to vector<64x32xf32>
    %cst_178 = arith.constant dense<0.000000e+00> : vector<64x128xf32>
    %380 = tpu.matmul %379, %368, %cst_178 {dimension_numbers = #tpu.dot_dimension_numbers<[1], [0], [0], [1], [0, 0, 1, 1], [], []>} : vector<64x32xf32>, vector<32x128xf32>, vector<64x128xf32> -> vector<64x128xf32>
    %381 = arith.addf %377, %380 : vector<64x128xf32>
    %c23 = arith.constant 23 : index
    %c0_179 = arith.constant 0 : index
    %c0_180 = arith.constant 0 : index
    %382 = vector.load %arg4[%c23, %c0_179, %c0_180] : memref<27x64x32xf32, #tpu.memory_space<vmem>>, vector<1x64x32xf32>
    %383 = vector.shape_cast %382 : vector<1x64x32xf32> to vector<64x32xf32>
    %cst_181 = arith.constant dense<0.000000e+00> : vector<64x128xf32>
    %384 = tpu.matmul %383, %374, %cst_181 {dimension_numbers = #tpu.dot_dimension_numbers<[1], [0], [0], [1], [0, 0, 1, 1], [], []>} : vector<64x32xf32>, vector<32x128xf32>, vector<64x128xf32> -> vector<64x128xf32>
    %385 = arith.addf %381, %384 : vector<64x128xf32>
    %c7_182 = arith.constant 7 : index
    %c0_183 = arith.constant 0 : index
    %c0_184 = arith.constant 0 : index
    %386 = vector.load %arg5[%c7_182, %c0_183, %c0_184] : memref<9x64x1xf32, #tpu.memory_space<vmem>>, vector<1x64x1xf32>
    %387 = vector.shape_cast %386 : vector<1x64x1xf32> to vector<64x1xf32>
    %388 = vector.broadcast %387 : vector<64x1xf32> to vector<64x128xf32>
    %389 = arith.addf %385, %388 : vector<64x128xf32>
    %390 = vector.extract_strided_slice %389 {offsets = [0, 0], sizes = [32, 128], strides = [1, 1]} : vector<64x128xf32> to vector<32x128xf32>
    %391 = arith.negf %390 : vector<32x128xf32>
    %392 = math.exp %391 : vector<32x128xf32>
    %cst_185 = arith.constant 1.000000e+00 : f32
    %393 = vector.broadcast %cst_185 : f32 to vector<32x128xf32>
    %394 = arith.addf %393, %392 : vector<32x128xf32>
    %395 = arith.divf %393, %394 : vector<32x128xf32>
    %396 = vector.extract_strided_slice %389 {offsets = [32, 0], sizes = [32, 128], strides = [1, 1]} : vector<64x128xf32> to vector<32x128xf32>
    %cst_186 = arith.constant 0.000000e+00 : f32
    %397 = vector.broadcast %cst_186 : f32 to vector<32x128xf32>
    %398 = arith.maximumf %396, %397 : vector<32x128xf32>
    %399 = arith.mulf %395, %398 : vector<32x128xf32>
    %cst_187 = arith.constant 1.000000e+00 : f32
    %400 = vector.broadcast %cst_187 : f32 to vector<32x128xf32>
    %401 = arith.subf %400, %395 : vector<32x128xf32>
    %402 = arith.mulf %401, %368 : vector<32x128xf32>
    %403 = arith.addf %399, %402 : vector<32x128xf32>
    %c1_i32_188 = arith.constant 1 : i32
    %404 = tpu.dynamic_rotate %403 by %c1_i32_188 dim 1 : vector<32x128xf32>, i32 -> vector<32x128xf32>
    %cst_189 = arith.constant 0.000000e+00 : f32
    %405 = vector.broadcast %cst_189 : f32 to vector<32x128xf32>
    %406 = arith.select %38, %404, %405 : vector<32x128xi1>, vector<32x128xf32>
    %c127_i32_190 = arith.constant 127 : i32
    %407 = tpu.dynamic_rotate %403 by %c127_i32_190 dim 1 : vector<32x128xf32>, i32 -> vector<32x128xf32>
    %cst_191 = arith.constant 0.000000e+00 : f32
    %408 = vector.broadcast %cst_191 : f32 to vector<32x128xf32>
    %409 = arith.select %39, %407, %408 : vector<32x128xi1>, vector<32x128xf32>
    %c24 = arith.constant 24 : index
    %c0_192 = arith.constant 0 : index
    %c0_193 = arith.constant 0 : index
    %410 = vector.load %arg4[%c24, %c0_192, %c0_193] : memref<27x64x32xf32, #tpu.memory_space<vmem>>, vector<1x64x32xf32>
    %411 = vector.shape_cast %410 : vector<1x64x32xf32> to vector<64x32xf32>
    %cst_194 = arith.constant dense<0.000000e+00> : vector<64x128xf32>
    %412 = tpu.matmul %411, %406, %cst_194 {dimension_numbers = #tpu.dot_dimension_numbers<[1], [0], [0], [1], [0, 0, 1, 1], [], []>} : vector<64x32xf32>, vector<32x128xf32>, vector<64x128xf32> -> vector<64x128xf32>
    %c25 = arith.constant 25 : index
    %c0_195 = arith.constant 0 : index
    %c0_196 = arith.constant 0 : index
    %413 = vector.load %arg4[%c25, %c0_195, %c0_196] : memref<27x64x32xf32, #tpu.memory_space<vmem>>, vector<1x64x32xf32>
    %414 = vector.shape_cast %413 : vector<1x64x32xf32> to vector<64x32xf32>
    %cst_197 = arith.constant dense<0.000000e+00> : vector<64x128xf32>
    %415 = tpu.matmul %414, %403, %cst_197 {dimension_numbers = #tpu.dot_dimension_numbers<[1], [0], [0], [1], [0, 0, 1, 1], [], []>} : vector<64x32xf32>, vector<32x128xf32>, vector<64x128xf32> -> vector<64x128xf32>
    %416 = arith.addf %412, %415 : vector<64x128xf32>
    %c26 = arith.constant 26 : index
    %c0_198 = arith.constant 0 : index
    %c0_199 = arith.constant 0 : index
    %417 = vector.load %arg4[%c26, %c0_198, %c0_199] : memref<27x64x32xf32, #tpu.memory_space<vmem>>, vector<1x64x32xf32>
    %418 = vector.shape_cast %417 : vector<1x64x32xf32> to vector<64x32xf32>
    %cst_200 = arith.constant dense<0.000000e+00> : vector<64x128xf32>
    %419 = tpu.matmul %418, %409, %cst_200 {dimension_numbers = #tpu.dot_dimension_numbers<[1], [0], [0], [1], [0, 0, 1, 1], [], []>} : vector<64x32xf32>, vector<32x128xf32>, vector<64x128xf32> -> vector<64x128xf32>
    %420 = arith.addf %416, %419 : vector<64x128xf32>
    %c8_201 = arith.constant 8 : index
    %c0_202 = arith.constant 0 : index
    %c0_203 = arith.constant 0 : index
    %421 = vector.load %arg5[%c8_201, %c0_202, %c0_203] : memref<9x64x1xf32, #tpu.memory_space<vmem>>, vector<1x64x1xf32>
    %422 = vector.shape_cast %421 : vector<1x64x1xf32> to vector<64x1xf32>
    %423 = vector.broadcast %422 : vector<64x1xf32> to vector<64x128xf32>
    %424 = arith.addf %420, %423 : vector<64x128xf32>
    %425 = vector.extract_strided_slice %424 {offsets = [0, 0], sizes = [32, 128], strides = [1, 1]} : vector<64x128xf32> to vector<32x128xf32>
    %426 = arith.negf %425 : vector<32x128xf32>
    %427 = math.exp %426 : vector<32x128xf32>
    %cst_204 = arith.constant 1.000000e+00 : f32
    %428 = vector.broadcast %cst_204 : f32 to vector<32x128xf32>
    %429 = arith.addf %428, %427 : vector<32x128xf32>
    %430 = arith.divf %428, %429 : vector<32x128xf32>
    %431 = vector.extract_strided_slice %424 {offsets = [32, 0], sizes = [32, 128], strides = [1, 1]} : vector<64x128xf32> to vector<32x128xf32>
    %cst_205 = arith.constant 0.000000e+00 : f32
    %432 = vector.broadcast %cst_205 : f32 to vector<32x128xf32>
    %433 = arith.maximumf %431, %432 : vector<32x128xf32>
    %434 = arith.mulf %430, %433 : vector<32x128xf32>
    %cst_206 = arith.constant 1.000000e+00 : f32
    %435 = vector.broadcast %cst_206 : f32 to vector<32x128xf32>
    %436 = arith.subf %435, %430 : vector<32x128xf32>
    %437 = arith.mulf %436, %403 : vector<32x128xf32>
    %438 = arith.addf %434, %437 : vector<32x128xf32>
    %c2_207 = arith.constant 2 : index
    %c0_208 = arith.constant 0 : index
    %c0_209 = arith.constant 0 : index
    %439 = vector.load %arg2[%c2_207, %c0_208, %c0_209] : memref<3x32x32xf32, #tpu.memory_space<vmem>>, vector<1x32x32xf32>
    %440 = vector.shape_cast %439 : vector<1x32x32xf32> to vector<32x32xf32>
    %c2_210 = arith.constant 2 : index
    %c0_211 = arith.constant 0 : index
    %c0_212 = arith.constant 0 : index
    %441 = vector.load %arg3[%c2_210, %c0_211, %c0_212] : memref<3x32x1xf32, #tpu.memory_space<vmem>>, vector<1x32x1xf32>
    %442 = vector.shape_cast %441 : vector<1x32x1xf32> to vector<32x1xf32>
    %cst_213 = arith.constant dense<0.000000e+00> : vector<32x128xf32>
    %443 = tpu.matmul %440, %438, %cst_213 {dimension_numbers = #tpu.dot_dimension_numbers<[1], [0], [0], [1], [0, 0, 1, 1], [], []>} : vector<32x32xf32>, vector<32x128xf32>, vector<32x128xf32> -> vector<32x128xf32>
    %444 = vector.broadcast %442 : vector<32x1xf32> to vector<32x128xf32>
    %445 = arith.addf %443, %444 : vector<32x128xf32>
    %cst_214 = arith.constant 0.000000e+00 : f32
    %446 = vector.broadcast %cst_214 : f32 to vector<32x128xf32>
    %447 = arith.maximumf %445, %446 : vector<32x128xf32>
    %c0_215 = arith.constant 0 : index
    %c0_216 = arith.constant 0 : index
    %448 = vector.load %arg6[%c0_215, %c0_216] : memref<16x32xf32, #tpu.memory_space<vmem>>, vector<16x32xf32>
    %cst_217 = arith.constant dense<0.000000e+00> : vector<16x128xf32>
    %449 = tpu.matmul %448, %447, %cst_217 {dimension_numbers = #tpu.dot_dimension_numbers<[1], [0], [0], [1], [0, 0, 1, 1], [], []>} : vector<16x32xf32>, vector<32x128xf32>, vector<16x128xf32> -> vector<16x128xf32>
    %c0_218 = arith.constant 0 : index
    %c0_219 = arith.constant 0 : index
    %450 = vector.load %arg7[%c0_218, %c0_219] : memref<16x1xf32, #tpu.memory_space<vmem>>, vector<16x1xf32>
    %451 = vector.broadcast %450 : vector<16x1xf32> to vector<16x128xf32>
    %452 = arith.addf %449, %451 : vector<16x128xf32>
    %c0_220 = arith.constant 0 : index
    %c0_221 = arith.constant 0 : index
    %453 = vector.load %arg8[%c0_220, %c0_221] : memref<16x128xf32, #tpu.memory_space<vmem>>, vector<16x128xf32>
    tpu.vector_store %arg8[%c0_220, %c0_221], %452 {strides = array<i32>} : memref<16x128xf32, #tpu.memory_space<vmem>>, vector<16x128xf32>,
    return
  }
}

</mosaic_0001>

<bundles_post_ra>
// kernel: model_forward.1
= control target key start
LH: loop header
LB: loop body
LE: loop exit
PB: predicated region body
PF: predicated region fallthrough
CT: control target
= control target key end

     0   :  { %v37_v0 = vlaneseq  ;;  %vm78_vm0 = vcmask 523264   ;;  %v8080_v15 = vmov 1.0|1.0   ;;  %v8081_v22 = vmov 0   ;;  %s8083_s9 = smov 127   ;;  %s8084_s29 = smov 3   ;;  %s9768_s0 = inlined_call_operand.vmem [shape: s32[1,128], index: 0, kind: input, shape index: {}]   ;;  %s9769_s1 = inlined_call_operand.vmem [shape: f32[32,64], index: 1, kind: input, shape index: {}]   ;;  %s9770_s2 = inlined_call_operand.vmem [shape: f32[3,32,32], index: 2, kind: input, shape index: {}]   ;;  %s9771_s3 = inlined_call_operand.vmem [shape: f32[3,32,1], index: 3, kind: input, shape index: {}]   ;;  %s9772_s4 = inlined_call_operand.vmem [shape: f32[27,64,32], index: 4, kind: input, shape index: {}]   ;;  %s9773_s5 = inlined_call_operand.vmem [shape: f32[9,64,1], index: 5, kind: input, shape index: {}]   ;;  %s9774_s7 = inlined_call_operand.vmem [shape: f32[16,1], index: 7, kind: input, shape index: {}]   ;;  %s9775_s6 = inlined_call_operand.vmem [shape: f32[16,32], index: 6, kind: input, shape index: {}]   ;;  %s9776_s8 = inlined_call_operand.vmem [shape: f32[16,128], index: 8, kind: output, shape index: {}]  }
   0x1   :  { %v29_v1 = vld [vmem:[%s9768_s0] sm:$0x1]  ;;  %v75_v18 = vld [vmem:[%s9769_s1 + $0x8] sm:$0xff]  ;;  %v76_v19 = vld [vmem:[%s9769_s1 + $0x10] sm:$0xff]  ;;  %7754 = vset.pattern.permute.xlu0 %v8081_v22  ;;  %7755 = vset.pattern.permute.xlu1 %v8081_v22  ;;  %s8082_s0 = smov 1   ;;  %s8085_s30 = smov 125  }
   0x2   :  { %v74_v2 = vld [vmem:[%s9769_s1] sm:$0xff]  ;;  %vm30_vm1 = vcmp.gt.s32.totalorder %v29_v1, 0  ;;  %v5636_v3 = vadd.s32 4294967276, %v29_v1  ;;  %v38_v4 = vshrl.u32 %v37_v0, 7  ;;  %v77_v20 = vld [vmem:[%s9769_s1 + $0x18] sm:$0xff]  ;;  %v228_v24 = vld [vmem:[%s9771_s3 + $0x10] sm:$0xff] }
   0x3   :  { %6665 = vmatprep.mubr.msk.f32.mxu1 %vm78_vm0, %v74_v2  ;;  %v222_v21 = vld [vmem:[%s9770_s2] sm:$0xff]  ;;  %242 = vperm.xlu1 %7755, %v228_v24   ;;  %v227_v25 = vld [vmem:[%s9771_s3 + $0x8] sm:$0xff]  ;;  %v229_v26 = vld [vmem:[%s9771_s3 + $0x18] sm:$0xff]  ;;  %s8086_s14 = smov 9   ;;  %s8087_s15 = smov 119  }
   0x4   :  { %v32_v5 = vsel %vm30_vm1, %v5636_v3, %v29_v1  ;;  %v48_v6 = vsub.s32 0, %v38_v4  ;;  %v39_v8 = vadd.s32 8, %v38_v4  ;;  %v40_v9 = vadd.s32 16, %v38_v4  ;;  %v226_v23 = vld [vmem:[%s9771_s3] sm:$0xff]  ;;  %v223_v33 = vld [vmem:[%s9770_s2 + $0x8] sm:$0xff]  ;;  %v224_v34 = vld [vmem:[%s9770_s2 + $0x10] sm:$0xff] }
   0x5   :  { %vm33_vm2 = vcmp.gt.s32.totalorder %v32_v5, 0  ;;  %v41_v10 = vadd.s32 24, %v38_v4  ;;  %v42_v13 = vadd.s32 32, %v38_v4  ;;  %v43_v14 = vadd.s32 40, %v38_v4  ;;  %232 = vperm.xlu0 %7754, %v226_v23   ;;  %v225_v35 = vld [vmem:[%s9770_s2 + $0x18] sm:$0xff]  ;;  %v5661_v36 = vld [vmem:[%s9772_s4 + $0x40] sm:$0xff] }
   0x6   :  { %v34_v7 = vsel %vm33_vm2, %v32_v5, 0  ;;  %v44_v16 = vadd.s32 48, %v38_v4  ;;  %v45_v17 = vadd.s32 56, %v38_v4  ;;  %vm9777_vm1 = vcmask 261120   ;;  %v797_v57 = vld [vmem:[%s9773_s5] sm:$0xff]  ;;  %v5662_v58 = vld [vmem:[%s9772_s4 + $0x48] sm:$0xff] }
   0x7   :  { %vm35_vm3 = vcmp.lt.s32.totalorder %v34_v7, 63  ;;  %247 = vperm.xlu1 %7755, %v229_v26   ;;  %v5663_v59 = vld [vmem:[%s9772_s4 + $0x50] sm:$0xff]  ;;  %v798_v60 = vld [vmem:[%s9773_s5 + $0x8] sm:$0xff]  ;;  %v5664_v62 = vld [vmem:[%s9772_s4 + $0x58] sm:$0xff]  ;;  %s8088_s25 = smov 27   ;;  %s8089_s26 = smov 101  }
   0x8   :  { %v36_v11 = vsel %vm35_vm3, %v34_v7, 63  ;;  %v799_v61 = vld [vmem:[%s9773_s5 + $0x10] sm:$0xff]  ;;  %v5665_v63 = vld [vmem:[%s9772_s4 + $0x60] sm:$0xff]  ;;  %v800_v1 = vld [vmem:[%s9773_s5 + $0x18] sm:$0xff] }
   0x9   :  { %v49_v12 = vrot.slane %v36_v11, %v48_v6  ;;  %237 = vperm.xlu0 %7754, %v227_v25   ;;  %v801_v2 = vld [vmem:[%s9773_s5 + $0x20] sm:$0xff]  ;;  %v5666_v3 = vld [vmem:[%s9772_s4 + $0x68] sm:$0xff]  ;;  %v803_v6 = vld [vmem:[%s9773_s5 + $0x30] sm:$0xff] }
   0xa   :  { %v802_v5 = vld [vmem:[%s9773_s5 + $0x28] sm:$0xff]  ;;  %v5668_v7 = vld [vmem:[%s9772_s4 + $0x78] sm:$0xff]  ;;  %v6237_v23 = vld [vmem:[%s9772_s4 + $0x680] sm:$0xff] }
   0xb   :  { %vm50_vm4 = vcmp.eq.s32.totalorder %v38_v4, %v49_v12  ;;  %vm51_vm5 = vcmp.eq.s32.totalorder %v39_v8, %v49_v12  ;;  %vm52_vm6 = vcmp.eq.s32.totalorder %v40_v9, %v49_v12  ;;  %vm53_vm7 = vcmp.eq.s32.totalorder %v41_v10, %v49_v12  ;;  %v5667_v4 = vld [vmem:[%s9772_s4 + $0x70] sm:$0xff]  ;;  %v376_v8 = vld [vmem:[%s9772_s4] sm:$0xff]  ;;  %v804_v9 = vld [vmem:[%s9773_s5 + $0x38] sm:$0xff] }
   0xc   :  { %vm7264_vm8 = vmpackc.low %vm51_vm5, %vm50_vm4  ;;  %vm54_vm10 = vcmp.eq.s32.totalorder %v42_v13, %v49_v12  ;;  %vm55_vm11 = vcmp.eq.s32.totalorder %v43_v14, %v49_v12  ;;  %vm56_vm13 = vcmp.eq.s32.totalorder %v44_v16, %v49_v12  ;;  %vm57_vm14 = vcmp.eq.s32.totalorder %v45_v17, %v49_v12 }
   0xd   :  { %7265 = vmatprep.subr.msk.bf16.mxu1 %vm7264_vm8, %v8080_v15  ;;  %vm7268_vm9 = vmpackc.low %vm53_vm7, %vm52_vm6  ;;  %v8264_v10 = vand.u32 127, %v37_v0  ;;  %v6204_v0 = vld [vmem:[%s9772_s4 + $0x618] sm:$0xff] }
   0xe   :  { %7267 = vmatpush3.bf16.msk.msra.mxu1 %vm7264_vm8, %v8080_v15  ;;  %vm7272_vm12 = vmpackc.low %vm55_vm11, %vm54_vm10 }
   0xf   :  { %7269 = vmatprep.subr.msk.bf16.mxu1 %vm7268_vm9, %v8080_v15  ;;  %vm7276_vm15 = vmpackc.low %vm57_vm14, %vm56_vm13  ;;  %vm179_vm2 = vcmp.lt.s32.totalorder %v8264_v10, 64  ;;  %vm184_vm4 = vcmp.ge.s32.totalorder %v8264_v10, 65  ;;  %vm187_vm6 = vcmp.ge.s32.totalorder %v8264_v10, 64  ;;  %vm188_vm7 = vcmp.lt.s32.totalorder %v8264_v10, 127 }
  0x10   :  { %vm189_vm10 = vmand %vm187_vm6, %vm188_vm7  ;;  %vm192_vm13 = vcmp.ge.s32.totalorder %v8264_v10, 3 }
  0x11   :  { %vm193_vm14 = vmand %vm192_vm13, %vm179_vm2 }
  0x12   :  { %7271 = vmatpush3.bf16.msk.msra.mxu1 %vm7268_vm9, %v8080_v15  ;;  %vm182_vm9 = vcmp.lt.s32.totalorder %v8264_v10, 63 }
  0x13   :  { %7273 = vmatprep.subr.msk.bf16.mxu1 %vm7272_vm12, %v8080_v15  ;;  %vm191_vm11 = vmor %vm182_vm9, %vm189_vm10 }
  0x16   :  { %7275 = vmatpush3.bf16.msk.msra.mxu1 %vm7272_vm12, %v8080_v15  ;;  %vm8284_vm12 = vmpackc.low %vm191_vm11, %vm191_vm11  ;;  %vm202_vm11 = vcmp.ge.s32.totalorder %v8264_v10, 9 }
  0x17   :  { %7277 = vmatprep.subr.msk.bf16.mxu1 %vm7276_vm15, %v8080_v15  ;;  %vm203_vm13 = vmand %vm202_vm11, %vm179_vm2 }
  0x1a   :  { %7279 = vmatpush3.bf16.msk.msra.mxu1 %vm7276_vm15, %v8080_v15  ;;  %vm196_vm15 = vcmp.ge.s32.totalorder %v8264_v10, 67 }
  0x1d   :  { %6666 = vmatmul.mubr.msk.f32.vlgmr.msra.gmra.mrb[0].mxu1 %vm78_vm0, %v75_v18 }
  0x1e   :  { %6668 = vmatprep.mubr.msk.f32.mxu1 %vm78_vm0, %v76_v19 }
  0x21   :  { %6669 = vmatmul.mubr.msk.f32.gmra.mrb[2].mxu1 %vm78_vm0, %v77_v20  ;;  %vm178_vm0 = vcmp.ge.s32.totalorder %v8264_v10, 1 }
  0x22   :  { %6679 = vmatprep.mubr.msk.f32.mxu1 %vm9777_vm1, %v222_v21  ;;  %vm180_vm3 = vmand %vm178_vm0, %vm179_vm2 }
  0x23   :  { %vm190_vm5 = vmor %vm180_vm3, %vm184_vm4  ;;  %vm198_vm3 = vcmp.lt.s32.totalorder %v8264_v10, 125 }
  0x24   :  { %vm8273_vm8 = vmpackc.low %vm190_vm5, %vm190_vm5  ;;  %vm194_vm5 = vcmp.lt.s32.totalorder %v8264_v10, 61 }
  0x25   :  { %vm200_vm0 = vmor %vm193_vm14, %vm196_vm15  ;;  %vm206_vm14 = vcmp.ge.s32.totalorder %v8264_v10, 73 }
  0x26   :  { %vm8449_vm4 = vmpackc.low %vm200_vm0, %vm200_vm0  ;;  %vm208_vm0 = vcmp.lt.s32.totalorder %v8264_v10, 119 }
  0x27   :  { %vm199_vm7 = vmand %vm187_vm6, %vm198_vm3 }
  0x28   :  { %vm201_vm9 = vmor %vm194_vm5, %vm199_vm7  ;;  %vm204_vm5 = vcmp.lt.s32.totalorder %v8264_v10, 55 }
  0x29   :  { %vm8460_vm10 = vmpackc.low %vm201_vm9, %vm201_vm9 }
  0x2a   :  { %vm210_vm15 = vmor %vm203_vm13, %vm206_vm14  ;;  %vm212_vm13 = vcmp.ge.s32.totalorder %v8264_v10, 27 }
  0x2b   :  { %vm8625_vm3 = vmpackc.low %vm210_vm15, %vm210_vm15  ;;  %vm216_vm15 = vcmp.ge.s32.totalorder %v8264_v10, 91 }
  0x2c   :  { %vm209_vm7 = vmand %vm187_vm6, %vm208_vm0 }
  0x2d   :  { %vm211_vm9 = vmor %vm204_vm5, %vm209_vm7  ;;  %vm218_vm5 = vcmp.lt.s32.totalorder %v8264_v10, 101 }
  0x2e   :  { %vm8636_vm11 = vmpackc.low %vm211_vm9, %vm211_vm9  ;;  %vm214_vm9 = vcmp.lt.s32.totalorder %v8264_v10, 37 }
  0x2f   :  { %vm213_vm14 = vmand %vm212_vm13, %vm179_vm2 }
  0x30   :  { %vm220_vm0 = vmor %vm213_vm14, %vm216_vm15 }
  0x31   :  { %vm8813_vm7 = vmpackc.low %vm220_vm0, %vm220_vm0 }
  0x82   :  { %v243_v38 = vpop.permute.xlu1 %242 }
  0x84   :  { %v233_v37 = vpop.permute.xlu0 %232 }
  0x86   :  { %v248_v45 = vpop.permute.xlu1 %247 }
  0x88   :  { %v238_v39 = vpop.permute.xlu0 %237 }
  0xf0   :  { %v6667_v27 = vpop.f32.mrb[0].mxu1 }
  0xf1   :  { %v157_v28 = vpop.f32.mrb[1].mxu1 }
  0xf2   :  { %v7280_v29 = vpack.c.bf16 %v6667_v27, %v157_v28  ;;  %v377_v27 = vld [vmem:[%s9772_s4 + $0x8] sm:$0xff]  ;;  %v378_v28 = vld [vmem:[%s9772_s4 + $0x10] sm:$0xff] }
  0xf4   :  { %v6670_v30 = vpop.f32.mrb[2].mxu1  ;;  %7281 = vmatprep.subr.bf16.mxu1 %v7280_v29 }
  0xf5   :  { %v167_v31 = vpop.f32.mrb[3].mxu1  ;;  %7283 = vmatpush3.bf16.msra.mxu1 %v7280_v29 }
  0xf6   :  { %v7284_v32 = vpack.c.bf16 %v6670_v30, %v167_v31  ;;  %v379_v30 = vld [vmem:[%s9772_s4 + $0x18] sm:$0xff]  ;;  %v380_v31 = vld [vmem:[%s9772_s4 + $0x20] sm:$0xff] }
  0xf8   :  { %7285 = vmatprep.subr.bf16.mxu1 %v7284_v32 }
  0xf9   :  { %7287 = vmatpush3.bf16.msra.mxu1 %v7284_v32  ;;  %v381_v32 = vld [vmem:[%s9772_s4 + $0x28] sm:$0xff] }
  0xfc   :  { %6680 = vmatmul.mubr.msk.f32.vlgmr.msra.gmra.mrb[4].mxu1 %vm9777_vm1, %v223_v33  ;;  %v382_v33 = vld [vmem:[%s9772_s4 + $0x30] sm:$0xff] }
  0xfd   :  { %6682 = vmatprep.mubr.msk.f32.mxu1 %vm9777_vm1, %v224_v34  ;;  %v383_v34 = vld [vmem:[%s9772_s4 + $0x38] sm:$0xff] }
 0x100   :  { %6683 = vmatmul.mubr.msk.f32.gmra.mrb[6].mxu1 %vm9777_vm1, %v225_v35  ;;  %v5689_v35 = vld [vmem:[%s9772_s4 + $0x80] sm:$0xff] }
 0x101   :  { %6693 = vmatprep.mubr.msk.f32.mxu1 %vm9777_vm1, %v5661_v36  ;;  %v5690_v36 = vld [vmem:[%s9772_s4 + $0x88] sm:$0xff] }
 0x1cf   :  { %v6681_v40 = vpop.f32.mrb[4].mxu1 }
 0x1d0   :  { %v335_v41 = vadd.f32 %v6681_v40, %v238_v39  ;;  %v329_v42 = vpop.f32.mrb[5].mxu1  ;;  %v5693_v39 = vld [vmem:[%s9772_s4 + $0xa0] sm:$0xff]  ;;  %v5694_v40 = vld [vmem:[%s9772_s4 + $0xa8] sm:$0xff] }
 0x1d1   :  { %v330_v43 = vadd.f32 %v329_v42, %v233_v37  ;;  %v5691_v37 = vld [vmem:[%s9772_s4 + $0x90] sm:$0xff]  ;;  %v5696_v42 = vld [vmem:[%s9772_s4 + $0xb8] sm:$0xff] }
 0x1d2   :  { %v8187_v44 = vmax.f32 %v335_v41, 0.0  ;;  %v5695_v41 = vld [vmem:[%s9772_s4 + $0xb0] sm:$0xff] }
 0x1d3   :  { %v8189_v46 = vmax.f32 %v330_v43, 0.0  ;;  %v6684_v47 = vpop.f32.mrb[6].mxu1  ;;  %v5721_v43 = vld [vmem:[%s9772_s4 + $0x100] sm:$0xff] }
 0x1d4   :  { %v345_v48 = vadd.f32 %v6684_v47, %v248_v45  ;;  %v339_v49 = vpop.f32.mrb[7].mxu1  ;;  %6753 = vmatprep.mubr.msk.f32.mxu0 %vm9777_vm1, %v5721_v43 }
 0x1d5   :  { %v340_v50 = vadd.f32 %v339_v49, %v243_v38  ;;  %v7756_v51 = vpack.i.bf16 %v8187_v44, %v8189_v46  ;;  %v7288_v52 = vpack.c.bf16 %v8187_v44, %v8189_v46  ;;  %v5692_v38 = vld [vmem:[%s9772_s4 + $0x98] sm:$0xff] }
 0x1d6   :  { %v8195_v53 = vmax.f32 %v345_v48, 0.0 }
 0x1d7   :  { %v8197_v54 = vmax.f32 %v340_v50, 0.0  ;;  %7757 = vrot.lane.b32.xlu0 %v7756_v51, %s8082_s0  ;;  %7289 = vmatprep.subr.bf16.mxu1 %v7288_v52 }
 0x1d8   :  { %7291 = vmatpush3.bf16.msra.mxu1 %v7288_v52 }
 0x1d9   :  { %v7761_v55 = vpack.i.bf16 %v8195_v53, %v8197_v54  ;;  %v7292_v56 = vpack.c.bf16 %v8195_v53, %v8197_v54 }
 0x1db   :  { %7762 = vrot.lane.b32.xlu1 %v7761_v55, %s8082_s0  ;;  %7767 = vrot.lane.b32.xlu0 %v7756_v51, %s8083_s9 }
 0x1dc   :  { %7293 = vmatprep.subr.bf16.mxu1 %v7292_v56 }
 0x1dd   :  { %7295 = vmatpush3.bf16.msra.mxu1 %v7292_v56 }
 0x1df   :  { %7772 = vrot.lane.b32.xlu1 %v7761_v55, %s8083_s9  ;;  %807 = vperm.xlu0 %7754, %v797_v57  }
 0x1e0   :  { %6694 = vmatmul.mubr.msk.f32.vlgmr.msra.gmra.mrb[8].mxu1 %vm9777_vm1, %v5662_v58 }
 0x1e1   :  { %6696 = vmatprep.mubr.msk.f32.mxu1 %vm9777_vm1, %v5663_v59 }
 0x1e3   :  { %812 = vperm.xlu1 %7755, %v798_v60   ;;  %817 = vperm.xlu0 %7754, %v799_v61  }
 0x1e4   :  { %6697 = vmatmul.mubr.msk.f32.gmra.mrb[10].mxu1 %vm9777_vm1, %v5664_v62 }
 0x1e5   :  { %6699 = vmatprep.mubr.msk.f32.mxu1 %vm9777_vm1, %v5665_v63 }
 0x1e7   :  { %822 = vperm.xlu1 %7755, %v800_v1   ;;  %827 = vperm.xlu0 %7754, %v801_v2  }
 0x1e8   :  { %6700 = vmatmul.mubr.msk.f32.gmra.mrb[12].mxu1 %vm9777_vm1, %v5666_v3 }
 0x1e9   :  { %6702 = vmatprep.mubr.msk.f32.mxu1 %vm9777_vm1, %v5667_v4 }
 0x1eb   :  { %832 = vperm.xlu1 %7755, %v802_v5   ;;  %837 = vperm.xlu0 %7754, %v803_v6  }
 0x1ec   :  { %6703 = vmatmul.mubr.msk.f32.gmra.mrb[14].mxu1 %vm9777_vm1, %v5668_v7 }
 0x1ed   :  { %6713 = vmatprep.mubr.msk.f32.mxu1 %vm9777_vm1, %v376_v8 }
 0x1ef   :  { %842 = vperm.xlu1 %7755, %v804_v9  }
 0x249   :  { %v7758_v11 = vpop.permute.xlu0 %7757 }
 0x24a   :  { %v7760_v12 = vunpack.i.h.bf16 %v7758_v11  ;;  %v7759_v13 = vunpack.i.l.bf16 %v7758_v11 }
 0x24c   :  { %v7296_v14 = vpack.c.bf16 %v7760_v12, %v7759_v13 }
 0x24d   :  { %v7763_v15 = vpop.permute.xlu1 %7762  ;;  %v7768_v16 = vpop.permute.xlu0 %7767 }
 0x24e   :  { %v7765_v17 = vunpack.i.h.bf16 %v7763_v15  ;;  %v7764_v18 = vunpack.i.l.bf16 %v7763_v15  ;;  %v7770_v19 = vunpack.i.h.bf16 %v7768_v16  ;;  %v7769_v20 = vunpack.i.l.bf16 %v7768_v16  ;;  %7298 = vmatprep.subr.msk.bf16.mxu1 %vm8273_vm8, %v7296_v14 }
 0x24f   :  { %7301 = vmatpush3.bf16.msk.msra.mxu1 %vm8273_vm8, %v7296_v14 }
 0x250   :  { %v7302_v21 = vpack.c.bf16 %v7765_v17, %v7764_v18  ;;  %v7308_v24 = vpack.c.bf16 %v7770_v19, %v7769_v20 }
 0x251   :  { %v7773_v22 = vpop.permute.xlu1 %7772 }
 0x252   :  { %v7775_v25 = vunpack.i.h.bf16 %v7773_v22  ;;  %v7774_v26 = vunpack.i.l.bf16 %v7773_v22  ;;  %7304 = vmatprep.subr.msk.bf16.mxu1 %vm8273_vm8, %v7302_v21 }
 0x253   :  { %7307 = vmatpush3.bf16.msk.msra.mxu1 %vm8273_vm8, %v7302_v21 }
 0x254   :  { %7310 = vmatprep.subr.msk.bf16.mxu1 %vm8284_vm12, %v7308_v24  ;;  %v7314_v29 = vpack.c.bf16 %v7775_v25, %v7774_v26 }
 0x256   :  { %6714 = vmatmul.mubr.msk.f32.vlgmr.msra.gmra.mrb[8].mxu1 %vm9777_vm1, %v377_v27 }
 0x257   :  { %7313 = vmatpush3.bf16.msk.msra.mxu1 %vm8284_vm12, %v7308_v24  ;;  %6716 = vmatprep.mubr.msk.f32.mxu1 %vm9777_vm1, %v378_v28 }
 0x258   :  { %7316 = vmatprep.subr.msk.bf16.mxu1 %vm8284_vm12, %v7314_v29 }
 0x25a   :  { %6717 = vmatmul.mubr.msk.f32.gmra.mrb[10].mxu1 %vm9777_vm1, %v379_v30 }
 0x25b   :  { %7319 = vmatpush3.bf16.msk.msra.mxu1 %vm8284_vm12, %v7314_v29  ;;  %6719 = vmatprep.mubr.msk.f32.mxu1 %vm9777_vm1, %v380_v31 }
 0x25e   :  { %6720 = vmatmul.mubr.msk.f32.gmra.mrb[12].mxu1 %vm9777_vm1, %v381_v32  ;;  %v808_v47 = vpop.permute.xlu0 %807 }
 0x25f   :  { %6722 = vmatprep.mubr.msk.f32.mxu1 %vm9777_vm1, %v382_v33 }
 0x262   :  { %6723 = vmatmul.mubr.msk.f32.gmra.mrb[14].mxu1 %vm9777_vm1, %v383_v34  ;;  %v813_v45 = vpop.permute.xlu1 %812  ;;  %v818_v58 = vpop.permute.xlu0 %817 }
 0x263   :  { %6733 = vmatprep.mubr.msk.f32.mxu1 %vm9777_vm1, %v5689_v35 }
 0x266   :  { %6734 = vmatmul.mubr.msk.f32.vlgmr.msra.gmra.mrb[8].mxu1 %vm9777_vm1, %v5690_v36  ;;  %v823_v55 = vpop.permute.xlu1 %822  ;;  %v828_v14 = vpop.permute.xlu0 %827 }
 0x267   :  { %6736 = vmatprep.mubr.msk.f32.mxu1 %vm9777_vm1, %v5691_v37 }
 0x26a   :  { %6737 = vmatmul.mubr.msk.f32.gmra.mrb[10].mxu1 %vm9777_vm1, %v5692_v38  ;;  %v833_v12 = vpop.permute.xlu1 %832  ;;  %v838_v19 = vpop.permute.xlu0 %837 }
 0x26b   :  { %6739 = vmatprep.mubr.msk.f32.mxu1 %vm9777_vm1, %v5693_v39 }
 0x26e   :  { %6740 = vmatmul.mubr.msk.f32.gmra.mrb[12].mxu1 %vm9777_vm1, %v5694_v40  ;;  %v843_v18 = vpop.permute.xlu1 %842 }
 0x26f   :  { %6742 = vmatprep.mubr.msk.f32.mxu1 %vm9777_vm1, %v5695_v41 }
 0x272   :  { %6743 = vmatmul.mubr.msk.f32.gmra.mrb[14].mxu1 %vm9777_vm1, %v5696_v42 }
 0x339   :  { %v6735_v48 = vpop.f32.mrb[8].mxu1 }
 0x33a   :  { %v846_v49 = vadd.f32 %v6735_v48, %v813_v45  ;;  %v750_v50 = vpop.f32.mrb[9].mxu1 }
 0x33b   :  { %v845_v51 = vadd.f32 %v808_v47, %v750_v50  ;;  %v5722_v50 = vld [vmem:[%s9772_s4 + $0x108] sm:$0xff] }
 0x33c   :  { %v5710_v52 = vmul.f32 -1.442695, %v846_v49  ;;  %v5769_v49 = vld [vmem:[%s9773_s5 + $0x40] sm:$0xff] }
 0x33d   :  { %v5709_v56 = vmul.f32 -1.442695, %v845_v51  ;;  %v6738_v57 = vpop.f32.mrb[10].mxu1  ;;  %v5723_v51 = vld [vmem:[%s9772_s4 + $0x110] sm:$0xff] }
 0x33e   :  { %7936 = vpow2.f32 %v5710_v52  ;;  %v848_v59 = vadd.f32 %v6738_v57, %v823_v55  ;;  %v760_v60 = vpop.f32.mrb[11].mxu1  ;;  %v5771_v52 = vld [vmem:[%s9773_s5 + $0x50] sm:$0xff]  ;;  %v5770_v55 = vld [vmem:[%s9773_s5 + $0x48] sm:$0xff]  ;;  %v5725_v57 = vld [vmem:[%s9772_s4 + $0x120] sm:$0xff] }
 0x33f   :  { %7938 = vpow2.f32 %v5709_v56  ;;  %v847_v61 = vadd.f32 %v818_v58, %v760_v60  ;;  %v5724_v56 = vld [vmem:[%s9772_s4 + $0x118] sm:$0xff]  ;;  %v5773_v58 = vld [vmem:[%s9773_s5 + $0x60] sm:$0xff]  ;;  %v5726_v60 = vld [vmem:[%s9772_s4 + $0x128] sm:$0xff] }
 0x340   :  { %v5712_v62 = vmul.f32 -1.442695, %v848_v59  ;;  %v5772_v59 = vld [vmem:[%s9773_s5 + $0x58] sm:$0xff] }
 0x341   :  { %v5711_v63 = vmul.f32 -1.442695, %v847_v61  ;;  %v6741_v1 = vpop.f32.mrb[12].mxu1  ;;  %v5727_v61 = vld [vmem:[%s9772_s4 + $0x130] sm:$0xff] }
 0x342   :  { %7940 = vpow2.f32 %v5712_v62  ;;  %v770_v2 = vpop.f32.mrb[13].mxu1  ;;  %v850_v16 = vadd.f32 %v6741_v1, %v833_v12  ;;  %v5775_v62 = vld [vmem:[%s9773_s5 + $0x70] sm:$0xff]  ;;  %v5728_v1 = vld [vmem:[%s9772_s4 + $0x138] sm:$0xff] }
 0x343   :  { %7942 = vpow2.f32 %v5711_v63  ;;  %v849_v17 = vadd.f32 %v828_v14, %v770_v2  ;;  %v5774_v63 = vld [vmem:[%s9773_s5 + $0x68] sm:$0xff]  ;;  %v5713_v2 = vld [vmem:[%s9772_s4 + $0xc0] sm:$0xff] }
 0x344   :  { %v878_v20 = vmax.f32 %v850_v16, 0.0 }
 0x345   :  { %v6744_v3 = vpop.f32.mrb[14].mxu1  ;;  %v877_v24 = vmax.f32 %v849_v17, 0.0 }
 0x346   :  { %v780_v4 = vpop.f32.mrb[15].mxu1  ;;  %v852_v21 = vadd.f32 %v6744_v3, %v843_v18  ;;  %v5776_v3 = vld [vmem:[%s9773_s5 + $0x78] sm:$0xff]  ;;  %v6033_v18 = vld [vmem:[%s9772_s4 + $0x440] sm:$0xff] }
 0x347   :  { %v851_v25 = vadd.f32 %v838_v19, %v780_v4 }
 0x348   :  { %v7937_v5 = vpop.eup %7936  ;;  %v880_v32 = vmax.f32 %v852_v21, 0.0 }
 0x349   :  { %v7939_v6 = vpop.eup %7938  ;;  %v866_v7 = vadd.f32 1.0, %v7937_v5  ;;  %v879_v35 = vmax.f32 %v851_v25, 0.0 }
 0x34a   :  { %v865_v8 = vadd.f32 1.0, %v7939_v6 }
 0x34b   :  { %7944 = vrcp.f32 %v866_v7  ;;  %v6000_v7 = vld [vmem:[%s9772_s4 + $0x3d8] sm:$0xff] }
 0x34c   :  { %v7941_v9 = vpop.eup %7940  ;;  %7946 = vrcp.f32 %v865_v8 }
 0x34d   :  { %v7943_v11 = vpop.eup %7942  ;;  %v868_v13 = vadd.f32 1.0, %v7941_v9 }
 0x34e   :  { %v867_v15 = vadd.f32 1.0, %v7943_v11 }
 0x34f   :  { %7948 = vrcp.f32 %v868_v13 }
 0x350   :  { %7950 = vrcp.f32 %v867_v15 }
 0x355   :  { %v7945_v22 = vpop.eup %7944 }
 0x356   :  { %v7947_v26 = vpop.eup %7946  ;;  %v882_v27 = vmul.f32 %v7945_v22, %v878_v20  ;;  %v886_v28 = vsub.f32 1.0, %v7945_v22  ;;  %v5714_v22 = vld [vmem:[%s9772_s4 + $0xc8] sm:$0xff] }
 0x357   :  { %v881_v29 = vmul.f32 %v7947_v26, %v877_v24  ;;  %v885_v30 = vsub.f32 1.0, %v7947_v26  ;;  %v5715_v24 = vld [vmem:[%s9772_s4 + $0xd0] sm:$0xff]  ;;  %v5716_v26 = vld [vmem:[%s9772_s4 + $0xd8] sm:$0xff] }
 0x358   :  { %v890_v31 = vmul.f32 %v886_v28, %v8187_v44  ;;  %v5718_v28 = vld [vmem:[%s9772_s4 + $0xe8] sm:$0xff] }
 0x359   :  { %v7949_v33 = vpop.eup %7948  ;;  %v889_v34 = vmul.f32 %v885_v30, %v8189_v46  ;;  %v5720_v30 = vld [vmem:[%s9772_s4 + $0xf8] sm:$0xff] }
 0x35a   :  { %v7951_v36 = vpop.eup %7950  ;;  %v8366_v37 = vadd.f32 %v890_v31, %v882_v27  ;;  %v884_v38 = vmul.f32 %v7949_v33, %v880_v32  ;;  %v888_v39 = vsub.f32 1.0, %v7949_v33  ;;  %v5717_v27 = vld [vmem:[%s9772_s4 + $0xe0] sm:$0xff]  ;;  %v5750_v32 = vld [vmem:[%s9772_s4 + $0x148] sm:$0xff]  ;;  %v5751_v33 = vld [vmem:[%s9772_s4 + $0x150] sm:$0xff] }
 0x35b   :  { %v8368_v40 = vadd.f32 %v889_v34, %v881_v29  ;;  %v883_v41 = vmul.f32 %v7951_v36, %v879_v35  ;;  %v887_v42 = vsub.f32 1.0, %v7951_v36  ;;  %v5719_v29 = vld [vmem:[%s9772_s4 + $0xf0] sm:$0xff]  ;;  %v5749_v31 = vld [vmem:[%s9772_s4 + $0x140] sm:$0xff]  ;;  %v5752_v34 = vld [vmem:[%s9772_s4 + $0x158] sm:$0xff] }
 0x35c   :  { %v892_v43 = vmul.f32 %v888_v39, %v8195_v53  ;;  %v5753_v35 = vld [vmem:[%s9772_s4 + $0x160] sm:$0xff]  ;;  %v5754_v36 = vld [vmem:[%s9772_s4 + $0x168] sm:$0xff]  ;;  %v5756_v39 = vld [vmem:[%s9772_s4 + $0x178] sm:$0xff] }
 0x35d   :  { %v891_v45 = vmul.f32 %v887_v42, %v8197_v54  ;;  %v7776_v44 = vpack.i.bf16 %v8366_v37, %v8368_v40  ;;  %v7320_v46 = vpack.c.bf16 %v8366_v37, %v8368_v40 }
 0x35e   :  { %v8376_v47 = vadd.f32 %v892_v43, %v884_v38  ;;  %v5755_v38 = vld [vmem:[%s9772_s4 + $0x170] sm:$0xff] }
 0x35f   :  { %v8378_v48 = vadd.f32 %v891_v45, %v883_v41  ;;  %7777 = vrot.lane.b32.xlu0 %v7776_v44, %s8084_s29  ;;  %7321 = vmatprep.subr.bf16.mxu0 %v7320_v46  ;;  %v5789_v41 = vld [vmem:[%s9772_s4 + $0x1c0] sm:$0xff] }
 0x360   :  { %7323 = vmatpush3.bf16.msra.mxu0 %v7320_v46  ;;  %6813 = vmatprep.mubr.msk.f32.mxu1 %vm9777_vm1, %v5789_v41 }
 0x361   :  { %v7781_v53 = vpack.i.bf16 %v8376_v47, %v8378_v48  ;;  %v7324_v54 = vpack.c.bf16 %v8376_v47, %v8378_v48 }
 0x363   :  { %7787 = vrot.lane.b32.xlu0 %v7776_v44, %s8085_s30  ;;  %7782 = vrot.lane.b32.xlu1 %v7781_v53, %s8084_s29 }
 0x364   :  { %7325 = vmatprep.subr.bf16.mxu0 %v7324_v54 }
 0x365   :  { %7327 = vmatpush3.bf16.msra.mxu0 %v7324_v54 }
 0x367   :  { %1354 = vperm.xlu0 %7754, %v5769_v49   ;;  %7792 = vrot.lane.b32.xlu1 %v7781_v53, %s8085_s30 }
 0x368   :  { %6754 = vmatmul.mubr.msk.f32.vlgmr.msra.gmra.mrb[0].mxu0 %vm9777_vm1, %v5722_v50 }
 0x369   :  { %6756 = vmatprep.mubr.msk.f32.mxu0 %vm9777_vm1, %v5723_v51 }
 0x36b   :  { %1364 = vperm.xlu0 %7754, %v5771_v52   ;;  %1359 = vperm.xlu1 %7755, %v5770_v55  }
 0x36c   :  { %6757 = vmatmul.mubr.msk.f32.gmra.mrb[2].mxu0 %vm9777_vm1, %v5724_v56 }
 0x36d   :  { %6759 = vmatprep.mubr.msk.f32.mxu0 %vm9777_vm1, %v5725_v57 }
 0x36f   :  { %1374 = vperm.xlu0 %7754, %v5773_v58   ;;  %1369 = vperm.xlu1 %7755, %v5772_v59  }
 0x370   :  { %6760 = vmatmul.mubr.msk.f32.gmra.mrb[4].mxu0 %vm9777_vm1, %v5726_v60 }
 0x371   :  { %6762 = vmatprep.mubr.msk.f32.mxu0 %vm9777_vm1, %v5727_v61 }
 0x373   :  { %1384 = vperm.xlu0 %7754, %v5775_v62   ;;  %1379 = vperm.xlu1 %7755, %v5774_v63  }
 0x374   :  { %6763 = vmatmul.mubr.msk.f32.gmra.mrb[6].mxu0 %vm9777_vm1, %v5728_v1 }
 0x375   :  { %6773 = vmatprep.mubr.msk.f32.mxu0 %vm9777_vm1, %v5713_v2 }
 0x377   :  { %1389 = vperm.xlu1 %7755, %v5776_v3  }
 0x3d1   :  { %v7778_v4 = vpop.permute.xlu0 %7777 }
 0x3d2   :  { %v7780_v5 = vunpack.i.h.bf16 %v7778_v4  ;;  %v7779_v6 = vunpack.i.l.bf16 %v7778_v4 }
 0x3d4   :  { %v7328_v8 = vpack.c.bf16 %v7780_v5, %v7779_v6 }
 0x3d5   :  { %v7788_v9 = vpop.permute.xlu0 %7787  ;;  %v7783_v11 = vpop.permute.xlu1 %7782 }
 0x3d6   :  { %v7790_v12 = vunpack.i.h.bf16 %v7788_v9  ;;  %v7789_v13 = vunpack.i.l.bf16 %v7788_v9  ;;  %v7785_v14 = vunpack.i.h.bf16 %v7783_v11  ;;  %v7784_v15 = vunpack.i.l.bf16 %v7783_v11  ;;  %7330 = vmatprep.subr.msk.bf16.mxu0 %vm8449_vm4, %v7328_v8 }
 0x3d7   :  { %7333 = vmatpush3.bf16.msk.msra.mxu0 %vm8449_vm4, %v7328_v8 }
 0x3d8   :  { %v7334_v16 = vpack.c.bf16 %v7785_v14, %v7784_v15  ;;  %v7340_v19 = vpack.c.bf16 %v7790_v12, %v7789_v13 }
 0x3d9   :  { %v7793_v17 = vpop.permute.xlu1 %7792 }
 0x3da   :  { %v7795_v20 = vunpack.i.h.bf16 %v7793_v17  ;;  %v7794_v21 = vunpack.i.l.bf16 %v7793_v17  ;;  %7336 = vmatprep.subr.msk.bf16.mxu0 %vm8449_vm4, %v7334_v16 }
 0x3db   :  { %7339 = vmatpush3.bf16.msk.msra.mxu0 %vm8449_vm4, %v7334_v16 }
 0x3dc   :  { %7342 = vmatprep.subr.msk.bf16.mxu0 %vm8460_vm10, %v7340_v19  ;;  %v7346_v25 = vpack.c.bf16 %v7795_v20, %v7794_v21 }
 0x3de   :  { %6774 = vmatmul.mubr.msk.f32.vlgmr.msra.gmra.mrb[0].mxu0 %vm9777_vm1, %v5714_v22 }
 0x3df   :  { %7345 = vmatpush3.bf16.msk.msra.mxu0 %vm8460_vm10, %v7340_v19  ;;  %6776 = vmatprep.mubr.msk.f32.mxu0 %vm9777_vm1, %v5715_v24 }
 0x3e0   :  { %7348 = vmatprep.subr.msk.bf16.mxu0 %vm8460_vm10, %v7346_v25 }
 0x3e2   :  { %6777 = vmatmul.mubr.msk.f32.gmra.mrb[2].mxu0 %vm9777_vm1, %v5716_v26 }
 0x3e3   :  { %7351 = vmatpush3.bf16.msk.msra.mxu0 %vm8460_vm10, %v7346_v25  ;;  %6779 = vmatprep.mubr.msk.f32.mxu0 %vm9777_vm1, %v5717_v27 }
 0x3e6   :  { %6780 = vmatmul.mubr.msk.f32.gmra.mrb[4].mxu0 %vm9777_vm1, %v5718_v28  ;;  %v1355_v43 = vpop.permute.xlu0 %1354 }
 0x3e7   :  { %6782 = vmatprep.mubr.msk.f32.mxu0 %vm9777_vm1, %v5719_v29 }
 0x3ea   :  { %6783 = vmatmul.mubr.msk.f32.gmra.mrb[6].mxu0 %vm9777_vm1, %v5720_v30  ;;  %v1360_v42 = vpop.permute.xlu1 %1359  ;;  %v1365_v52 = vpop.permute.xlu0 %1364 }
 0x3eb   :  { %6793 = vmatprep.mubr.msk.f32.mxu0 %vm9777_vm1, %v5749_v31 }
 0x3ee   :  { %6794 = vmatmul.mubr.msk.f32.vlgmr.msra.gmra.mrb[0].mxu0 %vm9777_vm1, %v5750_v32  ;;  %v1370_v49 = vpop.permute.xlu1 %1369  ;;  %v1375_v11 = vpop.permute.xlu0 %1374 }
 0x3ef   :  { %6796 = vmatprep.mubr.msk.f32.mxu0 %vm9777_vm1, %v5751_v33 }
 0x3f2   :  { %6797 = vmatmul.mubr.msk.f32.gmra.mrb[2].mxu0 %vm9777_vm1, %v5752_v34  ;;  %v1380_v8 = vpop.permute.xlu1 %1379  ;;  %v1385_v16 = vpop.permute.xlu0 %1384 }
 0x3f3   :  { %6799 = vmatprep.mubr.msk.f32.mxu0 %vm9777_vm1, %v5753_v35 }
 0x3f6   :  { %6800 = vmatmul.mubr.msk.f32.gmra.mrb[4].mxu0 %vm9777_vm1, %v5754_v36  ;;  %v1390_v15 = vpop.permute.xlu1 %1389 }
 0x3f7   :  { %6802 = vmatprep.mubr.msk.f32.mxu0 %vm9777_vm1, %v5755_v38 }
 0x3fa   :  { %6803 = vmatmul.mubr.msk.f32.gmra.mrb[6].mxu0 %vm9777_vm1, %v5756_v39 }
 0x4c1   :  { %v6795_v45 = vpop.f32.mrb[0].mxu0 }
 0x4c2   :  { %v1393_v44 = vadd.f32 %v6795_v45, %v1360_v42  ;;  %v1296_v46 = vpop.f32.mrb[1].mxu0 }
 0x4c3   :  { %v1392_v53 = vadd.f32 %v1355_v43, %v1296_v46 }
 0x4c4   :  { %v5778_v54 = vmul.f32 -1.442695, %v1393_v44 }
 0x4c5   :  { %v5777_v50 = vmul.f32 -1.442695, %v1392_v53  ;;  %v6798_v51 = vpop.f32.mrb[2].mxu0  ;;  %v5837_v53 = vld [vmem:[%s9773_s5 + $0x80] sm:$0xff] }
 0x4c6   :  { %7952 = vpow2.f32 %v5778_v54  ;;  %v1395_v55 = vadd.f32 %v6798_v51, %v1370_v49  ;;  %v1306_v56 = vpop.f32.mrb[3].mxu0  ;;  %v5790_v54 = vld [vmem:[%s9772_s4 + $0x1c8] sm:$0xff]  ;;  %v5791_v49 = vld [vmem:[%s9772_s4 + $0x1d0] sm:$0xff] }
 0x4c7   :  { %7954 = vpow2.f32 %v5777_v50  ;;  %v1394_v57 = vadd.f32 %v1365_v52, %v1306_v56  ;;  %v5839_v50 = vld [vmem:[%s9773_s5 + $0x90] sm:$0xff]  ;;  %v5838_v51 = vld [vmem:[%s9773_s5 + $0x88] sm:$0xff]  ;;  %v5792_v52 = vld [vmem:[%s9772_s4 + $0x1d8] sm:$0xff] }
 0x4c8   :  { %v5780_v58 = vmul.f32 -1.442695, %v1395_v55  ;;  %v5793_v55 = vld [vmem:[%s9772_s4 + $0x1e0] sm:$0xff] }
 0x4c9   :  { %v5779_v59 = vmul.f32 -1.442695, %v1394_v57  ;;  %v6801_v60 = vpop.f32.mrb[4].mxu0  ;;  %v5841_v56 = vld [vmem:[%s9773_s5 + $0xa0] sm:$0xff]  ;;  %v5840_v57 = vld [vmem:[%s9773_s5 + $0x98] sm:$0xff] }
 0x4ca   :  { %7956 = vpow2.f32 %v5780_v58  ;;  %v1316_v61 = vpop.f32.mrb[5].mxu0  ;;  %v1397_v13 = vadd.f32 %v6801_v60, %v1380_v8  ;;  %v5794_v58 = vld [vmem:[%s9772_s4 + $0x1e8] sm:$0xff]  ;;  %v5843_v60 = vld [vmem:[%s9773_s5 + $0xb0] sm:$0xff] }
 0x4cb   :  { %7958 = vpow2.f32 %v5779_v59  ;;  %v1396_v14 = vadd.f32 %v1375_v11, %v1316_v61  ;;  %v5795_v59 = vld [vmem:[%s9772_s4 + $0x1f0] sm:$0xff]  ;;  %v5842_v61 = vld [vmem:[%s9773_s5 + $0xa8] sm:$0xff] }
 0x4cc   :  { %v1425_v17 = vmax.f32 %v1397_v13, 0.0 }
 0x4cd   :  { %v6804_v62 = vpop.f32.mrb[6].mxu0  ;;  %v1424_v21 = vmax.f32 %v1396_v14, 0.0 }
 0x4ce   :  { %v1326_v63 = vpop.f32.mrb[7].mxu0  ;;  %v1399_v19 = vadd.f32 %v6804_v62, %v1390_v15  ;;  %v5796_v62 = vld [vmem:[%s9772_s4 + $0x1f8] sm:$0xff] }
 0x4cf   :  { %v1398_v22 = vadd.f32 %v1385_v16, %v1326_v63  ;;  %v5781_v63 = vld [vmem:[%s9772_s4 + $0x180] sm:$0xff] }
 0x4d0   :  { %v7953_v1 = vpop.eup %7952  ;;  %v1427_v30 = vmax.f32 %v1399_v19, 0.0 }
 0x4d1   :  { %v7955_v2 = vpop.eup %7954  ;;  %v1413_v3 = vadd.f32 1.0, %v7953_v1  ;;  %v1426_v33 = vmax.f32 %v1398_v22, 0.0  ;;  %v5844_v1 = vld [vmem:[%s9773_s5 + $0xb8] sm:$0xff]  ;;  %v5782_v22 = vld [vmem:[%s9772_s4 + $0x188] sm:$0xff] }
 0x4d2   :  { %v1412_v4 = vadd.f32 1.0, %v7955_v2 }
 0x4d3   :  { %7960 = vrcp.f32 %v1413_v3 }
 0x4d4   :  { %v7957_v5 = vpop.eup %7956  ;;  %7962 = vrcp.f32 %v1412_v4 }
 0x4d5   :  { %v7959_v6 = vpop.eup %7958  ;;  %v1415_v9 = vadd.f32 1.0, %v7957_v5  ;;  %v6068_v5 = vld [vmem:[%s9772_s4 + $0x498] sm:$0xff] }
 0x4d6   :  { %v1414_v12 = vadd.f32 1.0, %v7959_v6 }
 0x4d7   :  { %7964 = vrcp.f32 %v1415_v9 }
 0x4d8   :  { %7966 = vrcp.f32 %v1414_v12 }
 0x4dd   :  { %v7961_v20 = vpop.eup %7960 }
 0x4de   :  { %v7963_v24 = vpop.eup %7962  ;;  %v1429_v25 = vmul.f32 %v7961_v20, %v1425_v17  ;;  %v1433_v26 = vsub.f32 1.0, %v7961_v20  ;;  %v6101_v17 = vld [vmem:[%s9772_s4 + $0x500] sm:$0xff] }
 0x4df   :  { %v1428_v27 = vmul.f32 %v7963_v24, %v1424_v21  ;;  %v1432_v28 = vsub.f32 1.0, %v7963_v24  ;;  %v5783_v24 = vld [vmem:[%s9772_s4 + $0x190] sm:$0xff] }
 0x4e0   :  { %v1437_v29 = vmul.f32 %v1433_v26, %v8366_v37  ;;  %v5784_v26 = vld [vmem:[%s9772_s4 + $0x198] sm:$0xff] }
 0x4e1   :  { %v7965_v31 = vpop.eup %7964  ;;  %v1436_v32 = vmul.f32 %v1432_v28, %v8368_v40  ;;  %v5786_v28 = vld [vmem:[%s9772_s4 + $0x1a8] sm:$0xff] }
 0x4e2   :  { %v7967_v34 = vpop.eup %7966  ;;  %v8542_v35 = vadd.f32 %v1437_v29, %v1429_v25  ;;  %v1431_v36 = vmul.f32 %v7965_v31, %v1427_v30  ;;  %v1435_v38 = vsub.f32 1.0, %v7965_v31  ;;  %v5787_v29 = vld [vmem:[%s9772_s4 + $0x1b0] sm:$0xff]  ;;  %v5788_v30 = vld [vmem:[%s9772_s4 + $0x1b8] sm:$0xff]  ;;  %v5817_v31 = vld [vmem:[%s9772_s4 + $0x200] sm:$0xff] }
 0x4e3   :  { %v8544_v39 = vadd.f32 %v1436_v32, %v1428_v27  ;;  %v1430_v41 = vmul.f32 %v7967_v34, %v1426_v33  ;;  %v1434_v42 = vsub.f32 1.0, %v7967_v34  ;;  %v5785_v27 = vld [vmem:[%s9772_s4 + $0x1a0] sm:$0xff]  ;;  %v5818_v32 = vld [vmem:[%s9772_s4 + $0x208] sm:$0xff]  ;;  %v5819_v33 = vld [vmem:[%s9772_s4 + $0x210] sm:$0xff] }
 0x4e4   :  { %v1439_v43 = vmul.f32 %v1435_v38, %v8376_v47  ;;  %v5820_v34 = vld [vmem:[%s9772_s4 + $0x218] sm:$0xff]  ;;  %v5822_v38 = vld [vmem:[%s9772_s4 + $0x228] sm:$0xff] }
 0x4e5   :  { %v1438_v45 = vmul.f32 %v1434_v42, %v8378_v48  ;;  %v7796_v37 = vpack.i.bf16 %v8542_v35, %v8544_v39  ;;  %v7352_v40 = vpack.c.bf16 %v8542_v35, %v8544_v39  ;;  %v5824_v42 = vld [vmem:[%s9772_s4 + $0x238] sm:$0xff] }
 0x4e6   :  { %v8552_v44 = vadd.f32 %v1439_v43, %v1431_v36  ;;  %v5821_v36 = vld [vmem:[%s9772_s4 + $0x220] sm:$0xff] }
 0x4e7   :  { %v8554_v46 = vadd.f32 %v1438_v45, %v1430_v41  ;;  %7797 = vrot.lane.b32.xlu0 %v7796_v37, %s8086_s14  ;;  %7353 = vmatprep.subr.bf16.mxu1 %v7352_v40  ;;  %v5823_v41 = vld [vmem:[%s9772_s4 + $0x230] sm:$0xff]  ;;  %v5857_v43 = vld [vmem:[%s9772_s4 + $0x280] sm:$0xff] }
 0x4e8   :  { %7355 = vmatpush3.bf16.msra.mxu1 %v7352_v40  ;;  %6873 = vmatprep.mubr.msk.f32.mxu0 %vm9777_vm1, %v5857_v43 }
 0x4e9   :  { %v7801_v47 = vpack.i.bf16 %v8552_v44, %v8554_v46  ;;  %v7356_v48 = vpack.c.bf16 %v8552_v44, %v8554_v46 }
 0x4eb   :  { %7807 = vrot.lane.b32.xlu0 %v7796_v37, %s8087_s15  ;;  %7802 = vrot.lane.b32.xlu1 %v7801_v47, %s8086_s14 }
 0x4ec   :  { %7357 = vmatprep.subr.bf16.mxu1 %v7356_v48 }
 0x4ed   :  { %7359 = vmatpush3.bf16.msra.mxu1 %v7356_v48 }
 0x4ef   :  { %1901 = vperm.xlu0 %7754, %v5837_v53   ;;  %7812 = vrot.lane.b32.xlu1 %v7801_v47, %s8087_s15 }
 0x4f0   :  { %6814 = vmatmul.mubr.msk.f32.vlgmr.msra.gmra.mrb[16].mxu1 %vm9777_vm1, %v5790_v54 }
 0x4f1   :  { %6816 = vmatprep.mubr.msk.f32.mxu1 %vm9777_vm1, %v5791_v49 }
 0x4f3   :  { %1911 = vperm.xlu0 %7754, %v5839_v50   ;;  %1906 = vperm.xlu1 %7755, %v5838_v51  }
 0x4f4   :  { %6817 = vmatmul.mubr.msk.f32.gmra.mrb[18].mxu1 %vm9777_vm1, %v5792_v52 }
 0x4f5   :  { %6819 = vmatprep.mubr.msk.f32.mxu1 %vm9777_vm1, %v5793_v55 }
 0x4f7   :  { %1921 = vperm.xlu0 %7754, %v5841_v56   ;;  %1916 = vperm.xlu1 %7755, %v5840_v57  }
 0x4f8   :  { %6820 = vmatmul.mubr.msk.f32.gmra.mrb[20].mxu1 %vm9777_vm1, %v5794_v58 }
 0x4f9   :  { %6822 = vmatprep.mubr.msk.f32.mxu1 %vm9777_vm1, %v5795_v59 }
 0x4fb   :  { %1931 = vperm.xlu0 %7754, %v5843_v60   ;;  %1926 = vperm.xlu1 %7755, %v5842_v61  }
 0x4fc   :  { %6823 = vmatmul.mubr.msk.f32.gmra.mrb[22].mxu1 %vm9777_vm1, %v5796_v62 }
 0x4fd   :  { %6833 = vmatprep.mubr.msk.f32.mxu1 %vm9777_vm1, %v5781_v63 }
 0x4ff   :  { %1936 = vperm.xlu1 %7755, %v5844_v1  }
 0x559   :  { %v7798_v2 = vpop.permute.xlu0 %7797 }
 0x55a   :  { %v7800_v3 = vunpack.i.h.bf16 %v7798_v2  ;;  %v7799_v4 = vunpack.i.l.bf16 %v7798_v2 }
 0x55c   :  { %v7360_v6 = vpack.c.bf16 %v7800_v3, %v7799_v4 }
 0x55d   :  { %v7808_v8 = vpop.permute.xlu0 %7807  ;;  %v7803_v9 = vpop.permute.xlu1 %7802 }
 0x55e   :  { %v7810_v11 = vunpack.i.h.bf16 %v7808_v8  ;;  %v7809_v12 = vunpack.i.l.bf16 %v7808_v8  ;;  %v7805_v13 = vunpack.i.h.bf16 %v7803_v9  ;;  %v7804_v14 = vunpack.i.l.bf16 %v7803_v9  ;;  %7362 = vmatprep.subr.msk.bf16.mxu1 %vm8625_vm3, %v7360_v6 }
 0x55f   :  { %7365 = vmatpush3.bf16.msk.msra.mxu1 %vm8625_vm3, %v7360_v6 }
 0x560   :  { %v7366_v15 = vpack.c.bf16 %v7805_v13, %v7804_v14  ;;  %v7372_v19 = vpack.c.bf16 %v7810_v11, %v7809_v12 }
 0x561   :  { %v7813_v16 = vpop.permute.xlu1 %7812 }
 0x562   :  { %v7815_v20 = vunpack.i.h.bf16 %v7813_v16  ;;  %v7814_v21 = vunpack.i.l.bf16 %v7813_v16  ;;  %7368 = vmatprep.subr.msk.bf16.mxu1 %vm8625_vm3, %v7366_v15 }
 0x563   :  { %7371 = vmatpush3.bf16.msk.msra.mxu1 %vm8625_vm3, %v7366_v15 }
 0x564   :  { %7374 = vmatprep.subr.msk.bf16.mxu1 %vm8636_vm11, %v7372_v19  ;;  %v7378_v25 = vpack.c.bf16 %v7815_v20, %v7814_v21 }
 0x566   :  { %6834 = vmatmul.mubr.msk.f32.vlgmr.msra.gmra.mrb[16].mxu1 %vm9777_vm1, %v5782_v22 }
 0x567   :  { %7377 = vmatpush3.bf16.msk.msra.mxu1 %vm8636_vm11, %v7372_v19  ;;  %6836 = vmatprep.mubr.msk.f32.mxu1 %vm9777_vm1, %v5783_v24 }
 0x568   :  { %7380 = vmatprep.subr.msk.bf16.mxu1 %vm8636_vm11, %v7378_v25 }
 0x56a   :  { %6837 = vmatmul.mubr.msk.f32.gmra.mrb[18].mxu1 %vm9777_vm1, %v5784_v26 }
 0x56b   :  { %7383 = vmatpush3.bf16.msk.msra.mxu1 %vm8636_vm11, %v7378_v25  ;;  %6839 = vmatprep.mubr.msk.f32.mxu1 %vm9777_vm1, %v5785_v27 }
 0x56e   :  { %6840 = vmatmul.mubr.msk.f32.gmra.mrb[20].mxu1 %vm9777_vm1, %v5786_v28  ;;  %v1902_v37 = vpop.permute.xlu0 %1901 }
 0x56f   :  { %6842 = vmatprep.mubr.msk.f32.mxu1 %vm9777_vm1, %v5787_v29 }
 0x572   :  { %6843 = vmatmul.mubr.msk.f32.gmra.mrb[22].mxu1 %vm9777_vm1, %v5788_v30  ;;  %v1907_v45 = vpop.permute.xlu1 %1906  ;;  %v1912_v52 = vpop.permute.xlu0 %1911 }
 0x573   :  { %6853 = vmatprep.mubr.msk.f32.mxu1 %vm9777_vm1, %v5817_v31 }
 0x576   :  { %6854 = vmatmul.mubr.msk.f32.vlgmr.msra.gmra.mrb[16].mxu1 %vm9777_vm1, %v5818_v32  ;;  %v1917_v49 = vpop.permute.xlu1 %1916  ;;  %v1922_v12 = vpop.permute.xlu0 %1921 }
 0x577   :  { %6856 = vmatprep.mubr.msk.f32.mxu1 %vm9777_vm1, %v5819_v33 }
 0x57a   :  { %6857 = vmatmul.mubr.msk.f32.gmra.mrb[18].mxu1 %vm9777_vm1, %v5820_v34  ;;  %v1927_v9 = vpop.permute.xlu1 %1926  ;;  %v1932_v19 = vpop.permute.xlu0 %1931 }
 0x57b   :  { %6859 = vmatprep.mubr.msk.f32.mxu1 %vm9777_vm1, %v5821_v36 }
 0x57e   :  { %6860 = vmatmul.mubr.msk.f32.gmra.mrb[20].mxu1 %vm9777_vm1, %v5822_v38  ;;  %v1937_v16 = vpop.permute.xlu1 %1936 }
 0x57f   :  { %6862 = vmatprep.mubr.msk.f32.mxu1 %vm9777_vm1, %v5823_v41 }
 0x582   :  { %6863 = vmatmul.mubr.msk.f32.gmra.mrb[22].mxu1 %vm9777_vm1, %v5824_v42 }
 0x649   :  { %v6855_v40 = vpop.f32.mrb[16].mxu1 }
 0x64a   :  { %v1940_v47 = vadd.f32 %v6855_v40, %v1907_v45  ;;  %v1843_v48 = vpop.f32.mrb[17].mxu1 }
 0x64b   :  { %v1939_v53 = vadd.f32 %v1902_v37, %v1843_v48 }
 0x64c   :  { %v5846_v54 = vmul.f32 -1.442695, %v1940_v47 }
 0x64d   :  { %v5845_v50 = vmul.f32 -1.442695, %v1939_v53  ;;  %v6858_v51 = vpop.f32.mrb[18].mxu1 }
 0x64e   :  { %7968 = vpow2.f32 %v5846_v54  ;;  %v1942_v55 = vadd.f32 %v6858_v51, %v1917_v49  ;;  %v1853_v56 = vpop.f32.mrb[19].mxu1  ;;  %v5905_v49 = vld [vmem:[%s9773_s5 + $0xc0] sm:$0xff]  ;;  %v5859_v51 = vld [vmem:[%s9772_s4 + $0x290] sm:$0xff] }
 0x64f   :  { %7970 = vpow2.f32 %v5845_v50  ;;  %v1941_v57 = vadd.f32 %v1912_v52, %v1853_v56  ;;  %v5858_v50 = vld [vmem:[%s9772_s4 + $0x288] sm:$0xff]  ;;  %v5907_v52 = vld [vmem:[%s9773_s5 + $0xd0] sm:$0xff]  ;;  %v5860_v56 = vld [vmem:[%s9772_s4 + $0x298] sm:$0xff] }
 0x650   :  { %v5848_v58 = vmul.f32 -1.442695, %v1942_v55  ;;  %v5906_v55 = vld [vmem:[%s9773_s5 + $0xc8] sm:$0xff] }
 0x651   :  { %v5847_v59 = vmul.f32 -1.442695, %v1941_v57  ;;  %v6861_v60 = vpop.f32.mrb[20].mxu1  ;;  %v5861_v57 = vld [vmem:[%s9772_s4 + $0x2a0] sm:$0xff] }
 0x652   :  { %7972 = vpow2.f32 %v5848_v58  ;;  %v1863_v61 = vpop.f32.mrb[21].mxu1  ;;  %v1944_v14 = vadd.f32 %v6861_v60, %v1927_v9  ;;  %v5909_v58 = vld [vmem:[%s9773_s5 + $0xe0] sm:$0xff]  ;;  %v5862_v60 = vld [vmem:[%s9772_s4 + $0x2a8] sm:$0xff]  ;;  %v5924_v9 = vld [vmem:[%s9771_s3 + $0x38] sm:$0xff] }
 0x653   :  { %7974 = vpow2.f32 %v5847_v59  ;;  %v1943_v15 = vadd.f32 %v1922_v12, %v1863_v61  ;;  %v5908_v59 = vld [vmem:[%s9773_s5 + $0xd8] sm:$0xff]  ;;  %v5863_v61 = vld [vmem:[%s9772_s4 + $0x2b0] sm:$0xff] }
 0x654   :  { %v1972_v20 = vmax.f32 %v1944_v14, 0.0  ;;  %v6136_v14 = vld [vmem:[%s9772_s4 + $0x558] sm:$0xff] }
 0x655   :  { %v6864_v62 = vpop.f32.mrb[22].mxu1  ;;  %v1971_v24 = vmax.f32 %v1943_v15, 0.0 }
 0x656   :  { %v1873_v63 = vpop.f32.mrb[23].mxu1  ;;  %v1946_v21 = vadd.f32 %v6864_v62, %v1937_v16  ;;  %v5911_v62 = vld [vmem:[%s9773_s5 + $0xf0] sm:$0xff] }
 0x657   :  { %v1945_v25 = vadd.f32 %v1932_v19, %v1873_v63  ;;  %v5910_v63 = vld [vmem:[%s9773_s5 + $0xe8] sm:$0xff] }
 0x658   :  { %v7969_v1 = vpop.eup %7968  ;;  %v1974_v32 = vmax.f32 %v1946_v21, 0.0 }
 0x659   :  { %v7971_v2 = vpop.eup %7970  ;;  %v1960_v3 = vadd.f32 1.0, %v7969_v1  ;;  %v1973_v36 = vmax.f32 %v1945_v25, 0.0  ;;  %v5864_v1 = vld [vmem:[%s9772_s4 + $0x2b8] sm:$0xff] }
 0x65a   :  { %v1959_v4 = vadd.f32 1.0, %v7971_v2  ;;  %v5849_v2 = vld [vmem:[%s9772_s4 + $0x240] sm:$0xff] }
 0x65b   :  { %7976 = vrcp.f32 %v1960_v3  ;;  %v5921_v3 = vld [vmem:[%s9771_s3 + $0x20] sm:$0xff] }
 0x65c   :  { %v7973_v6 = vpop.eup %7972  ;;  %7978 = vrcp.f32 %v1959_v4  ;;  %v5912_v4 = vld [vmem:[%s9773_s5 + $0xf8] sm:$0xff] }
 0x65d   :  { %v7975_v8 = vpop.eup %7974  ;;  %v1962_v11 = vadd.f32 1.0, %v7973_v6  ;;  %v5923_v6 = vld [vmem:[%s9771_s3 + $0x30] sm:$0xff] }
 0x65e   :  { %v1961_v13 = vadd.f32 1.0, %v7975_v8  ;;  %v5922_v8 = vld [vmem:[%s9771_s3 + $0x28] sm:$0xff] }
 0x65f   :  { %7980 = vrcp.f32 %v1962_v11 }
 0x660   :  { %7982 = vrcp.f32 %v1961_v13 }
 0x665   :  { %v7977_v22 = vpop.eup %7976 }
 0x666   :  { %v7979_v26 = vpop.eup %7978  ;;  %v1976_v27 = vmul.f32 %v7977_v22, %v1972_v20  ;;  %v1980_v28 = vsub.f32 1.0, %v7977_v22 }
 0x667   :  { %v1975_v29 = vmul.f32 %v7979_v26, %v1971_v24  ;;  %v1979_v30 = vsub.f32 1.0, %v7979_v26 }
 0x668   :  { %v1984_v31 = vmul.f32 %v1980_v28, %v8542_v35 }
 0x669   :  { %v7981_v33 = vpop.eup %7980  ;;  %v1983_v34 = vmul.f32 %v1979_v30, %v8544_v39  ;;  %v5850_v30 = vld [vmem:[%s9772_s4 + $0x248] sm:$0xff] }
 0x66a   :  { %v7983_v38 = vpop.eup %7982  ;;  %v8718_v41 = vadd.f32 %v1984_v31, %v1976_v27  ;;  %v1978_v42 = vmul.f32 %v7981_v33, %v1974_v32  ;;  %v1982_v43 = vsub.f32 1.0, %v7981_v33  ;;  %v5851_v31 = vld [vmem:[%s9772_s4 + $0x250] sm:$0xff]  ;;  %v5852_v33 = vld [vmem:[%s9772_s4 + $0x258] sm:$0xff]  ;;  %v6169_v27 = vld [vmem:[%s9772_s4 + $0x5c0] sm:$0xff] }
 0x66b   :  { %v8720_v45 = vadd.f32 %v1983_v34, %v1975_v29  ;;  %v1977_v37 = vmul.f32 %v7983_v38, %v1973_v36  ;;  %v1981_v40 = vsub.f32 1.0, %v7983_v38  ;;  %v5853_v34 = vld [vmem:[%s9772_s4 + $0x260] sm:$0xff]  ;;  %v5854_v36 = vld [vmem:[%s9772_s4 + $0x268] sm:$0xff]  ;;  %v5855_v38 = vld [vmem:[%s9772_s4 + $0x270] sm:$0xff] }
 0x66c   :  { %v1986_v47 = vmul.f32 %v1982_v43, %v8552_v44  ;;  %v5885_v43 = vld [vmem:[%s9772_s4 + $0x2c0] sm:$0xff] }
 0x66d   :  { %v1985_v48 = vmul.f32 %v1981_v40, %v8554_v46  ;;  %v7816_v35 = vpack.i.bf16 %v8718_v41, %v8720_v45  ;;  %v7384_v39 = vpack.c.bf16 %v8718_v41, %v8720_v45  ;;  %v5887_v40 = vld [vmem:[%s9772_s4 + $0x2d0] sm:$0xff] }
 0x66e   :  { %v8728_v53 = vadd.f32 %v1986_v47, %v1978_v42  ;;  %v5856_v42 = vld [vmem:[%s9772_s4 + $0x278] sm:$0xff] }
 0x66f   :  { %v8730_v54 = vadd.f32 %v1985_v48, %v1977_v37  ;;  %7817 = vrot.lane.b32.xlu0 %v7816_v35, %s8088_s25  ;;  %7385 = vmatprep.subr.bf16.mxu0 %v7384_v39  ;;  %v5886_v37 = vld [vmem:[%s9772_s4 + $0x2c8] sm:$0xff]  ;;  %v5888_v47 = vld [vmem:[%s9772_s4 + $0x2d8] sm:$0xff]  ;;  %v5889_v48 = vld [vmem:[%s9772_s4 + $0x2e0] sm:$0xff] }
 0x670   :  { %7387 = vmatpush3.bf16.msra.mxu0 %v7384_v39  ;;  %v5891_v39 = vld [vmem:[%s9772_s4 + $0x2f0] sm:$0xff] }
 0x671   :  { %v7821_v44 = vpack.i.bf16 %v8728_v53, %v8730_v54  ;;  %v7388_v46 = vpack.c.bf16 %v8728_v53, %v8730_v54 }
 0x673   :  { %7827 = vrot.lane.b32.xlu0 %v7816_v35, %s8089_s26  ;;  %7822 = vrot.lane.b32.xlu1 %v7821_v44, %s8088_s25  ;;  %v5890_v35 = vld [vmem:[%s9772_s4 + $0x2e8] sm:$0xff] }
 0x674   :  { %7389 = vmatprep.subr.bf16.mxu0 %v7388_v46 }
 0x675   :  { %7391 = vmatpush3.bf16.msra.mxu0 %v7388_v46  ;;  %v5917_v46 = vld [vmem:[%s9770_s2 + $0x20] sm:$0xff] }
 0x677   :  { %2448 = vperm.xlu0 %7754, %v5905_v49   ;;  %7832 = vrot.lane.b32.xlu1 %v7821_v44, %s8089_s26  ;;  %v5892_v44 = vld [vmem:[%s9772_s4 + $0x2f8] sm:$0xff] }
 0x678   :  { %6874 = vmatmul.mubr.msk.f32.vlgmr.msra.gmra.mrb[8].mxu0 %vm9777_vm1, %v5858_v50 }
 0x679   :  { %6876 = vmatprep.mubr.msk.f32.mxu0 %vm9777_vm1, %v5859_v51 }
 0x67b   :  { %2458 = vperm.xlu0 %7754, %v5907_v52   ;;  %2453 = vperm.xlu1 %7755, %v5906_v55  }
 0x67c   :  { %6877 = vmatmul.mubr.msk.f32.gmra.mrb[10].mxu0 %vm9777_vm1, %v5860_v56 }
 0x67d   :  { %6879 = vmatprep.mubr.msk.f32.mxu0 %vm9777_vm1, %v5861_v57 }
 0x67f   :  { %2468 = vperm.xlu0 %7754, %v5909_v58   ;;  %2463 = vperm.xlu1 %7755, %v5908_v59  }
 0x680   :  { %6880 = vmatmul.mubr.msk.f32.gmra.mrb[12].mxu0 %vm9777_vm1, %v5862_v60 }
 0x681   :  { %6882 = vmatprep.mubr.msk.f32.mxu0 %vm9777_vm1, %v5863_v61 }
 0x683   :  { %2478 = vperm.xlu0 %7754, %v5911_v62   ;;  %2473 = vperm.xlu1 %7755, %v5910_v63  }
 0x684   :  { %6883 = vmatmul.mubr.msk.f32.gmra.mrb[14].mxu0 %vm9777_vm1, %v5864_v1 }
 0x685   :  { %6893 = vmatprep.mubr.msk.f32.mxu0 %vm9777_vm1, %v5849_v2  ;;  %vm219_vm1 = vmand %vm187_vm6, %vm218_vm5 }
 0x686   :  { %vm221_vm2 = vmor %vm214_vm9, %vm219_vm1  ;;  %vm9794_vm1 = vcmask 261120  }
 0x687   :  { %2550 = vperm.xlu0 %7754, %v5921_v3   ;;  %2483 = vperm.xlu1 %7755, %v5912_v4   ;;  %vm8824_vm13 = vmpackc.low %vm221_vm2, %vm221_vm2 }
 0x688   :  { %vm9795_vm6 = vmmov %vm9794_vm1 }
 0x689   :  { %vm9796_vm14 = vmmov %vm9794_vm1 }
 0x68a   :  { %vm9797_vm15 = vmmov %vm9794_vm1 }
 0x68b   :  { %2560 = vperm.xlu0 %7754, %v5923_v6   ;;  %2555 = vperm.xlu1 %7755, %v5922_v8   ;;  %vm9798_vm0 = vmmov %vm9794_vm1 }
 0x68c   :  { %vm9799_vm5 = vmmov %vm9798_vm0 }
 0x68d   :  { %vm9800_vm9 = vmmov %vm9798_vm0 }
 0x68e   :  { %vm9801_vm2 = vmmov %vm9798_vm0 }
 0x68f   :  { %2565 = vperm.xlu1 %7755, %v5924_v9  }
 0x6e1   :  { %v7818_v11 = vpop.permute.xlu0 %7817 }
 0x6e2   :  { %v7820_v12 = vunpack.i.h.bf16 %v7818_v11  ;;  %v7819_v13 = vunpack.i.l.bf16 %v7818_v11 }
 0x6e4   :  { %v7392_v15 = vpack.c.bf16 %v7820_v12, %v7819_v13 }
 0x6e5   :  { %v7828_v16 = vpop.permute.xlu0 %7827  ;;  %v7823_v19 = vpop.permute.xlu1 %7822 }
 0x6e6   :  { %v7830_v20 = vunpack.i.h.bf16 %v7828_v16  ;;  %v7829_v21 = vunpack.i.l.bf16 %v7828_v16  ;;  %v7825_v22 = vunpack.i.h.bf16 %v7823_v19  ;;  %v7824_v24 = vunpack.i.l.bf16 %v7823_v19  ;;  %7394 = vmatprep.subr.msk.bf16.mxu0 %vm8813_vm7, %v7392_v15 }
 0x6e7   :  { %7397 = vmatpush3.bf16.msk.msra.mxu0 %vm8813_vm7, %v7392_v15 }
 0x6e8   :  { %v7398_v25 = vpack.c.bf16 %v7825_v22, %v7824_v24  ;;  %v7404_v10 = vpack.c.bf16 %v7830_v20, %v7829_v21 }
 0x6e9   :  { %v7833_v26 = vpop.permute.xlu1 %7832 }
 0x6ea   :  { %v7835_v28 = vunpack.i.h.bf16 %v7833_v26  ;;  %v7834_v29 = vunpack.i.l.bf16 %v7833_v26  ;;  %7400 = vmatprep.subr.msk.bf16.mxu0 %vm8813_vm7, %v7398_v25 }
 0x6eb   :  { %7403 = vmatpush3.bf16.msk.msra.mxu0 %vm8813_vm7, %v7398_v25 }
 0x6ec   :  { %7406 = vmatprep.subr.msk.bf16.mxu0 %vm8824_vm13, %v7404_v10  ;;  %v7410_v32 = vpack.c.bf16 %v7835_v28, %v7834_v29 }
 0x6ee   :  { %6894 = vmatmul.mubr.msk.f32.vlgmr.msra.gmra.mrb[8].mxu0 %vm9794_vm1, %v5850_v30  ;;  %vm9802_vm1 = vmmov %vm9798_vm0 }
 0x6ef   :  { %7409 = vmatpush3.bf16.msk.msra.mxu0 %vm8824_vm13, %v7404_v10  ;;  %6896 = vmatprep.mubr.msk.f32.mxu0 %vm9795_vm6, %v5851_v31  ;;  %vm9803_vm6 = vmmov %vm9798_vm0 }
 0x6f0   :  { %7412 = vmatprep.subr.msk.bf16.mxu0 %vm8824_vm13, %v7410_v32 }
 0x6f2   :  { %6897 = vmatmul.mubr.msk.f32.gmra.mrb[10].mxu0 %vm9796_vm14, %v5852_v33  ;;  %vm9804_vm14 = vmmov %vm9798_vm0 }
 0x6f3   :  { %7415 = vmatpush3.bf16.msk.msra.mxu0 %vm8824_vm13, %v7410_v32  ;;  %6899 = vmatprep.mubr.msk.f32.mxu0 %vm9797_vm15, %v5853_v34  ;;  %vm9805_vm15 = vmmov %vm9798_vm0 }
 0x6f6   :  { %6900 = vmatmul.mubr.msk.f32.gmra.mrb[12].mxu0 %vm9798_vm0, %v5854_v36  ;;  %v2449_v50 = vpop.permute.xlu0 %2448 }
 0x6f7   :  { %6902 = vmatprep.mubr.msk.f32.mxu0 %vm9799_vm5, %v5855_v38  ;;  %vm9806_vm5 = vmmov %vm9798_vm0 }
 0x6fa   :  { %6903 = vmatmul.mubr.msk.f32.gmra.mrb[14].mxu0 %vm9800_vm9, %v5856_v42  ;;  %vm9807_vm9 = vmmov %vm9798_vm0  ;;  %v2454_v49 = vpop.permute.xlu1 %2453  ;;  %v2459_v61 = vpop.permute.xlu0 %2458 }
 0x6fb   :  { %6913 = vmatprep.mubr.msk.f32.mxu0 %vm9801_vm2, %v5885_v43  ;;  %vm9808_vm2 = vmmov %vm9798_vm0 }
 0x6fc   :  { %6933 = vmatprep.mubr.msk.f32.mxu1 %vm9808_vm2, %v5917_v46  ;;  %vm9815_vm2 = vmmov %vm9798_vm0 }
 0x6fe   :  { %6914 = vmatmul.mubr.msk.f32.vlgmr.msra.gmra.mrb[8].mxu0 %vm9802_vm1, %v5886_v37  ;;  %v2464_v58 = vpop.permute.xlu1 %2463  ;;  %v2469_v22 = vpop.permute.xlu0 %2468  ;;  %vm9809_vm1 = vmmov %vm9798_vm0 }
 0x6ff   :  { %6916 = vmatprep.mubr.msk.f32.mxu0 %vm9803_vm6, %v5887_v40  ;;  %vm9810_vm6 = vmmov %vm9798_vm0 }
 0x702   :  { %6917 = vmatmul.mubr.msk.f32.gmra.mrb[10].mxu0 %vm9804_vm14, %v5888_v47  ;;  %v2474_v20 = vpop.permute.xlu1 %2473  ;;  %v2479_v28 = vpop.permute.xlu0 %2478  ;;  %vm9811_vm14 = vmmov %vm9798_vm0 }
 0x703   :  { %6919 = vmatprep.mubr.msk.f32.mxu0 %vm9805_vm15, %v5889_v48  ;;  %vm9812_vm15 = vmmov %vm9798_vm0 }
 0x706   :  { %6920 = vmatmul.mubr.msk.f32.gmra.mrb[12].mxu0 %vm9798_vm0, %v5890_v35  ;;  %v2484_v10 = vpop.permute.xlu1 %2483 }
 0x707   :  { %6922 = vmatprep.mubr.msk.f32.mxu0 %vm9806_vm5, %v5891_v39  ;;  %vm9813_vm5 = vmmov %vm9798_vm0 }
 0x70a   :  { %6923 = vmatmul.mubr.msk.f32.gmra.mrb[14].mxu0 %vm9807_vm9, %v5892_v44  ;;  %vm9814_vm9 = vmmov %vm9798_vm0 }
 0x7d1   :  { %v6915_v51 = vpop.f32.mrb[8].mxu0 }
 0x7d2   :  { %v2487_v52 = vadd.f32 %v6915_v51, %v2454_v49  ;;  %v2390_v55 = vpop.f32.mrb[9].mxu0 }
 0x7d3   :  { %v2486_v56 = vadd.f32 %v2449_v50, %v2390_v55 }
 0x7d4   :  { %v5914_v57 = vmul.f32 -1.442695, %v2487_v52 }
 0x7d5   :  { %v5913_v59 = vmul.f32 -1.442695, %v2486_v56  ;;  %v6918_v60 = vpop.f32.mrb[10].mxu0 }
 0x7d6   :  { %7984 = vpow2.f32 %v5914_v57  ;;  %v2489_v62 = vadd.f32 %v6918_v60, %v2464_v58  ;;  %v2400_v63 = vpop.f32.mrb[11].mxu0  ;;  %v5919_v60 = vld [vmem:[%s9770_s2 + $0x30] sm:$0xff] }
 0x7d7   :  { %7986 = vpow2.f32 %v5913_v59  ;;  %v2488_v1 = vadd.f32 %v2459_v61, %v2400_v63  ;;  %v2556_v61 = vpop.permute.xlu1 %2555 }
 0x7d8   :  { %v5916_v2 = vmul.f32 -1.442695, %v2489_v62  ;;  %v2551_v62 = vpop.permute.xlu0 %2550 }
 0x7d9   :  { %v5915_v3 = vmul.f32 -1.442695, %v2488_v1  ;;  %v6921_v4 = vpop.f32.mrb[12].mxu0 }
 0x7da   :  { %7988 = vpow2.f32 %v5916_v2  ;;  %v2410_v6 = vpop.f32.mrb[13].mxu0  ;;  %v2491_v25 = vadd.f32 %v6921_v4, %v2474_v20 }
 0x7db   :  { %7990 = vpow2.f32 %v5915_v3  ;;  %v2490_v26 = vadd.f32 %v2469_v22, %v2410_v6  ;;  %v2566_v6 = vpop.permute.xlu1 %2565 }
 0x7dc   :  { %v2519_v29 = vmax.f32 %v2491_v25, 0.0  ;;  %v5985_v25 = vld [vmem:[%s9773_s5 + $0x100] sm:$0xff] }
 0x7dd   :  { %v6924_v8 = vpop.f32.mrb[14].mxu0  ;;  %v2518_v32 = vmax.f32 %v2490_v26, 0.0  ;;  %v5938_v26 = vld [vmem:[%s9772_s4 + $0x348] sm:$0xff] }
 0x7de   :  { %v2420_v9 = vpop.f32.mrb[15].mxu0  ;;  %v2493_v30 = vadd.f32 %v6924_v8, %v2484_v10  ;;  %v5939_v10 = vld [vmem:[%s9772_s4 + $0x350] sm:$0xff] }
 0x7df   :  { %v2492_v33 = vadd.f32 %v2479_v28, %v2420_v9  ;;  %v5986_v28 = vld [vmem:[%s9773_s5 + $0x108] sm:$0xff] }
 0x7e0   :  { %v7985_v11 = vpop.eup %7984  ;;  %v2521_v40 = vmax.f32 %v2493_v30, 0.0  ;;  %v5940_v30 = vld [vmem:[%s9772_s4 + $0x358] sm:$0xff] }
 0x7e1   :  { %v7987_v12 = vpop.eup %7986  ;;  %v2507_v13 = vadd.f32 1.0, %v7985_v11  ;;  %v2520_v35 = vmax.f32 %v2492_v33, 0.0  ;;  %v2561_v11 = vpop.permute.xlu0 %2560  ;;  %v5989_v33 = vld [vmem:[%s9773_s5 + $0x120] sm:$0xff] }
 0x7e2   :  { %v2506_v15 = vadd.f32 1.0, %v7987_v12 }
 0x7e3   :  { %7992 = vrcp.f32 %v2507_v13 }
 0x7e4   :  { %v7989_v16 = vpop.eup %7988  ;;  %7994 = vrcp.f32 %v2506_v15 }
 0x7e5   :  { %v7991_v19 = vpop.eup %7990  ;;  %v2509_v21 = vadd.f32 1.0, %v7989_v16 }
 0x7e6   :  { %v2508_v24 = vadd.f32 1.0, %v7991_v19 }
 0x7e7   :  { %7996 = vrcp.f32 %v2509_v21 }
 0x7e8   :  { %7998 = vrcp.f32 %v2508_v24 }
 0x7ed   :  { %v7993_v31 = vpop.eup %7992 }
 0x7ee   :  { %v7995_v34 = vpop.eup %7994  ;;  %v2523_v36 = vmul.f32 %v7993_v31, %v2519_v29  ;;  %v2527_v38 = vsub.f32 1.0, %v7993_v31  ;;  %v5987_v29 = vld [vmem:[%s9773_s5 + $0x110] sm:$0xff]  ;;  %v5941_v31 = vld [vmem:[%s9772_s4 + $0x360] sm:$0xff] }
 0x7ef   :  { %v2522_v42 = vmul.f32 %v7995_v34, %v2518_v32  ;;  %v2526_v43 = vsub.f32 1.0, %v7995_v34  ;;  %v5988_v32 = vld [vmem:[%s9773_s5 + $0x118] sm:$0xff]  ;;  %v5942_v34 = vld [vmem:[%s9772_s4 + $0x368] sm:$0xff] }
 0x7f0   :  { %v2531_v37 = vmul.f32 %v2527_v38, %v8718_v41  ;;  %v5990_v38 = vld [vmem:[%s9773_s5 + $0x128] sm:$0xff] }
 0x7f1   :  { %v7997_v47 = vpop.eup %7996  ;;  %v2530_v48 = vmul.f32 %v2526_v43, %v8720_v45  ;;  %v5918_v45 = vld [vmem:[%s9770_s2 + $0x28] sm:$0xff]  ;;  %v5944_v43 = vld [vmem:[%s9772_s4 + $0x378] sm:$0xff] }
 0x7f2   :  { %v7999_v39 = vpop.eup %7998  ;;  %v2535_v44 = vadd.f32 %v2531_v37, %v2523_v36  ;;  %v2525_v46 = vmul.f32 %v7997_v47, %v2521_v40  ;;  %v2529_v49 = vsub.f32 1.0, %v7997_v47  ;;  %v5943_v36 = vld [vmem:[%s9772_s4 + $0x370] sm:$0xff]  ;;  %v5929_v37 = vld [vmem:[%s9772_s4 + $0x300] sm:$0xff]  ;;  %v5992_v40 = vld [vmem:[%s9773_s5 + $0x138] sm:$0xff] }
 0x7f3   :  { %v2534_v50 = vadd.f32 %v2530_v48, %v2522_v42  ;;  %v2524_v51 = vmul.f32 %v7999_v39, %v2520_v35  ;;  %v2528_v52 = vsub.f32 1.0, %v7999_v39  ;;  %v5991_v42 = vld [vmem:[%s9773_s5 + $0x130] sm:$0xff] }
 0x7f4   :  { %v2533_v55 = vmul.f32 %v2529_v49, %v8728_v53  ;;  %v5920_v53 = vld [vmem:[%s9770_s2 + $0x38] sm:$0xff] }
 0x7f5   :  { %v2532_v56 = vmul.f32 %v2528_v52, %v8730_v54  ;;  %v7416_v57 = vpack.c.bf16 %v2535_v44, %v2534_v50  ;;  %v5937_v54 = vld [vmem:[%s9772_s4 + $0x340] sm:$0xff] }
 0x7f6   :  { %v2537_v58 = vadd.f32 %v2533_v55, %v2525_v46  ;;  %6947 = vmatprep.mubr.msk.f32.mxu0 %vm9812_vm15, %v5937_v54  ;;  %vm9819_vm15 = vmmov %vm9798_vm0  ;;  %v5933_v54 = vld [vmem:[%s9772_s4 + $0x320] sm:$0xff] }
 0x7f7   :  { %v2536_v59 = vadd.f32 %v2532_v56, %v2524_v51  ;;  %7417 = vmatprep.subr.bf16.mxu1 %v7416_v57 }
 0x7f8   :  { %7419 = vmatpush3.bf16.msra.mxu1 %v7416_v57 }
 0x7f9   :  { %v7420_v41 = vpack.c.bf16 %v2537_v58, %v2536_v59 }
 0x7fb   :  { %7421 = vmatprep.subr.bf16.mxu1 %v7420_v41 }
 0x7fc   :  { %7423 = vmatpush3.bf16.msra.mxu1 %v7420_v41  ;;  %v5930_v41 = vld [vmem:[%s9772_s4 + $0x308] sm:$0xff] }
 0x7ff   :  { %6934 = vmatmul.mubr.msk.f32.vlgmr.msra.gmra.mrb[24].mxu1 %vm9809_vm1, %v5918_v45  ;;  %vm9816_vm1 = vmmov %vm9798_vm0  ;;  %v5931_v45 = vld [vmem:[%s9772_s4 + $0x310] sm:$0xff] }
 0x800   :  { %6936 = vmatprep.mubr.msk.f32.mxu1 %vm9810_vm6, %v5919_v60  ;;  %vm9817_vm6 = vmmov %vm9798_vm0 }
 0x803   :  { %6937 = vmatmul.mubr.msk.f32.gmra.mrb[26].mxu1 %vm9811_vm14, %v5920_v53  ;;  %vm9818_vm14 = vmmov %vm9798_vm0  ;;  %v5932_v53 = vld [vmem:[%s9772_s4 + $0x318] sm:$0xff] }
 0x8d2   :  { %v6935_v63 = vpop.f32.mrb[24].mxu1 }
 0x8d3   :  { %v2652_v1 = vadd.f32 %v6935_v63, %v2556_v61  ;;  %v2646_v2 = vpop.f32.mrb[25].mxu1  ;;  %v5934_v61 = vld [vmem:[%s9772_s4 + $0x328] sm:$0xff]  ;;  %v5936_v63 = vld [vmem:[%s9772_s4 + $0x338] sm:$0xff] }
 0x8d4   :  { %v2647_v3 = vadd.f32 %v2646_v2, %v2551_v62  ;;  %v5935_v62 = vld [vmem:[%s9772_s4 + $0x330] sm:$0xff]  ;;  %v5966_v2 = vld [vmem:[%s9772_s4 + $0x388] sm:$0xff] }
 0x8d5   :  { %v8924_v4 = vmax.f32 %v2652_v1, 0.0  ;;  %v5965_v1 = vld [vmem:[%s9772_s4 + $0x380] sm:$0xff] }
 0x8d6   :  { %v8926_v8 = vmax.f32 %v2647_v3, 0.0  ;;  %v6938_v9 = vpop.f32.mrb[26].mxu1  ;;  %v5967_v3 = vld [vmem:[%s9772_s4 + $0x390] sm:$0xff] }
 0x8d7   :  { %v2662_v12 = vadd.f32 %v6938_v9, %v2566_v6  ;;  %v2656_v13 = vpop.f32.mrb[27].mxu1  ;;  %v5968_v6 = vld [vmem:[%s9772_s4 + $0x398] sm:$0xff]  ;;  %v5969_v9 = vld [vmem:[%s9772_s4 + $0x3a0] sm:$0xff] }
 0x8d8   :  { %v2657_v15 = vadd.f32 %v2656_v13, %v2561_v11  ;;  %v7836_v16 = vpack.i.bf16 %v8924_v4, %v8926_v8  ;;  %v7424_v19 = vpack.c.bf16 %v8924_v4, %v8926_v8  ;;  %v5970_v11 = vld [vmem:[%s9772_s4 + $0x3a8] sm:$0xff]  ;;  %v5972_v13 = vld [vmem:[%s9772_s4 + $0x3b8] sm:$0xff] }
 0x8d9   :  { %v8932_v20 = vmax.f32 %v2662_v12, 0.0  ;;  %v5971_v12 = vld [vmem:[%s9772_s4 + $0x3b0] sm:$0xff] }
 0x8da   :  { %v8934_v21 = vmax.f32 %v2657_v15, 0.0  ;;  %7837 = vrot.lane.b32.xlu0 %v7836_v16, %s8082_s0  ;;  %7425 = vmatprep.subr.bf16.mxu0 %v7424_v19  ;;  %v6005_v15 = vld [vmem:[%s9772_s4 + $0x400] sm:$0xff] }
 0x8db   :  { %7427 = vmatpush3.bf16.msra.mxu0 %v7424_v19 }
 0x8dc   :  { %v7841_v22 = vpack.i.bf16 %v8932_v20, %v8934_v21  ;;  %v7428_v24 = vpack.c.bf16 %v8932_v20, %v8934_v21 }
 0x8de   :  { %7842 = vrot.lane.b32.xlu1 %v7841_v22, %s8082_s0  ;;  %7847 = vrot.lane.b32.xlu0 %v7836_v16, %s8083_s9 }
 0x8df   :  { %7429 = vmatprep.subr.bf16.mxu0 %v7428_v24 }
 0x8e0   :  { %7431 = vmatpush3.bf16.msra.mxu0 %v7428_v24 }
 0x8e2   :  { %7852 = vrot.lane.b32.xlu1 %v7841_v22, %s8083_s9  ;;  %3126 = vperm.xlu0 %7754, %v5985_v25  }
 0x8e3   :  { %6948 = vmatmul.mubr.msk.f32.vlgmr.msra.gmra.mrb[16].mxu0 %vm9798_vm0, %v5938_v26 }
 0x8e4   :  { %6950 = vmatprep.mubr.msk.f32.mxu0 %vm9813_vm5, %v5939_v10  ;;  %vm9820_vm5 = vmmov %vm9798_vm0 }
 0x8e6   :  { %3131 = vperm.xlu1 %7755, %v5986_v28   ;;  %3136 = vperm.xlu0 %7754, %v5987_v29  }
 0x8e7   :  { %6951 = vmatmul.mubr.msk.f32.gmra.mrb[18].mxu0 %vm9814_vm9, %v5940_v30  ;;  %vm9821_vm9 = vmmov %vm9798_vm0 }
 0x8e8   :  { %6953 = vmatprep.mubr.msk.f32.mxu0 %vm9815_vm2, %v5941_v31  ;;  %vm9822_vm2 = vmmov %vm9798_vm0 }
 0x8ea   :  { %3141 = vperm.xlu1 %7755, %v5988_v32   ;;  %3146 = vperm.xlu0 %7754, %v5989_v33  }
 0x8eb   :  { %6954 = vmatmul.mubr.msk.f32.gmra.mrb[20].mxu0 %vm9816_vm1, %v5942_v34  ;;  %vm9823_vm1 = vmmov %vm9798_vm0 }
 0x8ec   :  { %6956 = vmatprep.mubr.msk.f32.mxu0 %vm9817_vm6, %v5943_v36  ;;  %vm9824_vm6 = vmmov %vm9798_vm0 }
 0x8ee   :  { %3151 = vperm.xlu1 %7755, %v5990_v38   ;;  %3156 = vperm.xlu0 %7754, %v5991_v42  }
 0x8ef   :  { %6957 = vmatmul.mubr.msk.f32.gmra.mrb[22].mxu0 %vm9818_vm14, %v5944_v43  ;;  %vm9825_vm14 = vmmov %vm9798_vm0 }
 0x8f0   :  { %6967 = vmatprep.mubr.msk.f32.mxu0 %vm9819_vm15, %v5929_v37  ;;  %vm9826_vm15 = vmmov %vm9798_vm0 }
 0x8f2   :  { %3161 = vperm.xlu1 %7755, %v5992_v40  }
 0x94c   :  { %v7838_v47 = vpop.permute.xlu0 %7837 }
 0x94d   :  { %v7840_v48 = vunpack.i.h.bf16 %v7838_v47  ;;  %v7839_v35 = vunpack.i.l.bf16 %v7838_v47 }
 0x94f   :  { %v7432_v39 = vpack.c.bf16 %v7840_v48, %v7839_v35 }
 0x950   :  { %v7843_v44 = vpop.permute.xlu1 %7842  ;;  %v7848_v46 = vpop.permute.xlu0 %7847 }
 0x951   :  { %v7845_v49 = vunpack.i.h.bf16 %v7843_v44  ;;  %v7844_v50 = vunpack.i.l.bf16 %v7843_v44  ;;  %v7850_v51 = vunpack.i.h.bf16 %v7848_v46  ;;  %v7849_v52 = vunpack.i.l.bf16 %v7848_v46  ;;  %7434 = vmatprep.subr.msk.bf16.mxu0 %vm8273_vm8, %v7432_v39 }
 0x952   :  { %7437 = vmatpush3.bf16.msk.msra.mxu0 %vm8273_vm8, %v7432_v39 }
 0x953   :  { %v7438_v55 = vpack.c.bf16 %v7845_v49, %v7844_v50  ;;  %v7444_v57 = vpack.c.bf16 %v7850_v51, %v7849_v52 }
 0x954   :  { %v7853_v56 = vpop.permute.xlu1 %7852 }
 0x955   :  { %v7855_v58 = vunpack.i.h.bf16 %v7853_v56  ;;  %v7854_v59 = vunpack.i.l.bf16 %v7853_v56  ;;  %7440 = vmatprep.subr.msk.bf16.mxu0 %vm8273_vm8, %v7438_v55 }
 0x956   :  { %7443 = vmatpush3.bf16.msk.msra.mxu0 %vm8273_vm8, %v7438_v55 }
 0x957   :  { %7446 = vmatprep.subr.msk.bf16.mxu0 %vm8284_vm12, %v7444_v57  ;;  %v7450_v60 = vpack.c.bf16 %v7855_v58, %v7854_v59 }
 0x959   :  { %6968 = vmatmul.mubr.msk.f32.vlgmr.msra.gmra.mrb[16].mxu0 %vm9798_vm0, %v5930_v41 }
 0x95a   :  { %7449 = vmatpush3.bf16.msk.msra.mxu0 %vm8284_vm12, %v7444_v57  ;;  %6970 = vmatprep.mubr.msk.f32.mxu0 %vm9820_vm5, %v5931_v45  ;;  %vm9827_vm5 = vmmov %vm9798_vm0 }
 0x95b   :  { %7452 = vmatprep.subr.msk.bf16.mxu0 %vm8284_vm12, %v7450_v60 }
 0x95d   :  { %6971 = vmatmul.mubr.msk.f32.gmra.mrb[18].mxu0 %vm9821_vm9, %v5932_v53  ;;  %vm9828_vm9 = vmmov %vm9798_vm0 }
 0x95e   :  { %7455 = vmatpush3.bf16.msk.msra.mxu0 %vm8284_vm12, %v7450_v60  ;;  %6973 = vmatprep.mubr.msk.f32.mxu0 %vm9822_vm2, %v5933_v54  ;;  %vm9829_vm2 = vmmov %vm9798_vm0 }
 0x961   :  { %6974 = vmatmul.mubr.msk.f32.gmra.mrb[20].mxu0 %vm9823_vm1, %v5934_v61  ;;  %vm9830_vm1 = vmmov %vm9798_vm0  ;;  %v3127_v19 = vpop.permute.xlu0 %3126 }
 0x962   :  { %6976 = vmatprep.mubr.msk.f32.mxu0 %vm9824_vm6, %v5935_v62  ;;  %vm9831_vm6 = vmmov %vm9798_vm0 }
 0x965   :  { %6977 = vmatmul.mubr.msk.f32.gmra.mrb[22].mxu0 %vm9825_vm14, %v5936_v63  ;;  %vm9832_vm14 = vmmov %vm9798_vm0  ;;  %v3132_v16 = vpop.permute.xlu1 %3131  ;;  %v3137_v31 = vpop.permute.xlu0 %3136 }
 0x966   :  { %6987 = vmatprep.mubr.msk.f32.mxu0 %vm9826_vm15, %v5965_v1  ;;  %vm9833_vm15 = vmmov %vm9798_vm0 }
 0x967   :  { %7007 = vmatprep.mubr.msk.f32.mxu1 %vm9833_vm15, %v6005_v15  ;;  %vm9840_vm15 = vmmov %vm9798_vm0 }
 0x969   :  { %6988 = vmatmul.mubr.msk.f32.vlgmr.msra.gmra.mrb[16].mxu0 %vm9798_vm0, %v5966_v2  ;;  %v3142_v28 = vpop.permute.xlu1 %3141  ;;  %v3147_v51 = vpop.permute.xlu0 %3146 }
 0x96a   :  { %6990 = vmatprep.mubr.msk.f32.mxu0 %vm9827_vm5, %v5967_v3  ;;  %vm9834_vm5 = vmmov %vm9798_vm0 }
 0x96d   :  { %6991 = vmatmul.mubr.msk.f32.gmra.mrb[18].mxu0 %vm9828_vm9, %v5968_v6  ;;  %v3152_v49 = vpop.permute.xlu1 %3151  ;;  %v3157_v58 = vpop.permute.xlu0 %3156  ;;  %vm9835_vm9 = vmmov %vm9798_vm0 }
 0x96e   :  { %6993 = vmatprep.mubr.msk.f32.mxu0 %vm9829_vm2, %v5969_v9  ;;  %vm9836_vm2 = vmmov %vm9798_vm0 }
 0x971   :  { %6994 = vmatmul.mubr.msk.f32.gmra.mrb[20].mxu0 %vm9830_vm1, %v5970_v11  ;;  %v3162_v57 = vpop.permute.xlu1 %3161  ;;  %vm9837_vm1 = vmmov %vm9798_vm0 }
 0x972   :  { %6996 = vmatprep.mubr.msk.f32.mxu0 %vm9831_vm6, %v5971_v12  ;;  %vm9838_vm6 = vmmov %vm9798_vm0 }
 0x975   :  { %6997 = vmatmul.mubr.msk.f32.gmra.mrb[22].mxu0 %vm9832_vm14, %v5972_v13  ;;  %vm9839_vm14 = vmmov %vm9798_vm0 }
 0xa3c   :  { %v6989_v22 = vpop.f32.mrb[16].mxu0 }
 0xa3d   :  { %v3165_v24 = vadd.f32 %v6989_v22, %v3132_v16  ;;  %v3068_v25 = vpop.f32.mrb[17].mxu0 }
 0xa3e   :  { %v3164_v26 = vadd.f32 %v3127_v19, %v3068_v25 }
 0xa3f   :  { %v5994_v10 = vmul.f32 -1.442695, %v3165_v24 }
 0xa40   :  { %v5993_v29 = vmul.f32 -1.442695, %v3164_v26  ;;  %v6992_v30 = vpop.f32.mrb[18].mxu0 }
 0xa41   :  { %8000 = vpow2.f32 %v5994_v10  ;;  %v3167_v32 = vadd.f32 %v6992_v30, %v3142_v28  ;;  %v3078_v33 = vpop.f32.mrb[19].mxu0  ;;  %v6006_v30 = vld [vmem:[%s9772_s4 + $0x408] sm:$0xff] }
 0xa42   :  { %8002 = vpow2.f32 %v5993_v29  ;;  %v3166_v34 = vadd.f32 %v3137_v31, %v3078_v33  ;;  %v6007_v31 = vld [vmem:[%s9772_s4 + $0x410] sm:$0xff]  ;;  %v6054_v33 = vld [vmem:[%s9773_s5 + $0x148] sm:$0xff] }
 0xa43   :  { %v5996_v36 = vmul.f32 -1.442695, %v3167_v32  ;;  %v6055_v32 = vld [vmem:[%s9773_s5 + $0x150] sm:$0xff] }
 0xa44   :  { %v5995_v38 = vmul.f32 -1.442695, %v3166_v34  ;;  %v6995_v42 = vpop.f32.mrb[20].mxu0  ;;  %v6008_v34 = vld [vmem:[%s9772_s4 + $0x418] sm:$0xff] }
 0xa45   :  { %8004 = vpow2.f32 %v5996_v36  ;;  %v3088_v43 = vpop.f32.mrb[21].mxu0  ;;  %v3169_v55 = vadd.f32 %v6995_v42, %v3152_v49  ;;  %v6009_v36 = vld [vmem:[%s9772_s4 + $0x420] sm:$0xff]  ;;  %v6056_v42 = vld [vmem:[%s9773_s5 + $0x158] sm:$0xff] }
 0xa46   :  { %8006 = vpow2.f32 %v5995_v38  ;;  %v3168_v56 = vadd.f32 %v3147_v51, %v3088_v43  ;;  %v6057_v38 = vld [vmem:[%s9773_s5 + $0x160] sm:$0xff]  ;;  %v6010_v43 = vld [vmem:[%s9772_s4 + $0x428] sm:$0xff] }
 0xa47   :  { %v3197_v59 = vmax.f32 %v3169_v55, 0.0 }
 0xa48   :  { %v6998_v37 = vpop.f32.mrb[22].mxu0  ;;  %v3196_v60 = vmax.f32 %v3168_v56, 0.0 }
 0xa49   :  { %v3098_v40 = vpop.f32.mrb[23].mxu0  ;;  %v3171_v41 = vadd.f32 %v6998_v37, %v3162_v57  ;;  %v6011_v37 = vld [vmem:[%s9772_s4 + $0x430] sm:$0xff] }
 0xa4a   :  { %v3170_v53 = vadd.f32 %v3157_v58, %v3098_v40  ;;  %v6059_v40 = vld [vmem:[%s9773_s5 + $0x170] sm:$0xff] }
 0xa4b   :  { %v8001_v47 = vpop.eup %8000  ;;  %v3199_v3 = vmax.f32 %v3171_v41, 0.0 }
 0xa4c   :  { %v8003_v48 = vpop.eup %8002  ;;  %v3185_v35 = vadd.f32 1.0, %v8001_v47  ;;  %v3198_v11 = vmax.f32 %v3170_v53, 0.0  ;;  %v6058_v47 = vld [vmem:[%s9773_s5 + $0x168] sm:$0xff] }
 0xa4d   :  { %v3184_v39 = vadd.f32 1.0, %v8003_v48  ;;  %v6012_v48 = vld [vmem:[%s9772_s4 + $0x438] sm:$0xff] }
 0xa4e   :  { %8008 = vrcp.f32 %v3185_v35  ;;  %v5997_v35 = vld [vmem:[%s9772_s4 + $0x3c0] sm:$0xff] }
 0xa4f   :  { %v8005_v44 = vpop.eup %8004  ;;  %8010 = vrcp.f32 %v3184_v39  ;;  %v6060_v39 = vld [vmem:[%s9773_s5 + $0x178] sm:$0xff] }
 0xa50   :  { %v8007_v46 = vpop.eup %8006  ;;  %v3187_v50 = vadd.f32 1.0, %v8005_v44 }
 0xa51   :  { %v3186_v52 = vadd.f32 1.0, %v8007_v46 }
 0xa52   :  { %8012 = vrcp.f32 %v3187_v50 }
 0xa53   :  { %8014 = vrcp.f32 %v3186_v52 }
 0xa58   :  { %v8009_v45 = vpop.eup %8008 }
 0xa59   :  { %v8011_v54 = vpop.eup %8010  ;;  %v3201_v61 = vmul.f32 %v8009_v45, %v3197_v59  ;;  %v3205_v62 = vsub.f32 1.0, %v8009_v45 }
 0xa5a   :  { %v3200_v63 = vmul.f32 %v8011_v54, %v3196_v60  ;;  %v3204_v1 = vsub.f32 1.0, %v8011_v54  ;;  %v5998_v54 = vld [vmem:[%s9772_s4 + $0x3c8] sm:$0xff] }
 0xa5b   :  { %v3209_v2 = vmul.f32 %v3205_v62, %v8924_v4 }
 0xa5c   :  { %v8013_v6 = vpop.eup %8012  ;;  %v3208_v9 = vmul.f32 %v3204_v1, %v8926_v8  ;;  %v6002_v1 = vld [vmem:[%s9772_s4 + $0x3e8] sm:$0xff] }
 0xa5d   :  { %v8015_v12 = vpop.eup %8014  ;;  %v9082_v13 = vadd.f32 %v3209_v2, %v3201_v61  ;;  %v3203_v15 = vmul.f32 %v8013_v6, %v3199_v3  ;;  %v3207_v16 = vsub.f32 1.0, %v8013_v6  ;;  %v5999_v61 = vld [vmem:[%s9772_s4 + $0x3d0] sm:$0xff]  ;;  %v6004_v3 = vld [vmem:[%s9772_s4 + $0x3f8] sm:$0xff]  ;;  %v6034_v6 = vld [vmem:[%s9772_s4 + $0x448] sm:$0xff] }
 0xa5e   :  { %v9084_v19 = vadd.f32 %v3208_v9, %v3200_v63  ;;  %v3202_v22 = vmul.f32 %v8015_v12, %v3198_v11  ;;  %v3206_v24 = vsub.f32 1.0, %v8015_v12  ;;  %v6001_v63 = vld [vmem:[%s9772_s4 + $0x3e0] sm:$0xff]  ;;  %v6003_v2 = vld [vmem:[%s9772_s4 + $0x3f0] sm:$0xff]  ;;  %v6036_v11 = vld [vmem:[%s9772_s4 + $0x458] sm:$0xff] }
 0xa5f   :  { %v3211_v25 = vmul.f32 %v3207_v16, %v8932_v20  ;;  %v6035_v9 = vld [vmem:[%s9772_s4 + $0x450] sm:$0xff]  ;;  %v6037_v12 = vld [vmem:[%s9772_s4 + $0x460] sm:$0xff] }
 0xa60   :  { %v3210_v26 = vmul.f32 %v3206_v24, %v8934_v21  ;;  %v7856_v4 = vpack.i.bf16 %v9082_v13, %v9084_v19  ;;  %v7456_v8 = vpack.c.bf16 %v9082_v13, %v9084_v19  ;;  %v6053_v21 = vld [vmem:[%s9773_s5 + $0x140] sm:$0xff]  ;;  %v6039_v16 = vld [vmem:[%s9772_s4 + $0x470] sm:$0xff] }
 0xa61   :  { %v9092_v10 = vadd.f32 %v3211_v25, %v3203_v15  ;;  %v6038_v15 = vld [vmem:[%s9772_s4 + $0x468] sm:$0xff]  ;;  %v6073_v24 = vld [vmem:[%s9772_s4 + $0x4c0] sm:$0xff] }
 0xa62   :  { %v9094_v28 = vadd.f32 %v3210_v26, %v3202_v22  ;;  %7857 = vrot.lane.b32.xlu0 %v7856_v4, %s8084_s29  ;;  %7457 = vmatprep.subr.bf16.mxu1 %v7456_v8  ;;  %v6040_v22 = vld [vmem:[%s9772_s4 + $0x478] sm:$0xff] }
 0xa63   :  { %7459 = vmatpush3.bf16.msra.mxu1 %v7456_v8 }
 0xa64   :  { %v7861_v29 = vpack.i.bf16 %v9092_v10, %v9094_v28  ;;  %v7460_v20 = vpack.c.bf16 %v9092_v10, %v9094_v28 }
 0xa66   :  { %7867 = vrot.lane.b32.xlu0 %v7856_v4, %s8085_s30  ;;  %7862 = vrot.lane.b32.xlu1 %v7861_v29, %s8084_s29 }
 0xa67   :  { %7461 = vmatprep.subr.bf16.mxu1 %v7460_v20 }
 0xa68   :  { %7463 = vmatpush3.bf16.msra.mxu1 %v7460_v20 }
 0xa6a   :  { %3673 = vperm.xlu0 %7754, %v6053_v21   ;;  %7872 = vrot.lane.b32.xlu1 %v7861_v29, %s8085_s30 }
 0xa6b   :  { %7008 = vmatmul.mubr.msk.f32.vlgmr.msra.gmra.mrb[28].mxu1 %vm9798_vm0, %v6006_v30 }
 0xa6c   :  { %7010 = vmatprep.mubr.msk.f32.mxu1 %vm9834_vm5, %v6007_v31  ;;  %vm9841_vm5 = vmmov %vm9798_vm0 }
 0xa6e   :  { %3683 = vperm.xlu0 %7754, %v6055_v32   ;;  %3678 = vperm.xlu1 %7755, %v6054_v33  }
 0xa6f   :  { %7011 = vmatmul.mubr.msk.f32.gmra.mrb[30].mxu1 %vm9835_vm9, %v6008_v34  ;;  %vm9843_vm9 = vmmov %vm9798_vm0 }
 0xa70   :  { %7013 = vmatprep.mubr.msk.f32.mxu1 %vm9836_vm2, %v6009_v36  ;;  %vm9844_vm2 = vmmov %vm9798_vm0 }
 0xa72   :  { %3693 = vperm.xlu0 %7754, %v6057_v38   ;;  %3688 = vperm.xlu1 %7755, %v6056_v42  }
 0xa73   :  { %7014 = vmatmul.mubr.msk.f32.gmra.mrb[32].mxu1 %vm9837_vm1, %v6010_v43  ;;  %vm9845_vm1 = vmmov %vm9798_vm0 }
 0xa74   :  { %7016 = vmatprep.mubr.msk.f32.mxu1 %vm9838_vm6, %v6011_v37  ;;  %vm9847_vm6 = vmmov %vm9798_vm0 }
 0xa76   :  { %3703 = vperm.xlu0 %7754, %v6059_v40   ;;  %3698 = vperm.xlu1 %7755, %v6058_v47  }
 0xa77   :  { %7017 = vmatmul.mubr.msk.f32.gmra.mrb[34].mxu1 %vm9839_vm14, %v6012_v48  ;;  %vm9848_vm14 = vmmov %vm9798_vm0 }
 0xa78   :  { %7027 = vmatprep.mubr.msk.f32.mxu1 %vm9840_vm15, %v5997_v35  ;;  %vm9849_vm15 = vmmov %vm9798_vm0 }
 0xa7a   :  { %3708 = vperm.xlu1 %7755, %v6060_v39  }
 0xad4   :  { %v7858_v44 = vpop.permute.xlu0 %7857 }
 0xad5   :  { %v7860_v46 = vunpack.i.h.bf16 %v7858_v44  ;;  %v7859_v49 = vunpack.i.l.bf16 %v7858_v44 }
 0xad7   :  { %v7464_v50 = vpack.c.bf16 %v7860_v46, %v7859_v49 }
 0xad8   :  { %v7868_v51 = vpop.permute.xlu0 %7867  ;;  %v7863_v52 = vpop.permute.xlu1 %7862 }
 0xad9   :  { %v7870_v55 = vunpack.i.h.bf16 %v7868_v51  ;;  %v7869_v56 = vunpack.i.l.bf16 %v7868_v51  ;;  %v7865_v57 = vunpack.i.h.bf16 %v7863_v52  ;;  %v7864_v58 = vunpack.i.l.bf16 %v7863_v52  ;;  %7466 = vmatprep.subr.msk.bf16.mxu1 %vm8449_vm4, %v7464_v50 }
 0xada   :  { %7469 = vmatpush3.bf16.msk.msra.mxu1 %vm8449_vm4, %v7464_v50 }
 0xadb   :  { %v7470_v59 = vpack.c.bf16 %v7865_v57, %v7864_v58  ;;  %v7476_v45 = vpack.c.bf16 %v7870_v55, %v7869_v56 }
 0xadc   :  { %v7873_v41 = vpop.permute.xlu1 %7872 }
 0xadd   :  { %v7875_v60 = vunpack.i.h.bf16 %v7873_v41  ;;  %v7874_v53 = vunpack.i.l.bf16 %v7873_v41  ;;  %7472 = vmatprep.subr.msk.bf16.mxu1 %vm8449_vm4, %v7470_v59 }
 0xade   :  { %7475 = vmatpush3.bf16.msk.msra.mxu1 %vm8449_vm4, %v7470_v59  ;;  %vm9842_vm4 = vmmov %vm9798_vm0 }
 0xadf   :  { %7478 = vmatprep.subr.msk.bf16.mxu1 %vm8460_vm10, %v7476_v45  ;;  %v7482_v62 = vpack.c.bf16 %v7875_v60, %v7874_v53 }
 0xae1   :  { %7028 = vmatmul.mubr.msk.f32.vlgmr.msra.gmra.mrb[28].mxu1 %vm9798_vm0, %v5998_v54 }
 0xae2   :  { %7481 = vmatpush3.bf16.msk.msra.mxu1 %vm8460_vm10, %v7476_v45  ;;  %7030 = vmatprep.mubr.msk.f32.mxu1 %vm9841_vm5, %v5999_v61  ;;  %vm9850_vm5 = vmmov %vm9798_vm0 }
 0xae3   :  { %7484 = vmatprep.subr.msk.bf16.mxu1 %vm8460_vm10, %v7482_v62 }
 0xae5   :  { %7031 = vmatmul.mubr.msk.f32.gmra.mrb[30].mxu1 %vm9842_vm4, %v6000_v7  ;;  %vm9851_vm4 = vmmov %vm9798_vm0 }
 0xae6   :  { %7487 = vmatpush3.bf16.msk.msra.mxu1 %vm8460_vm10, %v7482_v62  ;;  %7033 = vmatprep.mubr.msk.f32.mxu1 %vm9843_vm9, %v6001_v63  ;;  %vm9846_vm10 = vmmov %vm9798_vm0 }
 0xae7   :  { %vm9852_vm9 = vmmov %vm9798_vm0 }
 0xae9   :  { %7034 = vmatmul.mubr.msk.f32.gmra.mrb[32].mxu1 %vm9844_vm2, %v6002_v1  ;;  %vm9853_vm2 = vmmov %vm9798_vm0  ;;  %v3674_v26 = vpop.permute.xlu0 %3673 }
 0xaea   :  { %7036 = vmatprep.mubr.msk.f32.mxu1 %vm9845_vm1, %v6003_v2  ;;  %vm9854_vm1 = vmmov %vm9798_vm0 }
 0xaeb   :  { %7067 = vmatprep.mubr.msk.f32.mxu0 %vm9854_vm1, %v6073_v24  ;;  %vm9863_vm1 = vmmov %vm9798_vm0 }
 0xaed   :  { %7037 = vmatmul.mubr.msk.f32.gmra.mrb[34].mxu1 %vm9846_vm10, %v6004_v3  ;;  %v3679_v25 = vpop.permute.xlu1 %3678  ;;  %v3684_v33 = vpop.permute.xlu0 %3683  ;;  %vm9855_vm10 = vmmov %vm9798_vm0 }
 0xaee   :  { %7047 = vmatprep.mubr.msk.f32.mxu1 %vm9847_vm6, %v6033_v18  ;;  %vm9856_vm6 = vmmov %vm9798_vm0 }
 0xaf1   :  { %7048 = vmatmul.mubr.msk.f32.vlgmr.msra.gmra.mrb[28].mxu1 %vm9848_vm14, %v6034_v6  ;;  %v3689_v30 = vpop.permute.xlu1 %3688  ;;  %v3694_v55 = vpop.permute.xlu0 %3693  ;;  %vm9857_vm14 = vmmov %vm9798_vm0 }
 0xaf2   :  { %7050 = vmatprep.mubr.msk.f32.mxu1 %vm9849_vm15, %v6035_v9  ;;  %vm9858_vm15 = vmmov %vm9798_vm0 }
 0xaf5   :  { %7051 = vmatmul.mubr.msk.f32.gmra.mrb[30].mxu1 %vm9798_vm0, %v6036_v11  ;;  %v3699_v51 = vpop.permute.xlu1 %3698  ;;  %v3704_v41 = vpop.permute.xlu0 %3703 }
 0xaf6   :  { %7053 = vmatprep.mubr.msk.f32.mxu1 %vm9850_vm5, %v6037_v12  ;;  %vm9859_vm5 = vmmov %vm9798_vm0 }
 0xaf9   :  { %7054 = vmatmul.mubr.msk.f32.gmra.mrb[32].mxu1 %vm9851_vm4, %v6038_v15  ;;  %v3709_v59 = vpop.permute.xlu1 %3708  ;;  %vm9860_vm4 = vmmov %vm9798_vm0 }
 0xafa   :  { %7056 = vmatprep.mubr.msk.f32.mxu1 %vm9852_vm9, %v6039_v16  ;;  %vm9861_vm9 = vmmov %vm9798_vm0 }
 0xafd   :  { %7057 = vmatmul.mubr.msk.f32.gmra.mrb[34].mxu1 %vm9853_vm2, %v6040_v22  ;;  %vm9862_vm2 = vmmov %vm9798_vm0 }
 0xbc4   :  { %v7049_v4 = vpop.f32.mrb[28].mxu1 }
 0xbc5   :  { %v3712_v8 = vadd.f32 %v7049_v4, %v3679_v25  ;;  %v3615_v29 = vpop.f32.mrb[29].mxu1 }
 0xbc6   :  { %v3711_v20 = vadd.f32 %v3674_v26, %v3615_v29 }
 0xbc7   :  { %v6062_v21 = vmul.f32 -1.442695, %v3712_v8 }
 0xbc8   :  { %v6061_v31 = vmul.f32 -1.442695, %v3711_v20  ;;  %v7052_v32 = vpop.f32.mrb[30].mxu1 }
 0xbc9   :  { %8016 = vpow2.f32 %v6062_v21  ;;  %v3714_v34 = vadd.f32 %v7052_v32, %v3689_v30  ;;  %v3625_v36 = vpop.f32.mrb[31].mxu1  ;;  %v6074_v30 = vld [vmem:[%s9772_s4 + $0x4c8] sm:$0xff]  ;;  %v6123_v32 = vld [vmem:[%s9773_s5 + $0x190] sm:$0xff] }
 0xbca   :  { %8018 = vpow2.f32 %v6061_v31  ;;  %v3713_v38 = vadd.f32 %v3684_v33, %v3625_v36  ;;  %v6075_v31 = vld [vmem:[%s9772_s4 + $0x4d0] sm:$0xff]  ;;  %v6122_v33 = vld [vmem:[%s9773_s5 + $0x188] sm:$0xff]  ;;  %v6077_v36 = vld [vmem:[%s9772_s4 + $0x4e0] sm:$0xff] }
 0xbcb   :  { %v6064_v42 = vmul.f32 -1.442695, %v3714_v34  ;;  %v6076_v34 = vld [vmem:[%s9772_s4 + $0x4d8] sm:$0xff] }
 0xbcc   :  { %v6063_v43 = vmul.f32 -1.442695, %v3713_v38  ;;  %v7055_v37 = vpop.f32.mrb[32].mxu1  ;;  %v6125_v38 = vld [vmem:[%s9773_s5 + $0x1a0] sm:$0xff] }
 0xbcd   :  { %8020 = vpow2.f32 %v6064_v42  ;;  %v3635_v40 = vpop.f32.mrb[33].mxu1  ;;  %v3716_v57 = vadd.f32 %v7055_v37, %v3699_v51  ;;  %v6124_v42 = vld [vmem:[%s9773_s5 + $0x198] sm:$0xff]  ;;  %v6079_v37 = vld [vmem:[%s9772_s4 + $0x4f0] sm:$0xff] }
 0xbce   :  { %8022 = vpow2.f32 %v6063_v43  ;;  %v3715_v58 = vadd.f32 %v3694_v55, %v3635_v40  ;;  %v6078_v43 = vld [vmem:[%s9772_s4 + $0x4e8] sm:$0xff]  ;;  %v6127_v40 = vld [vmem:[%s9773_s5 + $0x1b0] sm:$0xff] }
 0xbcf   :  { %v3744_v45 = vmax.f32 %v3716_v57, 0.0 }
 0xbd0   :  { %v7058_v47 = vpop.f32.mrb[34].mxu1  ;;  %v3743_v54 = vmax.f32 %v3715_v58, 0.0 }
 0xbd1   :  { %v3645_v48 = vpop.f32.mrb[35].mxu1  ;;  %v3718_v60 = vadd.f32 %v7058_v47, %v3709_v59  ;;  %v6126_v47 = vld [vmem:[%s9773_s5 + $0x1a8] sm:$0xff] }
 0xbd2   :  { %v3717_v61 = vadd.f32 %v3704_v41, %v3645_v48  ;;  %v6080_v48 = vld [vmem:[%s9772_s4 + $0x4f8] sm:$0xff] }
 0xbd3   :  { %v8017_v35 = vpop.eup %8016  ;;  %v3746_v18 = vmax.f32 %v3718_v60, 0.0 }
 0xbd4   :  { %v8019_v39 = vpop.eup %8018  ;;  %v3732_v44 = vadd.f32 1.0, %v8017_v35  ;;  %v3745_v11 = vmax.f32 %v3717_v61, 0.0  ;;  %v6065_v35 = vld [vmem:[%s9772_s4 + $0x480] sm:$0xff]  ;;  %v6067_v61 = vld [vmem:[%s9772_s4 + $0x490] sm:$0xff] }
 0xbd5   :  { %v3731_v46 = vadd.f32 1.0, %v8019_v39  ;;  %v6128_v39 = vld [vmem:[%s9773_s5 + $0x1b8] sm:$0xff] }
 0xbd6   :  { %8024 = vrcp.f32 %v3732_v44 }
 0xbd7   :  { %v8021_v49 = vpop.eup %8020  ;;  %8026 = vrcp.f32 %v3731_v46 }
 0xbd8   :  { %v8023_v50 = vpop.eup %8022  ;;  %v3734_v52 = vadd.f32 1.0, %v8021_v49 }
 0xbd9   :  { %v3733_v56 = vadd.f32 1.0, %v8023_v50 }
 0xbda   :  { %8028 = vrcp.f32 %v3734_v52 }
 0xbdb   :  { %8030 = vrcp.f32 %v3733_v56 }
 0xbe0   :  { %v8025_v53 = vpop.eup %8024 }
 0xbe1   :  { %v8027_v62 = vpop.eup %8026  ;;  %v3748_v7 = vmul.f32 %v8025_v53, %v3744_v45  ;;  %v3752_v63 = vsub.f32 1.0, %v8025_v53 }
 0xbe2   :  { %v3747_v1 = vmul.f32 %v8027_v62, %v3743_v54  ;;  %v3751_v2 = vsub.f32 1.0, %v8027_v62  ;;  %v6066_v54 = vld [vmem:[%s9772_s4 + $0x488] sm:$0xff] }
 0xbe3   :  { %v3756_v3 = vmul.f32 %v3752_v63, %v9082_v13  ;;  %v6070_v63 = vld [vmem:[%s9772_s4 + $0x4a8] sm:$0xff] }
 0xbe4   :  { %v8029_v6 = vpop.eup %8028  ;;  %v3755_v9 = vmul.f32 %v3751_v2, %v9084_v19  ;;  %v6072_v2 = vld [vmem:[%s9772_s4 + $0x4b8] sm:$0xff] }
 0xbe5   :  { %v8031_v12 = vpop.eup %8030  ;;  %v9242_v15 = vadd.f32 %v3756_v3, %v3748_v7  ;;  %v3750_v16 = vmul.f32 %v8029_v6, %v3746_v18  ;;  %v3754_v22 = vsub.f32 1.0, %v8029_v6  ;;  %v6069_v7 = vld [vmem:[%s9772_s4 + $0x4a0] sm:$0xff]  ;;  %v6102_v3 = vld [vmem:[%s9772_s4 + $0x508] sm:$0xff]  ;;  %v6103_v18 = vld [vmem:[%s9772_s4 + $0x510] sm:$0xff] }
 0xbe6   :  { %v9244_v24 = vadd.f32 %v3755_v9, %v3747_v1  ;;  %v3749_v25 = vmul.f32 %v8031_v12, %v3745_v11  ;;  %v3753_v26 = vsub.f32 1.0, %v8031_v12  ;;  %v6071_v1 = vld [vmem:[%s9772_s4 + $0x4b0] sm:$0xff]  ;;  %v6104_v6 = vld [vmem:[%s9772_s4 + $0x518] sm:$0xff]  ;;  %v6105_v9 = vld [vmem:[%s9772_s4 + $0x520] sm:$0xff] }
 0xbe7   :  { %v3758_v4 = vmul.f32 %v3754_v22, %v9092_v10  ;;  %v6106_v11 = vld [vmem:[%s9772_s4 + $0x528] sm:$0xff]  ;;  %v6107_v12 = vld [vmem:[%s9772_s4 + $0x530] sm:$0xff]  ;;  %v6141_v22 = vld [vmem:[%s9772_s4 + $0x580] sm:$0xff] }
 0xbe8   :  { %v3757_v8 = vmul.f32 %v3753_v26, %v9094_v28  ;;  %v7876_v13 = vpack.i.bf16 %v9242_v15, %v9244_v24  ;;  %v7488_v19 = vpack.c.bf16 %v9242_v15, %v9244_v24  ;;  %v6121_v28 = vld [vmem:[%s9773_s5 + $0x180] sm:$0xff] }
 0xbe9   :  { %v9252_v29 = vadd.f32 %v3758_v4, %v3750_v16  ;;  %v6108_v16 = vld [vmem:[%s9772_s4 + $0x538] sm:$0xff] }
 0xbea   :  { %v9254_v20 = vadd.f32 %v3757_v8, %v3749_v25  ;;  %7877 = vrot.lane.b32.xlu0 %v7876_v13, %s8086_s14  ;;  %7489 = vmatprep.subr.bf16.mxu0 %v7488_v19 }
 0xbeb   :  { %7491 = vmatpush3.bf16.msra.mxu0 %v7488_v19 }
 0xbec   :  { %v7881_v21 = vpack.i.bf16 %v9252_v29, %v9254_v20  ;;  %v7492_v10 = vpack.c.bf16 %v9252_v29, %v9254_v20 }
 0xbee   :  { %7887 = vrot.lane.b32.xlu0 %v7876_v13, %s8087_s15  ;;  %7882 = vrot.lane.b32.xlu1 %v7881_v21, %s8086_s14 }
 0xbef   :  { %7493 = vmatprep.subr.bf16.mxu0 %v7492_v10 }
 0xbf0   :  { %7495 = vmatpush3.bf16.msra.mxu0 %v7492_v10 }
 0xbf2   :  { %4220 = vperm.xlu0 %7754, %v6121_v28   ;;  %7892 = vrot.lane.b32.xlu1 %v7881_v21, %s8087_s15 }
 0xbf3   :  { %7068 = vmatmul.mubr.msk.f32.vlgmr.msra.gmra.mrb[24].mxu0 %vm9855_vm10, %v6074_v30  ;;  %vm9865_vm10 = vmmov %vm9798_vm0 }
 0xbf4   :  { %7070 = vmatprep.mubr.msk.f32.mxu0 %vm9856_vm6, %v6075_v31  ;;  %vm9866_vm6 = vmmov %vm9798_vm0 }
 0xbf6   :  { %4230 = vperm.xlu0 %7754, %v6123_v32   ;;  %4225 = vperm.xlu1 %7755, %v6122_v33  }
 0xbf7   :  { %7071 = vmatmul.mubr.msk.f32.gmra.mrb[26].mxu0 %vm9857_vm14, %v6076_v34  ;;  %vm9867_vm14 = vmmov %vm9798_vm0 }
 0xbf8   :  { %7073 = vmatprep.mubr.msk.f32.mxu0 %vm9858_vm15, %v6077_v36  ;;  %vm9869_vm15 = vmmov %vm9798_vm0 }
 0xbfa   :  { %4240 = vperm.xlu0 %7754, %v6125_v38   ;;  %4235 = vperm.xlu1 %7755, %v6124_v42  }
 0xbfb   :  { %7074 = vmatmul.mubr.msk.f32.gmra.mrb[28].mxu0 %vm9798_vm0, %v6078_v43 }
 0xbfc   :  { %7076 = vmatprep.mubr.msk.f32.mxu0 %vm9859_vm5, %v6079_v37  ;;  %vm9870_vm5 = vmmov %vm9798_vm0 }
 0xbfe   :  { %4250 = vperm.xlu0 %7754, %v6127_v40   ;;  %4245 = vperm.xlu1 %7755, %v6126_v47  }
 0xbff   :  { %7077 = vmatmul.mubr.msk.f32.gmra.mrb[30].mxu0 %vm9860_vm4, %v6080_v48  ;;  %vm9871_vm4 = vmmov %vm9798_vm0 }
 0xc00   :  { %7087 = vmatprep.mubr.msk.f32.mxu0 %vm9861_vm9, %v6065_v35  ;;  %vm9872_vm9 = vmmov %vm9798_vm0 }
 0xc02   :  { %4255 = vperm.xlu1 %7755, %v6128_v39  }
 0xc5c   :  { %v7878_v44 = vpop.permute.xlu0 %7877 }
 0xc5d   :  { %v7880_v46 = vunpack.i.h.bf16 %v7878_v44  ;;  %v7879_v49 = vunpack.i.l.bf16 %v7878_v44 }
 0xc5f   :  { %v7496_v50 = vpack.c.bf16 %v7880_v46, %v7879_v49 }
 0xc60   :  { %v7888_v51 = vpop.permute.xlu0 %7887  ;;  %v7883_v52 = vpop.permute.xlu1 %7882 }
 0xc61   :  { %v7890_v55 = vunpack.i.h.bf16 %v7888_v51  ;;  %v7889_v56 = vunpack.i.l.bf16 %v7888_v51  ;;  %v7885_v57 = vunpack.i.h.bf16 %v7883_v52  ;;  %v7884_v58 = vunpack.i.l.bf16 %v7883_v52  ;;  %7498 = vmatprep.subr.msk.bf16.mxu0 %vm8625_vm3, %v7496_v50 }
 0xc62   :  { %7501 = vmatpush3.bf16.msk.msra.mxu0 %vm8625_vm3, %v7496_v50 }
 0xc63   :  { %v7502_v59 = vpack.c.bf16 %v7885_v57, %v7884_v58  ;;  %v7508_v45 = vpack.c.bf16 %v7890_v55, %v7889_v56 }
 0xc64   :  { %v7893_v41 = vpop.permute.xlu1 %7892 }
 0xc65   :  { %v7895_v60 = vunpack.i.h.bf16 %v7893_v41  ;;  %v7894_v53 = vunpack.i.l.bf16 %v7893_v41  ;;  %7504 = vmatprep.subr.msk.bf16.mxu0 %vm8625_vm3, %v7502_v59 }
 0xc66   :  { %7507 = vmatpush3.bf16.msk.msra.mxu0 %vm8625_vm3, %v7502_v59  ;;  %vm9864_vm3 = vmmov %vm9798_vm0 }
 0xc67   :  { %7510 = vmatprep.subr.msk.bf16.mxu0 %vm8636_vm11, %v7508_v45  ;;  %v7514_v62 = vpack.c.bf16 %v7895_v60, %v7894_v53 }
 0xc69   :  { %7088 = vmatmul.mubr.msk.f32.vlgmr.msra.gmra.mrb[24].mxu0 %vm9862_vm2, %v6066_v54  ;;  %vm9873_vm2 = vmmov %vm9798_vm0 }
 0xc6a   :  { %7513 = vmatpush3.bf16.msk.msra.mxu0 %vm8636_vm11, %v7508_v45  ;;  %7090 = vmatprep.mubr.msk.f32.mxu0 %vm9863_vm1, %v6067_v61  ;;  %vm9874_vm1 = vmmov %vm9798_vm0 }
 0xc6b   :  { %7516 = vmatprep.subr.msk.bf16.mxu0 %vm8636_vm11, %v7514_v62 }
 0xc6d   :  { %7091 = vmatmul.mubr.msk.f32.gmra.mrb[26].mxu0 %vm9864_vm3, %v6068_v5  ;;  %vm9875_vm3 = vmmov %vm9798_vm0 }
 0xc6e   :  { %7519 = vmatpush3.bf16.msk.msra.mxu0 %vm8636_vm11, %v7514_v62  ;;  %7093 = vmatprep.mubr.msk.f32.mxu0 %vm9865_vm10, %v6069_v7  ;;  %vm9868_vm11 = vmmov %vm9798_vm0 }
 0xc6f   :  { %vm9876_vm10 = vmmov %vm9798_vm0 }
 0xc70   :  { %7127 = vmatprep.mubr.msk.f32.mxu1 %vm9876_vm10, %v6141_v22  ;;  %vm9888_vm10 = vmmov %vm9798_vm0 }
 0xc71   :  { %7094 = vmatmul.mubr.msk.f32.gmra.mrb[28].mxu0 %vm9866_vm6, %v6070_v63  ;;  %v4221_v26 = vpop.permute.xlu0 %4220  ;;  %vm9877_vm6 = vmmov %vm9798_vm0 }
 0xc72   :  { %7096 = vmatprep.mubr.msk.f32.mxu0 %vm9867_vm14, %v6071_v1  ;;  %vm9878_vm14 = vmmov %vm9798_vm0 }
 0xc75   :  { %7097 = vmatmul.mubr.msk.f32.gmra.mrb[30].mxu0 %vm9868_vm11, %v6072_v2  ;;  %v4226_v25 = vpop.permute.xlu1 %4225  ;;  %v4231_v31 = vpop.permute.xlu0 %4230  ;;  %vm9879_vm11 = vmmov %vm9798_vm0 }
 0xc76   :  { %7107 = vmatprep.mubr.msk.f32.mxu0 %vm9869_vm15, %v6101_v17  ;;  %vm9880_vm15 = vmmov %vm9798_vm0 }
 0xc79   :  { %7108 = vmatmul.mubr.msk.f32.vlgmr.msra.gmra.mrb[24].mxu0 %vm9798_vm0, %v6102_v3  ;;  %v4236_v10 = vpop.permute.xlu1 %4235  ;;  %v4241_v51 = vpop.permute.xlu0 %4240 }
 0xc7a   :  { %7110 = vmatprep.mubr.msk.f32.mxu0 %vm9870_vm5, %v6103_v18  ;;  %vm9881_vm5 = vmmov %vm9798_vm0 }
 0xc7d   :  { %7111 = vmatmul.mubr.msk.f32.gmra.mrb[26].mxu0 %vm9871_vm4, %v6104_v6  ;;  %v4246_v49 = vpop.permute.xlu1 %4245  ;;  %v4251_v58 = vpop.permute.xlu0 %4250  ;;  %vm9882_vm4 = vmmov %vm9798_vm0 }
 0xc7e   :  { %7113 = vmatprep.mubr.msk.f32.mxu0 %vm9872_vm9, %v6105_v9  ;;  %vm9883_vm9 = vmmov %vm9798_vm0 }
 0xc81   :  { %7114 = vmatmul.mubr.msk.f32.gmra.mrb[28].mxu0 %vm9873_vm2, %v6106_v11  ;;  %v4256_v57 = vpop.permute.xlu1 %4255  ;;  %vm9884_vm2 = vmmov %vm9798_vm0 }
 0xc82   :  { %7116 = vmatprep.mubr.msk.f32.mxu0 %vm9874_vm1, %v6107_v12  ;;  %vm9885_vm1 = vmmov %vm9798_vm0 }
 0xc85   :  { %7117 = vmatmul.mubr.msk.f32.gmra.mrb[30].mxu0 %vm9875_vm3, %v6108_v16  ;;  %vm9887_vm3 = vmmov %vm9798_vm0 }
 0xd4c   :  { %v7109_v4 = vpop.f32.mrb[24].mxu0 }
 0xd4d   :  { %v4259_v8 = vadd.f32 %v7109_v4, %v4226_v25  ;;  %v4162_v13 = vpop.f32.mrb[25].mxu0 }
 0xd4e   :  { %v4258_v19 = vadd.f32 %v4221_v26, %v4162_v13 }
 0xd4f   :  { %v6130_v21 = vmul.f32 -1.442695, %v4259_v8 }
 0xd50   :  { %v6129_v28 = vmul.f32 -1.442695, %v4258_v19  ;;  %v7112_v30 = vpop.f32.mrb[26].mxu0  ;;  %v6142_v19 = vld [vmem:[%s9772_s4 + $0x588] sm:$0xff] }
 0xd51   :  { %8032 = vpow2.f32 %v6130_v21  ;;  %v4261_v32 = vadd.f32 %v7112_v30, %v4236_v10  ;;  %v4172_v33 = vpop.f32.mrb[27].mxu0  ;;  %v6143_v21 = vld [vmem:[%s9772_s4 + $0x590] sm:$0xff]  ;;  %v6144_v30 = vld [vmem:[%s9772_s4 + $0x598] sm:$0xff] }
 0xd52   :  { %8034 = vpow2.f32 %v6129_v28  ;;  %v4260_v34 = vadd.f32 %v4231_v31, %v4172_v33  ;;  %v6191_v10 = vld [vmem:[%s9773_s5 + $0x1d0] sm:$0xff]  ;;  %v6190_v28 = vld [vmem:[%s9773_s5 + $0x1c8] sm:$0xff]  ;;  %v6145_v31 = vld [vmem:[%s9772_s4 + $0x5a0] sm:$0xff] }
 0xd53   :  { %v6132_v36 = vmul.f32 -1.442695, %v4261_v32  ;;  %v6193_v32 = vld [vmem:[%s9773_s5 + $0x1e0] sm:$0xff]  ;;  %v6192_v33 = vld [vmem:[%s9773_s5 + $0x1d8] sm:$0xff] }
 0xd54   :  { %v6131_v38 = vmul.f32 -1.442695, %v4260_v34  ;;  %v7115_v42 = vpop.f32.mrb[28].mxu0  ;;  %v6146_v34 = vld [vmem:[%s9772_s4 + $0x5a8] sm:$0xff] }
 0xd55   :  { %8036 = vpow2.f32 %v6132_v36  ;;  %v4182_v43 = vpop.f32.mrb[29].mxu0  ;;  %v4263_v55 = vadd.f32 %v7115_v42, %v4246_v49  ;;  %v6147_v36 = vld [vmem:[%s9772_s4 + $0x5b0] sm:$0xff]  ;;  %v6194_v42 = vld [vmem:[%s9773_s5 + $0x1e8] sm:$0xff] }
 0xd56   :  { %8038 = vpow2.f32 %v6131_v38  ;;  %v4262_v56 = vadd.f32 %v4241_v51, %v4182_v43  ;;  %v6195_v38 = vld [vmem:[%s9773_s5 + $0x1f0] sm:$0xff]  ;;  %v6148_v43 = vld [vmem:[%s9772_s4 + $0x5b8] sm:$0xff] }
 0xd57   :  { %v4291_v59 = vmax.f32 %v4263_v55, 0.0 }
 0xd58   :  { %v7118_v37 = vpop.f32.mrb[30].mxu0  ;;  %v4290_v60 = vmax.f32 %v4262_v56, 0.0 }
 0xd59   :  { %v4192_v40 = vpop.f32.mrb[31].mxu0  ;;  %v4265_v41 = vadd.f32 %v7118_v37, %v4256_v57  ;;  %v6133_v37 = vld [vmem:[%s9772_s4 + $0x540] sm:$0xff] }
 0xd5a   :  { %v4264_v53 = vadd.f32 %v4251_v58, %v4192_v40  ;;  %v6196_v40 = vld [vmem:[%s9773_s5 + $0x1f8] sm:$0xff] }
 0xd5b   :  { %v8033_v47 = vpop.eup %8032  ;;  %v4293_v1 = vmax.f32 %v4265_v41, 0.0  ;;  %v6134_v41 = vld [vmem:[%s9772_s4 + $0x548] sm:$0xff] }
 0xd5c   :  { %v8035_v48 = vpop.eup %8034  ;;  %v4279_v35 = vadd.f32 1.0, %v8033_v47  ;;  %v4292_v3 = vmax.f32 %v4264_v53, 0.0  ;;  %v6137_v53 = vld [vmem:[%s9772_s4 + $0x560] sm:$0xff] }
 0xd5d   :  { %v4278_v39 = vadd.f32 1.0, %v8035_v48 }
 0xd5e   :  { %8040 = vrcp.f32 %v4279_v35 }
 0xd5f   :  { %v8037_v44 = vpop.eup %8036  ;;  %8042 = vrcp.f32 %v4278_v39 }
 0xd60   :  { %v8039_v46 = vpop.eup %8038  ;;  %v4281_v50 = vadd.f32 1.0, %v8037_v44 }
 0xd61   :  { %v4280_v52 = vadd.f32 1.0, %v8039_v46 }
 0xd62   :  { %8044 = vrcp.f32 %v4281_v50 }
 0xd63   :  { %8046 = vrcp.f32 %v4280_v52 }
 0xd68   :  { %v8041_v45 = vpop.eup %8040 }
 0xd69   :  { %v8043_v54 = vpop.eup %8042  ;;  %v4295_v61 = vmul.f32 %v8041_v45, %v4291_v59  ;;  %v4299_v62 = vsub.f32 1.0, %v8041_v45  ;;  %v6135_v45 = vld [vmem:[%s9772_s4 + $0x550] sm:$0xff] }
 0xd6a   :  { %v4294_v5 = vmul.f32 %v8043_v54, %v4290_v60  ;;  %v4298_v7 = vsub.f32 1.0, %v8043_v54  ;;  %v6138_v54 = vld [vmem:[%s9772_s4 + $0x568] sm:$0xff] }
 0xd6b   :  { %v4303_v63 = vmul.f32 %v4299_v62, %v9242_v15  ;;  %v6140_v62 = vld [vmem:[%s9772_s4 + $0x578] sm:$0xff] }
 0xd6c   :  { %v8045_v2 = vpop.eup %8044  ;;  %v4302_v17 = vmul.f32 %v4298_v7, %v9244_v24  ;;  %v6171_v7 = vld [vmem:[%s9772_s4 + $0x5d0] sm:$0xff] }
 0xd6d   :  { %v8047_v18 = vpop.eup %8046  ;;  %v9402_v6 = vadd.f32 %v4303_v63, %v4295_v61  ;;  %v4297_v9 = vmul.f32 %v8045_v2, %v4293_v1  ;;  %v4301_v11 = vsub.f32 1.0, %v8045_v2  ;;  %v6139_v61 = vld [vmem:[%s9772_s4 + $0x570] sm:$0xff]  ;;  %v6172_v63 = vld [vmem:[%s9772_s4 + $0x5d8] sm:$0xff]  ;;  %v6173_v1 = vld [vmem:[%s9772_s4 + $0x5e0] sm:$0xff] }
 0xd6e   :  { %v9404_v12 = vadd.f32 %v4302_v17, %v4294_v5  ;;  %v4296_v16 = vmul.f32 %v8047_v18, %v4292_v3  ;;  %v4300_v22 = vsub.f32 1.0, %v8047_v18  ;;  %v6170_v5 = vld [vmem:[%s9772_s4 + $0x5c8] sm:$0xff]  ;;  %v6175_v17 = vld [vmem:[%s9772_s4 + $0x5f0] sm:$0xff]  ;;  %v6176_v3 = vld [vmem:[%s9772_s4 + $0x5f8] sm:$0xff] }
 0xd6f   :  { %v4305_v25 = vmul.f32 %v4301_v11, %v9252_v29  ;;  %v6174_v2 = vld [vmem:[%s9772_s4 + $0x5e8] sm:$0xff]  ;;  %v6209_v18 = vld [vmem:[%s9772_s4 + $0x640] sm:$0xff] }
 0xd70   :  { %v4304_v26 = vmul.f32 %v4300_v22, %v9254_v20  ;;  %v7896_v15 = vpack.i.bf16 %v9402_v6, %v9404_v12  ;;  %v7520_v24 = vpack.c.bf16 %v9402_v6, %v9404_v12  ;;  %v6189_v20 = vld [vmem:[%s9773_s5 + $0x1c0] sm:$0xff] }
 0xd71   :  { %v9412_v4 = vadd.f32 %v4305_v25, %v4297_v9 }
 0xd72   :  { %v9414_v8 = vadd.f32 %v4304_v26, %v4296_v16  ;;  %7897 = vrot.lane.b32.xlu0 %v7896_v15, %s8088_s25  ;;  %7521 = vmatprep.subr.bf16.mxu1 %v7520_v24 }
 0xd73   :  { %7523 = vmatpush3.bf16.msra.mxu1 %v7520_v24 }
 0xd74   :  { %v7901_v13 = vpack.i.bf16 %v9412_v4, %v9414_v8  ;;  %v7524_v29 = vpack.c.bf16 %v9412_v4, %v9414_v8 }
 0xd76   :  { %7907 = vrot.lane.b32.xlu0 %v7896_v15, %s8089_s26  ;;  %7902 = vrot.lane.b32.xlu1 %v7901_v13, %s8088_s25 }
 0xd77   :  { %7525 = vmatprep.subr.bf16.mxu1 %v7524_v29 }
 0xd78   :  { %7527 = vmatpush3.bf16.msra.mxu1 %v7524_v29 }
 0xd7a   :  { %4767 = vperm.xlu0 %7754, %v6189_v20   ;;  %7912 = vrot.lane.b32.xlu1 %v7901_v13, %s8089_s26 }
 0xd7b   :  { %7128 = vmatmul.mubr.msk.f32.vlgmr.msra.gmra.mrb[36].mxu1 %vm9877_vm6, %v6142_v19  ;;  %vm9889_vm6 = vmmov %vm9798_vm0 }
 0xd7c   :  { %7130 = vmatprep.mubr.msk.f32.mxu1 %vm9878_vm14, %v6143_v21  ;;  %vm9891_vm14 = vmmov %vm9798_vm0 }
 0xd7e   :  { %4777 = vperm.xlu0 %7754, %v6191_v10   ;;  %4772 = vperm.xlu1 %7755, %v6190_v28  }
 0xd7f   :  { %7131 = vmatmul.mubr.msk.f32.gmra.mrb[38].mxu1 %vm9879_vm11, %v6144_v30  ;;  %vm9892_vm11 = vmmov %vm9798_vm0 }
 0xd80   :  { %7133 = vmatprep.mubr.msk.f32.mxu1 %vm9880_vm15, %v6145_v31  ;;  %vm9893_vm15 = vmmov %vm9798_vm0 }
 0xd82   :  { %4787 = vperm.xlu0 %7754, %v6193_v32   ;;  %4782 = vperm.xlu1 %7755, %v6192_v33  }
 0xd83   :  { %7134 = vmatmul.mubr.msk.f32.gmra.mrb[40].mxu1 %vm9798_vm0, %v6146_v34 }
 0xd84   :  { %7136 = vmatprep.mubr.msk.f32.mxu1 %vm9881_vm5, %v6147_v36  ;;  %vm9894_vm5 = vmmov %vm9798_vm0 }
 0xd86   :  { %4797 = vperm.xlu0 %7754, %v6195_v38   ;;  %4792 = vperm.xlu1 %7755, %v6194_v42  }
 0xd87   :  { %7137 = vmatmul.mubr.msk.f32.gmra.mrb[42].mxu1 %vm9882_vm4, %v6148_v43  ;;  %vm9895_vm4 = vmmov %vm9798_vm0 }
 0xd88   :  { %7147 = vmatprep.mubr.msk.f32.mxu1 %vm9883_vm9, %v6133_v37  ;;  %vm9896_vm9 = vmmov %vm9798_vm0 }
 0xd8a   :  { %4802 = vperm.xlu1 %7755, %v6196_v40  }
 0xde4   :  { %v7898_v47 = vpop.permute.xlu0 %7897 }
 0xde5   :  { %v7900_v48 = vunpack.i.h.bf16 %v7898_v47  ;;  %v7899_v35 = vunpack.i.l.bf16 %v7898_v47 }
 0xde7   :  { %v7528_v39 = vpack.c.bf16 %v7900_v48, %v7899_v35 }
 0xde8   :  { %v7908_v44 = vpop.permute.xlu0 %7907  ;;  %v7903_v46 = vpop.permute.xlu1 %7902 }
 0xde9   :  { %v7910_v49 = vunpack.i.h.bf16 %v7908_v44  ;;  %v7909_v50 = vunpack.i.l.bf16 %v7908_v44  ;;  %v7905_v51 = vunpack.i.h.bf16 %v7903_v46  ;;  %v7904_v52 = vunpack.i.l.bf16 %v7903_v46  ;;  %7530 = vmatprep.subr.msk.bf16.mxu1 %vm8813_vm7, %v7528_v39 }
 0xdea   :  { %7533 = vmatpush3.bf16.msk.msra.mxu1 %vm8813_vm7, %v7528_v39 }
 0xdeb   :  { %v7534_v55 = vpack.c.bf16 %v7905_v51, %v7904_v52  ;;  %v7540_v57 = vpack.c.bf16 %v7910_v49, %v7909_v50 }
 0xdec   :  { %v7913_v56 = vpop.permute.xlu1 %7912 }
 0xded   :  { %v7915_v58 = vunpack.i.h.bf16 %v7913_v56  ;;  %v7914_v59 = vunpack.i.l.bf16 %v7913_v56  ;;  %7536 = vmatprep.subr.msk.bf16.mxu1 %vm8813_vm7, %v7534_v55 }
 0xdee   :  { %7539 = vmatpush3.bf16.msk.msra.mxu1 %vm8813_vm7, %v7534_v55  ;;  %vm9886_vm7 = vmmov %vm9798_vm0 }
 0xdef   :  { %7542 = vmatprep.subr.msk.bf16.mxu1 %vm8824_vm13, %v7540_v57  ;;  %v7546_v60 = vpack.c.bf16 %v7915_v58, %v7914_v59 }
 0xdf1   :  { %7148 = vmatmul.mubr.msk.f32.vlgmr.msra.gmra.mrb[36].mxu1 %vm9884_vm2, %v6134_v41  ;;  %vm9897_vm2 = vmmov %vm9798_vm0 }
 0xdf2   :  { %7545 = vmatpush3.bf16.msk.msra.mxu1 %vm8824_vm13, %v7540_v57  ;;  %7150 = vmatprep.mubr.msk.f32.mxu1 %vm9885_vm1, %v6135_v45  ;;  %vm9898_vm1 = vmmov %vm9798_vm0 }
 0xdf3   :  { %7548 = vmatprep.subr.msk.bf16.mxu1 %vm8824_vm13, %v7546_v60  ;;  %7187 = vmatprep.mubr.msk.f32.mxu0 %vm9898_vm1, %v6209_v18  ;;  %vm9913_vm1 = vmmov %vm9798_vm0 }
 0xdf5   :  { %7151 = vmatmul.mubr.msk.f32.gmra.mrb[38].mxu1 %vm9886_vm7, %v6136_v14  ;;  %vm9899_vm7 = vmmov %vm9798_vm0 }
 0xdf6   :  { %7551 = vmatpush3.bf16.msk.msra.mxu1 %vm8824_vm13, %v7546_v60  ;;  %7153 = vmatprep.mubr.msk.f32.mxu1 %vm9887_vm3, %v6137_v53  ;;  %vm9890_vm13 = vmmov %vm9798_vm0 }
 0xdf7   :  { %vm9900_vm3 = vmmov %vm9798_vm0 }
 0xdf9   :  { %7154 = vmatmul.mubr.msk.f32.gmra.mrb[40].mxu1 %vm9888_vm10, %v6138_v54  ;;  %v4768_v11 = vpop.permute.xlu0 %4767  ;;  %vm9901_vm10 = vmmov %vm9798_vm0 }
 0xdfa   :  { %7156 = vmatprep.mubr.msk.f32.mxu1 %vm9889_vm6, %v6139_v61  ;;  %vm9902_vm6 = vmmov %vm9798_vm0 }
 0xdfd   :  { %7157 = vmatmul.mubr.msk.f32.gmra.mrb[42].mxu1 %vm9890_vm13, %v6140_v62  ;;  %v4773_v9 = vpop.permute.xlu1 %4772  ;;  %v4778_v20 = vpop.permute.xlu0 %4777  ;;  %vm9903_vm13 = vmmov %vm9798_vm0 }
 0xdfe   :  { %7167 = vmatprep.mubr.msk.f32.mxu1 %vm9891_vm14, %v6169_v27  ;;  %vm9904_vm14 = vmmov %vm9798_vm0 }
 0xe01   :  { %7168 = vmatmul.mubr.msk.f32.vlgmr.msra.gmra.mrb[36].mxu1 %vm9892_vm11, %v6170_v5  ;;  %v4783_v24 = vpop.permute.xlu1 %4782  ;;  %v4788_v35 = vpop.permute.xlu0 %4787  ;;  %vm9905_vm11 = vmmov %vm9798_vm0 }
 0xe02   :  { %7170 = vmatprep.mubr.msk.f32.mxu1 %vm9893_vm15, %v6171_v7  ;;  %vm9906_vm15 = vmmov %vm9798_vm0 }
 0xe05   :  { %7171 = vmatmul.mubr.msk.f32.gmra.mrb[38].mxu1 %vm9798_vm0, %v6172_v63  ;;  %v4793_v47 = vpop.permute.xlu1 %4792  ;;  %v4798_v50 = vpop.permute.xlu0 %4797 }
 0xe06   :  { %7173 = vmatprep.mubr.msk.f32.mxu1 %vm9894_vm5, %v6173_v1  ;;  %vm9907_vm5 = vmmov %vm9798_vm0 }
 0xe09   :  { %7174 = vmatmul.mubr.msk.f32.gmra.mrb[40].mxu1 %vm9895_vm4, %v6174_v2  ;;  %v4803_v49 = vpop.permute.xlu1 %4802  ;;  %vm9909_vm4 = vmmov %vm9798_vm0 }
 0xe0a   :  { %7176 = vmatprep.mubr.msk.f32.mxu1 %vm9896_vm9, %v6175_v17  ;;  %vm9910_vm9 = vmmov %vm9798_vm0 }
 0xe0d   :  { %7177 = vmatmul.mubr.msk.f32.gmra.mrb[42].mxu1 %vm9897_vm2, %v6176_v3  ;;  %vm9911_vm2 = vmmov %vm9798_vm0 }
 0xed4   :  { %v7169_v16 = vpop.f32.mrb[36].mxu1 }
 0xed5   :  { %v4806_v22 = vadd.f32 %v7169_v16, %v4773_v9  ;;  %v4709_v25 = vpop.f32.mrb[37].mxu1 }
 0xed6   :  { %v4805_v26 = vadd.f32 %v4768_v11, %v4709_v25  ;;  %v6211_v25 = vld [vmem:[%s9772_s4 + $0x650] sm:$0xff] }
 0xed7   :  { %v6198_v15 = vmul.f32 -1.442695, %v4806_v22  ;;  %v6210_v22 = vld [vmem:[%s9772_s4 + $0x648] sm:$0xff] }
 0xed8   :  { %v6197_v13 = vmul.f32 -1.442695, %v4805_v26  ;;  %v7172_v29 = vpop.f32.mrb[38].mxu1  ;;  %v6259_v26 = vld [vmem:[%s9773_s5 + $0x210] sm:$0xff] }
 0xed9   :  { %8048 = vpow2.f32 %v6198_v15  ;;  %v4808_v19 = vadd.f32 %v7172_v29, %v4783_v24  ;;  %v4719_v21 = vpop.f32.mrb[39].mxu1  ;;  %v6258_v15 = vld [vmem:[%s9773_s5 + $0x208] sm:$0xff]  ;;  %v6212_v24 = vld [vmem:[%s9772_s4 + $0x658] sm:$0xff]  ;;  %v6261_v29 = vld [vmem:[%s9773_s5 + $0x220] sm:$0xff] }
 0xeda   :  { %8050 = vpow2.f32 %v6197_v13  ;;  %v4807_v10 = vadd.f32 %v4778_v20, %v4719_v21  ;;  %v6213_v13 = vld [vmem:[%s9772_s4 + $0x660] sm:$0xff]  ;;  %v6260_v20 = vld [vmem:[%s9773_s5 + $0x218] sm:$0xff]  ;;  %v6215_v21 = vld [vmem:[%s9772_s4 + $0x670] sm:$0xff] }
 0xedb   :  { %v6200_v28 = vmul.f32 -1.442695, %v4808_v19  ;;  %v6214_v19 = vld [vmem:[%s9772_s4 + $0x668] sm:$0xff] }
 0xedc   :  { %v6199_v30 = vmul.f32 -1.442695, %v4807_v10  ;;  %v7175_v31 = vpop.f32.mrb[40].mxu1  ;;  %v6263_v10 = vld [vmem:[%s9773_s5 + $0x230] sm:$0xff] }
 0xedd   :  { %8052 = vpow2.f32 %v6200_v28  ;;  %v4729_v32 = vpop.f32.mrb[41].mxu1  ;;  %v4810_v44 = vadd.f32 %v7175_v31, %v4793_v47  ;;  %v6262_v28 = vld [vmem:[%s9773_s5 + $0x228] sm:$0xff]  ;;  %v6201_v31 = vld [vmem:[%s9772_s4 + $0x600] sm:$0xff] }
 0xede   :  { %8054 = vpow2.f32 %v6199_v30  ;;  %v4809_v46 = vadd.f32 %v4788_v35, %v4729_v32  ;;  %v6216_v30 = vld [vmem:[%s9772_s4 + $0x678] sm:$0xff]  ;;  %v6273_v32 = vld [vmem:[%s9771_s3 + $0x40] sm:$0xff] }
 0xedf   :  { %v4838_v51 = vmax.f32 %v4810_v44, 0.0 }
 0xee0   :  { %v7178_v33 = vpop.f32.mrb[42].mxu1  ;;  %v4837_v56 = vmax.f32 %v4809_v46, 0.0 }
 0xee1   :  { %v4739_v34 = vpop.f32.mrb[43].mxu1  ;;  %v4812_v52 = vadd.f32 %v7178_v33, %v4803_v49  ;;  %v6264_v33 = vld [vmem:[%s9773_s5 + $0x238] sm:$0xff] }
 0xee2   :  { %v4811_v57 = vadd.f32 %v4798_v50, %v4739_v34  ;;  %v6275_v34 = vld [vmem:[%s9771_s3 + $0x50] sm:$0xff] }
 0xee3   :  { %v8049_v36 = vpop.eup %8048  ;;  %v4840_v53 = vmax.f32 %v4812_v52, 0.0 }
 0xee4   :  { %v8051_v38 = vpop.eup %8050  ;;  %v4826_v42 = vadd.f32 1.0, %v8049_v36  ;;  %v4839_v62 = vmax.f32 %v4811_v57, 0.0  ;;  %v6274_v36 = vld [vmem:[%s9771_s3 + $0x48] sm:$0xff] }
 0xee5   :  { %v4825_v43 = vadd.f32 1.0, %v8051_v38  ;;  %v5537_v38 = vld [vmem:[%s9774_s7] sm:$0xff] }
 0xee6   :  { %8056 = vrcp.f32 %v4826_v42  ;;  %v6276_v42 = vld [vmem:[%s9771_s3 + $0x58] sm:$0xff] }
 0xee7   :  { %v8053_v37 = vpop.eup %8052  ;;  %8058 = vrcp.f32 %v4825_v43  ;;  %v5538_v43 = vld [vmem:[%s9774_s7 + $0x8] sm:$0xff] }
 0xee8   :  { %v8055_v40 = vpop.eup %8054  ;;  %v4828_v48 = vadd.f32 1.0, %v8053_v37 }
 0xee9   :  { %v4827_v39 = vadd.f32 1.0, %v8055_v40 }
 0xeea   :  { %8060 = vrcp.f32 %v4828_v48 }
 0xeeb   :  { %8062 = vrcp.f32 %v4827_v39 }
 0xef0   :  { %v8057_v55 = vpop.eup %8056 }
 0xef1   :  { %v8059_v58 = vpop.eup %8058  ;;  %v4842_v59 = vmul.f32 %v8057_v55, %v4838_v51  ;;  %v4846_v41 = vsub.f32 1.0, %v8057_v55 }
 0xef2   :  { %v4841_v45 = vmul.f32 %v8059_v58, %v4837_v56  ;;  %v4845_v60 = vsub.f32 1.0, %v8059_v58  ;;  %v6202_v58 = vld [vmem:[%s9772_s4 + $0x608] sm:$0xff] }
 0xef3   :  { %v4850_v14 = vmul.f32 %v4846_v41, %v9402_v6 }
 0xef4   :  { %v8061_v54 = vpop.eup %8060  ;;  %v4849_v61 = vmul.f32 %v4845_v60, %v9404_v12  ;;  %v6206_v60 = vld [vmem:[%s9772_s4 + $0x628] sm:$0xff] }
 0xef5   :  { %v8063_v27 = vpop.eup %8062  ;;  %v9562_v5 = vadd.f32 %v4850_v14, %v4842_v59  ;;  %v4844_v7 = vmul.f32 %v8061_v54, %v4840_v53  ;;  %v4848_v63 = vsub.f32 1.0, %v8061_v54  ;;  %v6203_v59 = vld [vmem:[%s9772_s4 + $0x610] sm:$0xff]  ;;  %v6208_v53 = vld [vmem:[%s9772_s4 + $0x638] sm:$0xff]  ;;  %v6238_v54 = vld [vmem:[%s9772_s4 + $0x688] sm:$0xff] }
 0xef6   :  { %v9564_v1 = vadd.f32 %v4849_v61, %v4841_v45  ;;  %v4843_v2 = vmul.f32 %v8063_v27, %v4839_v62  ;;  %v4847_v17 = vsub.f32 1.0, %v8063_v27  ;;  %v6205_v45 = vld [vmem:[%s9772_s4 + $0x620] sm:$0xff]  ;;  %v6207_v14 = vld [vmem:[%s9772_s4 + $0x630] sm:$0xff]  ;;  %v6240_v62 = vld [vmem:[%s9772_s4 + $0x698] sm:$0xff] }
 0xef7   :  { %v4852_v3 = vmul.f32 %v4848_v63, %v9412_v4  ;;  %v6239_v61 = vld [vmem:[%s9772_s4 + $0x690] sm:$0xff]  ;;  %v6241_v27 = vld [vmem:[%s9772_s4 + $0x6a0] sm:$0xff] }
 0xef8   :  { %v4851_v18 = vmul.f32 %v4847_v17, %v9414_v8  ;;  %v7916_v6 = vpack.i.bf16 %v9562_v5, %v9564_v1  ;;  %v7552_v12 = vpack.c.bf16 %v9562_v5, %v9564_v1  ;;  %v6257_v8 = vld [vmem:[%s9773_s5 + $0x200] sm:$0xff]  ;;  %v6243_v63 = vld [vmem:[%s9772_s4 + $0x6b0] sm:$0xff] }
 0xef9   :  { %v9572_v9 = vadd.f32 %v4852_v3, %v4844_v7  ;;  %v6242_v7 = vld [vmem:[%s9772_s4 + $0x6a8] sm:$0xff]  ;;  %v6269_v17 = vld [vmem:[%s9770_s2 + $0x40] sm:$0xff] }
 0xefa   :  { %v9574_v11 = vadd.f32 %v4851_v18, %v4843_v2  ;;  %7917 = vrot.lane.b32.xlu0 %v7916_v6, %s8082_s0  ;;  %7553 = vmatprep.subr.bf16.mxu0 %v7552_v12  ;;  %v6244_v2 = vld [vmem:[%s9772_s4 + $0x6b8] sm:$0xff] }
 0xefb   :  { %7555 = vmatpush3.bf16.msra.mxu0 %v7552_v12 }
 0xefc   :  { %v7921_v16 = vpack.i.bf16 %v9572_v9, %v9574_v11  ;;  %v7556_v4 = vpack.c.bf16 %v9572_v9, %v9574_v11 }
 0xefe   :  { %7927 = vrot.lane.b32.xlu0 %v7916_v6, %s8083_s9  ;;  %7922 = vrot.lane.b32.xlu1 %v7921_v16, %s8082_s0 }
 0xeff   :  { %7557 = vmatprep.subr.bf16.mxu0 %v7556_v4 }
 0xf00   :  { %7559 = vmatpush3.bf16.msra.mxu0 %v7556_v4 }
 0xf02   :  { %5314 = vperm.xlu0 %7754, %v6257_v8   ;;  %7932 = vrot.lane.b32.xlu1 %v7921_v16, %s8083_s9 }
 0xf03   :  { %7188 = vmatmul.mubr.msk.f32.vlgmr.msra.gmra.mrb[32].mxu0 %vm9899_vm7, %v6210_v22  ;;  %vm9914_vm7 = vmmov %vm9798_vm0 }
 0xf04   :  { %7190 = vmatprep.mubr.msk.f32.mxu0 %vm9900_vm3, %v6211_v25  ;;  %vm9915_vm3 = vmmov %vm9798_vm0 }
 0xf06   :  { %5324 = vperm.xlu0 %7754, %v6259_v26   ;;  %5319 = vperm.xlu1 %7755, %v6258_v15  }
 0xf07   :  { %7191 = vmatmul.mubr.msk.f32.gmra.mrb[34].mxu0 %vm9901_vm10, %v6212_v24  ;;  %vm9916_vm10 = vmmov %vm9798_vm0 }
 0xf08   :  { %7193 = vmatprep.mubr.msk.f32.mxu0 %vm9902_vm6, %v6213_v13  ;;  %vm9917_vm6 = vmmov %vm9798_vm0 }
 0xf0a   :  { %5334 = vperm.xlu0 %7754, %v6261_v29   ;;  %5329 = vperm.xlu1 %7755, %v6260_v20  }
 0xf0b   :  { %7194 = vmatmul.mubr.msk.f32.gmra.mrb[36].mxu0 %vm9903_vm13, %v6214_v19  ;;  %vm9918_vm13 = vmmov %vm9798_vm0 }
 0xf0c   :  { %7196 = vmatprep.mubr.msk.f32.mxu0 %vm9904_vm14, %v6215_v21  ;;  %vm9919_vm14 = vmmov %vm9798_vm0 }
 0xf0e   :  { %5344 = vperm.xlu0 %7754, %v6263_v10   ;;  %5339 = vperm.xlu1 %7755, %v6262_v28  }
 0xf0f   :  { %7197 = vmatmul.mubr.msk.f32.gmra.mrb[38].mxu0 %vm9905_vm11, %v6216_v30  ;;  %vm9920_vm11 = vmmov %vm9798_vm0 }
 0xf10   :  { %7207 = vmatprep.mubr.msk.f32.mxu0 %vm9906_vm15, %v6201_v31  ;;  %vm9921_vm15 = vmmov %vm9798_vm0 }
 0xf11   :  { %7247 = vmatprep.mubr.msk.f32.mxu1 %vm9921_vm15, %v6269_v17 }
 0xf12   :  { %5416 = vperm.xlu0 %7754, %v6273_v32   ;;  %5349 = vperm.xlu1 %7755, %v6264_v33  }
 0xf16   :  { %5426 = vperm.xlu0 %7754, %v6275_v34   ;;  %5421 = vperm.xlu1 %7755, %v6274_v36  }
 0xf1a   :  { %5541 = vperm.xlu0 %7754, %v5537_v38   ;;  %5431 = vperm.xlu1 %7755, %v6276_v42  }
 0xf1e   :  { %5546 = vperm.xlu1 %7755, %v5538_v43  }
 0xf6c   :  { %v7918_v37 = vpop.permute.xlu0 %7917 }
 0xf6d   :  { %v7920_v40 = vunpack.i.h.bf16 %v7918_v37  ;;  %v7919_v47 = vunpack.i.l.bf16 %v7918_v37 }
 0xf6f   :  { %v7560_v48 = vpack.c.bf16 %v7920_v40, %v7919_v47 }
 0xf70   :  { %v7928_v35 = vpop.permute.xlu0 %7927  ;;  %v7923_v39 = vpop.permute.xlu1 %7922 }
 0xf71   :  { %v7930_v44 = vunpack.i.h.bf16 %v7928_v35  ;;  %v7929_v46 = vunpack.i.l.bf16 %v7928_v35  ;;  %v7925_v49 = vunpack.i.h.bf16 %v7923_v39  ;;  %v7924_v50 = vunpack.i.l.bf16 %v7923_v39  ;;  %7562 = vmatprep.subr.msk.bf16.mxu0 %vm8273_vm8, %v7560_v48 }
 0xf72   :  { %7565 = vmatpush3.bf16.msk.msra.mxu0 %vm8273_vm8, %v7560_v48 }
 0xf73   :  { %v7566_v51 = vpack.c.bf16 %v7925_v49, %v7924_v50  ;;  %v7572_v55 = vpack.c.bf16 %v7930_v44, %v7929_v46 }
 0xf74   :  { %v7933_v52 = vpop.permute.xlu1 %7932 }
 0xf75   :  { %v7935_v56 = vunpack.i.h.bf16 %v7933_v52  ;;  %v7934_v57 = vunpack.i.l.bf16 %v7933_v52  ;;  %7568 = vmatprep.subr.msk.bf16.mxu0 %vm8273_vm8, %v7566_v51 }
 0xf76   :  { %7571 = vmatpush3.bf16.msk.msra.mxu0 %vm8273_vm8, %v7566_v51  ;;  %vm9908_vm8 = vmmov %vm9798_vm0 }
 0xf77   :  { %7574 = vmatprep.subr.msk.bf16.mxu0 %vm8284_vm12, %v7572_v55  ;;  %v7578_v41 = vpack.c.bf16 %v7935_v56, %v7934_v57 }
 0xf79   :  { %7208 = vmatmul.mubr.msk.f32.vlgmr.msra.gmra.mrb[32].mxu0 %vm9798_vm0, %v6202_v58 }
 0xf7a   :  { %7577 = vmatpush3.bf16.msk.msra.mxu0 %vm8284_vm12, %v7572_v55  ;;  %7210 = vmatprep.mubr.msk.f32.mxu0 %vm9907_vm5, %v6203_v59  ;;  %vm9922_vm5 = vmmov %vm9798_vm0 }
 0xf7b   :  { %7580 = vmatprep.subr.msk.bf16.mxu0 %vm8284_vm12, %v7578_v41 }
 0xf7d   :  { %7211 = vmatmul.mubr.msk.f32.gmra.mrb[34].mxu0 %vm9908_vm8, %v6204_v0  ;;  %vm9923_vm8 = vmmov %vm9798_vm0 }
 0xf7e   :  { %7583 = vmatpush3.bf16.msk.msra.mxu0 %vm8284_vm12, %v7578_v41  ;;  %7213 = vmatprep.mubr.msk.f32.mxu0 %vm9909_vm4, %v6205_v45  ;;  %vm9912_vm12 = vmmov %vm9798_vm0 }
 0xf7f   :  { %vm9924_vm4 = vmmov %vm9798_vm0 }
 0xf81   :  { %7214 = vmatmul.mubr.msk.f32.gmra.mrb[36].mxu0 %vm9910_vm9, %v6206_v60  ;;  %v5315_v18 = vpop.permute.xlu0 %5314  ;;  %vm9925_vm9 = vmmov %vm9798_vm0 }
 0xf82   :  { %7216 = vmatprep.mubr.msk.f32.mxu0 %vm9911_vm2, %v6207_v14 }
 0xf85   :  { %7217 = vmatmul.mubr.msk.f32.gmra.mrb[38].mxu0 %vm9912_vm12, %v6208_v53  ;;  %v5320_v3 = vpop.permute.xlu1 %5319  ;;  %v5325_v15 = vpop.permute.xlu0 %5324 }
 0xf86   :  { %7227 = vmatprep.mubr.msk.f32.mxu0 %vm9913_vm1, %v6237_v23 }
 0xf89   :  { %7228 = vmatmul.mubr.msk.f32.vlgmr.msra.gmra.mrb[32].mxu0 %vm9914_vm7, %v6238_v54  ;;  %v5330_v22 = vpop.permute.xlu1 %5329  ;;  %v5335_v37 = vpop.permute.xlu0 %5334 }
 0xf8a   :  { %7230 = vmatprep.mubr.msk.f32.mxu0 %vm9915_vm3, %v6239_v61 }
 0xf8d   :  { %7231 = vmatmul.mubr.msk.f32.gmra.mrb[34].mxu0 %vm9916_vm10, %v6240_v62  ;;  %v5340_v42 = vpop.permute.xlu1 %5339  ;;  %v5345_v39 = vpop.permute.xlu0 %5344 }
 0xf8e   :  { %7233 = vmatprep.mubr.msk.f32.mxu0 %vm9917_vm6, %v6241_v27 }
 0xf91   :  { %7234 = vmatmul.mubr.msk.f32.gmra.mrb[36].mxu0 %vm9918_vm13, %v6242_v7  ;;  %v5350_v35 = vpop.permute.xlu1 %5349 }
 0xf92   :  { %7236 = vmatprep.mubr.msk.f32.mxu0 %vm9919_vm14, %v6243_v63 }
 0xf95   :  { %7237 = vmatmul.mubr.msk.f32.gmra.mrb[38].mxu0 %vm9920_vm11, %v6244_v2 }
0x105c   :  { %v7229_v6 = vpop.f32.mrb[32].mxu0 }
0x105d   :  { %v5353_v12 = vadd.f32 %v7229_v6, %v5320_v3  ;;  %v5256_v16 = vpop.f32.mrb[33].mxu0  ;;  %v5422_v6 = vpop.permute.xlu1 %5421 }
0x105e   :  { %v5352_v4 = vadd.f32 %v5315_v18, %v5256_v16  ;;  %v6271_v18 = vld [vmem:[%s9770_s2 + $0x50] sm:$0xff] }
0x105f   :  { %v6266_v8 = vmul.f32 -1.442695, %v5353_v12  ;;  %v5417_v12 = vpop.permute.xlu0 %5416 }
0x1060   :  { %v6265_v25 = vmul.f32 -1.442695, %v5352_v4  ;;  %v7232_v26 = vpop.f32.mrb[34].mxu0 }
0x1061   :  { %8064 = vpow2.f32 %v6266_v8  ;;  %v5355_v24 = vadd.f32 %v7232_v26, %v5330_v22  ;;  %v5266_v13 = vpop.f32.mrb[35].mxu0  ;;  %v5432_v26 = vpop.permute.xlu1 %5431 }
0x1062   :  { %8066 = vpow2.f32 %v6265_v25  ;;  %v5354_v29 = vadd.f32 %v5325_v15, %v5266_v13 }
0x1063   :  { %v6268_v20 = vmul.f32 -1.442695, %v5355_v24  ;;  %v5427_v13 = vpop.permute.xlu0 %5426 }
0x1064   :  { %v6267_v19 = vmul.f32 -1.442695, %v5354_v29  ;;  %v7235_v21 = vpop.f32.mrb[36].mxu0 }
0x1065   :  { %8068 = vpow2.f32 %v6268_v20  ;;  %v5276_v10 = vpop.f32.mrb[37].mxu0  ;;  %v5357_v47 = vadd.f32 %v7235_v21, %v5340_v42 }
0x1066   :  { %8070 = vpow2.f32 %v6267_v19  ;;  %v5356_v48 = vadd.f32 %v5335_v37, %v5276_v10 }
0x1067   :  { %v5385_v44 = vmax.f32 %v5357_v47, 0.0 }
0x1068   :  { %v7238_v28 = vpop.f32.mrb[38].mxu0  ;;  %v5384_v50 = vmax.f32 %v5356_v48, 0.0 }
0x1069   :  { %v5286_v30 = vpop.f32.mrb[39].mxu0  ;;  %v5359_v46 = vadd.f32 %v7238_v28, %v5350_v35 }
0x106a   :  { %v5358_v51 = vadd.f32 %v5345_v39, %v5286_v30 }
0x106b   :  { %v8065_v31 = vpop.eup %8064  ;;  %v5387_v41 = vmax.f32 %v5359_v46, 0.0 }
0x106c   :  { %v8067_v32 = vpop.eup %8066  ;;  %v5373_v33 = vadd.f32 1.0, %v8065_v31  ;;  %v5386_v60 = vmax.f32 %v5358_v51, 0.0  ;;  %v5536_v31 = vld [vmem:[%s9775_s6 + $0x8] sm:$0xff] }
0x106d   :  { %v5372_v34 = vadd.f32 1.0, %v8067_v32  ;;  %v5547_v32 = vpop.permute.xlu1 %5546 }
0x106e   :  { %8072 = vrcp.f32 %v5373_v33 }
0x106f   :  { %v8069_v36 = vpop.eup %8068  ;;  %8074 = vrcp.f32 %v5372_v34  ;;  %v5542_v34 = vpop.permute.xlu0 %5541 }
0x1070   :  { %v8071_v38 = vpop.eup %8070  ;;  %v5375_v43 = vadd.f32 1.0, %v8069_v36 }
0x1071   :  { %v5374_v40 = vadd.f32 1.0, %v8071_v38 }
0x1072   :  { %8076 = vrcp.f32 %v5375_v43 }
0x1073   :  { %8078 = vrcp.f32 %v5374_v40 }
0x1078   :  { %v8073_v49 = vpop.eup %8072 }
0x1079   :  { %v8075_v52 = vpop.eup %8074  ;;  %v5389_v55 = vmul.f32 %v8073_v49, %v5385_v44  ;;  %v5393_v56 = vsub.f32 1.0, %v8073_v49 }
0x107a   :  { %v5388_v57 = vmul.f32 %v8075_v52, %v5384_v50  ;;  %v5392_v58 = vsub.f32 1.0, %v8075_v52 }
0x107b   :  { %v5397_v59 = vmul.f32 %v5393_v56, %v9562_v5 }
0x107c   :  { %v8077_v0 = vpop.eup %8076  ;;  %v5396_v45 = vmul.f32 %v5392_v58, %v9564_v1  ;;  %v6270_v1 = vld [vmem:[%s9770_s2 + $0x48] sm:$0xff] }
0x107d   :  { %v8079_v14 = vpop.eup %8078  ;;  %v5401_v53 = vadd.f32 %v5397_v59, %v5389_v55  ;;  %v5391_v23 = vmul.f32 %v8077_v0, %v5387_v41  ;;  %v5395_v54 = vsub.f32 1.0, %v8077_v0 }
0x107e   :  { %v5400_v61 = vadd.f32 %v5396_v45, %v5388_v57  ;;  %v5390_v62 = vmul.f32 %v8079_v14, %v5386_v60  ;;  %v5394_v27 = vsub.f32 1.0, %v8079_v14 }
0x107f   :  { %v5399_v7 = vmul.f32 %v5395_v54, %v9572_v9  ;;  %v6272_v9 = vld [vmem:[%s9770_s2 + $0x58] sm:$0xff] }
0x1080   :  { %v5398_v63 = vmul.f32 %v5394_v27, %v9574_v11  ;;  %v7584_v2 = vpack.c.bf16 %v5401_v53, %v5400_v61  ;;  %v5535_v11 = vld [vmem:[%s9775_s6] sm:$0xff] }
0x1081   :  { %v5403_v17 = vadd.f32 %v5399_v7, %v5391_v23 }
0x1082   :  { %v5402_v3 = vadd.f32 %v5398_v63, %v5390_v62  ;;  %7585 = vmatprep.subr.bf16.mxu1 %v7584_v2 }
0x1083   :  { %7587 = vmatpush3.bf16.msra.mxu1 %v7584_v2 }
0x1084   :  { %v7588_v5 = vpack.c.bf16 %v5403_v17, %v5402_v3 }
0x1086   :  { %7589 = vmatprep.subr.bf16.mxu1 %v7588_v5 }
0x1087   :  { %7591 = vmatpush3.bf16.msra.mxu1 %v7588_v5 }
0x108a   :  { %7248 = vmatmul.mubr.msk.f32.vlgmr.msra.gmra.mrb[44].mxu1 %vm9798_vm0, %v6270_v1 }
0x108b   :  { %7250 = vmatprep.mubr.msk.f32.mxu1 %vm9922_vm5, %v6271_v18 }
0x108e   :  { %7251 = vmatmul.mubr.msk.f32.gmra.mrb[46].mxu1 %vm9923_vm8, %v6272_v9 }
0x108f   :  { %7261 = vmatprep.mubr.msk.f32.mxu1 %vm9924_vm4, %v5535_v11 }
0x115d   :  { %v7249_v16 = vpop.f32.mrb[44].mxu1 }
0x115e   :  { %v5518_v4 = vadd.f32 %v7249_v16, %v5422_v6  ;;  %v5512_v8 = vpop.f32.mrb[45].mxu1 }
0x115f   :  { %v5513_v22 = vadd.f32 %v5512_v8, %v5417_v12 }
0x1160   :  { %v5532_v25 = vmax.f32 %v5518_v4, 0.0 }
0x1161   :  { %v5531_v15 = vmax.f32 %v5513_v22, 0.0  ;;  %v7252_v24 = vpop.f32.mrb[46].mxu1 }
0x1162   :  { %v5528_v29 = vadd.f32 %v7252_v24, %v5432_v26  ;;  %v5522_v20 = vpop.f32.mrb[47].mxu1 }
0x1163   :  { %v7592_v19 = vpack.c.bf16 %v5532_v25, %v5531_v15  ;;  %v5523_v21 = vadd.f32 %v5522_v20, %v5427_v13 }
0x1164   :  { %v5534_v10 = vmax.f32 %v5528_v29, 0.0 }
0x1165   :  { %v5533_v28 = vmax.f32 %v5523_v21, 0.0  ;;  %7593 = vmatprep.subr.bf16.mxu1 %v7592_v19 }
0x1166   :  { %7595 = vmatpush3.bf16.msra.mxu1 %v7592_v19 }
0x1167   :  { %v7596_v30 = vpack.c.bf16 %v5534_v10, %v5533_v28 }
0x1169   :  { %7597 = vmatprep.subr.bf16.mxu1 %v7596_v30 }
0x116a   :  { %7599 = vmatpush3.bf16.msra.mxu1 %v7596_v30 }
0x116d   :  { %7262 = vmatmul.mubr.msk.f32.vlgmr.msra.gmra.mrb[48].mxu1 %vm9925_vm9, %v5536_v31 }
0x1240   :  { %v7263_v33 = vpop.f32.mrb[48].mxu1 }
0x1241   :  { %v5627_v36 = vadd.f32 %v7263_v33, %v5547_v32  ;;  %v5621_v38 = vpop.f32.mrb[49].mxu1 }
0x1242   :  { %v5622_v42 = vadd.f32 %v5621_v38, %v5542_v34 }
0x1243   :  { %5631 = vst [vmem:[%s9776_s8 + $0x8] sm:$0xff] %v5627_v36 }
0x1244   :  { %5630 = vst [vmem:[%s9776_s8] sm:$0xff] %v5622_v42 }

</bundles_post_ra>
